<compile_context>
chip_gen: v7x
topology: tpu7x:2x2x1
jax: 0.10.0
libtpu: 0.0.40
codegen_flags: <defaults>
</compile_context>

<pallas_src>
import jax
import jax.numpy as jnp
import numpy as np
from jax.experimental import pallas as pl
from jax.experimental.pallas import tpu as pltpu

MAP_SHAPE = (1, 80, 40)
IN_FEATURES = int(np.prod(MAP_SHAPE))   # 3200
H1, H2, OUT = 512, 256, 1
OUT_PAD = 128                           # pad last layer to a full lane width


def _leaky_relu(x, slope=0.2):
    return jnp.where(x > 0, x, slope * x)


def discriminator_kernel(x_ref, w1_ref, b1_ref, w2_ref, b2_ref, w3_ref, b3_ref,
                         out_ref):
    # x tile arrives as f32 (halves x-path HBM traffic vs a wrapper pre-cast
    # pass); cast to bf16 on-chip for the MXU. Biases / accumulation in f32.
    x = x_ref[...].astype(jnp.bfloat16)

    # Linear(3200, 512) + LeakyReLU(0.2)
    h1 = jnp.dot(x, w1_ref[...], preferred_element_type=jnp.float32) + b1_ref[...]
    h1 = _leaky_relu(h1).astype(jnp.bfloat16)

    # Linear(512, 256) + LeakyReLU(0.2)
    h2 = jnp.dot(h1, w2_ref[...], preferred_element_type=jnp.float32) + b2_ref[...]
    h2 = _leaky_relu(h2).astype(jnp.bfloat16)

    # Linear(256, 1) + Sigmoid — W3 padded to (256, 128) so the output store is
    # lane-dense (unmasked vst); wrapper keeps only column 0.
    logits = jnp.dot(h2, w3_ref[...], preferred_element_type=jnp.float32) + b3_ref[...]
    out_ref[...] = jax.nn.sigmoid(logits).astype(out_ref.dtype)


def _round_up(x, m):
    return (x + m - 1) // m * m


def _choose_tb(batch, tb_max):
    """Pick a batch tile (multiple of 16) that divides the 16-rounded batch,
    is <= tb_max, and leaves >= 2 grid steps when possible (v7x 2-TC sharding)."""
    b16 = _round_up(batch, 16)
    cap = min(tb_max, b16)
    if b16 >= 32:
        cap = min(cap, max(16, (b16 // 2) // 16 * 16))
    for tb in range(cap, 15, -16):
        if b16 % tb == 0:
            return tb
    return cap


def prepare_params(params):
    """One-time conversion of f32 params into the kernel-ready pytree:
    bf16 W1/W2, W3/b3 padded to 128 output lanes (W3 in bf16)."""
    w1, b1, w2, b2, w3, b3 = params
    w1b = w1.astype(jnp.bfloat16)
    w2b = w2.astype(jnp.bfloat16)
    w3p = jnp.pad(w3, ((0, 0), (0, OUT_PAD - OUT))).astype(jnp.bfloat16)
    b3p = jnp.pad(b3, ((0, 0), (0, OUT_PAD - OUT)))
    return (w1b, b1, w2b, b2, w3p, b3p)


def discriminator_forward(img, prepared_params, *, tb_max=512):
    """img: (B, 1, 80, 40) float32 (NCHW). prepared_params: from prepare_params().
    Returns (B, 1) float32 in (0, 1)."""
    w1b, b1, w2b, b2, w3p, b3p = prepared_params
    B = img.shape[0]
    x = img.reshape(B, -1)                       # same flatten as torch .view, stays f32

    TB = _choose_tb(B, tb_max)
    B_pad = _round_up(B, TB)
    if B_pad != B:                               # only when B is not a multiple of 16
        x = jnp.pad(x, ((0, B_pad - B), (0, 0)))

    grid = (B_pad // TB,)

    # Weights/biases: constant block index across the batch grid, and single
    # buffered — double-buffering an input that never changes wastes VMEM.
    def resident(shape):
        return pl.BlockSpec(shape, lambda i: (0, 0),
                            pipeline_mode=pl.Buffered(1))

    flops = 2 * B_pad * (IN_FEATURES * H1 + H1 * H2 + H2 * OUT_PAD)
    bytes_accessed = (x.size * 4
                      + w1b.size * 2 + w2b.size * 2 + w3p.size * 2
                      + b1.size * 4 + b2.size * 4 + b3p.size * 4
                      + B_pad * OUT_PAD * 2)

    out = pl.pallas_call(
        discriminator_kernel,
        out_shape=jax.ShapeDtypeStruct((B_pad, OUT_PAD), jnp.bfloat16),
        grid=grid,
        in_specs=[
            pl.BlockSpec((TB, IN_FEATURES), lambda i: (i, 0)),   # x: streamed f32
            resident((IN_FEATURES, H1)), resident((1, H1)),
            resident((H1, H2)),          resident((1, H2)),
            resident((H2, OUT_PAD)),     resident((1, OUT_PAD)),
        ],
        out_specs=pl.BlockSpec((TB, OUT_PAD), lambda i: (i, 0)),
        compiler_params=pltpu.CompilerParams(
            dimension_semantics=("parallel",),
            # f32 x double-buffer at TB=512 is ~13 MiB; raise above v5e's
            # 16 MiB scoped default, still well under v7x's 64 MiB VMEM.
            vmem_limit_bytes=32 * 1024 * 1024),
        cost_estimate=pl.CostEstimate(
            flops=flops,
            transcendentals=B_pad * OUT_PAD,
            bytes_accessed=bytes_accessed),
    )(x, w1b, b1, w2b, b2, w3p, b3p)

    return out[:B, :OUT].astype(jnp.float32)


def init_params(key):
    """Deterministic init matching the PyTorch module:
       - weights: xavier_uniform_ (limit = sqrt(6/(fan_in+fan_out)))
       - biases : PyTorch Linear default, U(-1/sqrt(fan_in), 1/sqrt(fan_in))
       Weights stored as (in, out) — i.e. already transposed vs torch."""
    keys = jax.random.split(key, 6)

    def xavier(k, fan_in, fan_out):
        limit = float(np.sqrt(6.0 / (fan_in + fan_out)))
        return jax.random.uniform(k, (fan_in, fan_out), jnp.float32,
                                  minval=-limit, maxval=limit)

    def bias(k, fan_in, fan_out):
        bound = 1.0 / float(np.sqrt(fan_in))
        return jax.random.uniform(k, (1, fan_out), jnp.float32,
                                  minval=-bound, maxval=bound)

    w1 = xavier(keys[0], IN_FEATURES, H1)
    b1 = bias(keys[1], IN_FEATURES, H1)
    w2 = xavier(keys[2], H1, H2)
    b2 = bias(keys[3], H1, H2)
    w3 = xavier(keys[4], H2, OUT)
    b3 = bias(keys[5], H2, OUT)
    return (w1, b1, w2, b2, w3, b3)


def _reference_forward(img, params):
    """Pure-JAX f32 reference of the PyTorch forward."""
    w1, b1, w2, b2, w3, b3 = params
    x = img.reshape(img.shape[0], -1)
    h1 = _leaky_relu(x @ w1 + b1)
    h2 = _leaky_relu(h1 @ w2 + b2)
    return jax.nn.sigmoid(h2 @ w3 + b3)


if __name__ == "__main__":
    key = jax.random.PRNGKey(0)
    k_img, k_params = jax.random.split(key)

    params = init_params(k_params)
    prepared = prepare_params(params)   # one-time bf16 cast / 128-lane pad

    # Case 1: tiny batch (single grid step, batch padded 2 -> 16).
    # Case 2: B > TB and B not a multiple of 16 (multi-step pipeline + pad/slice).
    for B in (2, 40):
        img = jax.random.normal(k_img, (B, *MAP_SHAPE), dtype=jnp.float32)  # NCHW
        out = jax.block_until_ready(discriminator_forward(img, prepared))

        assert out.shape == (B, OUT)
        assert out.dtype == jnp.float32
        assert bool(jnp.all(jnp.isfinite(out)))
        assert bool(jnp.all((out >= 0.0) & (out <= 1.0)))  # sigmoid range

        # bf16 weights/activations in the kernel vs. f32 reference -> small tol.
        expected = _reference_forward(img, params)
        np.testing.assert_allclose(np.asarray(out), np.asarray(expected),
                                   atol=5e-2)

    print("KERNEL_OK")
</pallas_src>

<mosaic_0001>
module attributes {stable_mosaic.version = 11 : i64} {
  func.func @discriminator_kernel(%arg0: i32, %arg1: memref<16x3200xf32, #tpu.memory_space<vmem>>, %arg2: memref<3200x512xbf16, #tpu.memory_space<vmem>>, %arg3: memref<1x512xf32, #tpu.memory_space<vmem>>, %arg4: memref<512x256xbf16, #tpu.memory_space<vmem>>, %arg5: memref<1x256xf32, #tpu.memory_space<vmem>>, %arg6: memref<256x128xbf16, #tpu.memory_space<vmem>>, %arg7: memref<1x128xf32, #tpu.memory_space<vmem>>, %arg8: memref<16x128xbf16, #tpu.memory_space<vmem>>) attributes {dimension_semantics = [#tpu.dimension_semantics<parallel>], iteration_bounds = array<i64: 1>, scalar_prefetch = 0 : i64, scratch_operands = 0 : i64, tpu.core_type = #tpu.core_type<tc>, window_params = [{transform_indices = @transform_0, window_bounds = array<i64: 16, 3200>}, {pipeline_mode = #tpu.pipeline_mode<synchronous>, transform_indices = @transform_1, window_bounds = array<i64: 3200, 512>}, {pipeline_mode = #tpu.pipeline_mode<synchronous>, transform_indices = @transform_2, window_bounds = array<i64: 1, 512>}, {pipeline_mode = #tpu.pipeline_mode<synchronous>, transform_indices = @transform_3, window_bounds = array<i64: 512, 256>}, {pipeline_mode = #tpu.pipeline_mode<synchronous>, transform_indices = @transform_4, window_bounds = array<i64: 1, 256>}, {pipeline_mode = #tpu.pipeline_mode<synchronous>, transform_indices = @transform_5, window_bounds = array<i64: 256, 128>}, {pipeline_mode = #tpu.pipeline_mode<synchronous>, transform_indices = @transform_6, window_bounds = array<i64: 1, 128>}, {transform_indices = @transform_7, window_bounds = array<i64: 16, 128>}]} {
    %c0 = arith.constant 0 : index
    %c0_0 = arith.constant 0 : index
    %0 = vector.load %arg1[%c0, %c0_0] : memref<16x3200xf32, #tpu.memory_space<vmem>>, vector<16x3200xf32>
    %1 = arith.truncf %0 : vector<16x3200xf32> to vector<16x3200xbf16>
    %c0_1 = arith.constant 0 : index
    %c0_2 = arith.constant 0 : index
    %2 = vector.load %arg2[%c0_1, %c0_2] : memref<3200x512xbf16, #tpu.memory_space<vmem>>, vector<3200x512xbf16>
    %cst = arith.constant dense<0.000000e+00> : vector<16x512xf32>
    %3 = tpu.matmul %1, %2, %cst {dimension_numbers = #tpu.dot_dimension_numbers<[1], [0], [0], [1], [0, 0, 1, 1], [], []>} : vector<16x3200xbf16>, vector<3200x512xbf16>, vector<16x512xf32> -> vector<16x512xf32>
    %c0_3 = arith.constant 0 : index
    %c0_4 = arith.constant 0 : index
    %4 = vector.load %arg3[%c0_3, %c0_4] : memref<1x512xf32, #tpu.memory_space<vmem>>, vector<1x512xf32>
    %5 = vector.broadcast %4 : vector<1x512xf32> to vector<16x512xf32>
    %6 = arith.addf %3, %5 : vector<16x512xf32>
    %cst_5 = arith.constant 0.000000e+00 : f32
    %7 = vector.broadcast %cst_5 : f32 to vector<16x512xf32>
    %8 = arith.cmpf ogt, %6, %7 : vector<16x512xf32>
    %cst_6 = arith.constant 2.000000e-01 : f32
    %9 = vector.broadcast %cst_6 : f32 to vector<16x512xf32>
    %10 = arith.mulf %9, %6 : vector<16x512xf32>
    %11 = arith.select %8, %6, %10 : vector<16x512xi1>, vector<16x512xf32>
    %12 = arith.truncf %11 : vector<16x512xf32> to vector<16x512xbf16>
    %c0_7 = arith.constant 0 : index
    %c0_8 = arith.constant 0 : index
    %13 = vector.load %arg4[%c0_7, %c0_8] : memref<512x256xbf16, #tpu.memory_space<vmem>>, vector<512x256xbf16>
    %cst_9 = arith.constant dense<0.000000e+00> : vector<16x256xf32>
    %14 = tpu.matmul %12, %13, %cst_9 {dimension_numbers = #tpu.dot_dimension_numbers<[1], [0], [0], [1], [0, 0, 1, 1], [], []>} : vector<16x512xbf16>, vector<512x256xbf16>, vector<16x256xf32> -> vector<16x256xf32>
    %c0_10 = arith.constant 0 : index
    %c0_11 = arith.constant 0 : index
    %15 = vector.load %arg5[%c0_10, %c0_11] : memref<1x256xf32, #tpu.memory_space<vmem>>, vector<1x256xf32>
    %16 = vector.broadcast %15 : vector<1x256xf32> to vector<16x256xf32>
    %17 = arith.addf %14, %16 : vector<16x256xf32>
    %cst_12 = arith.constant 0.000000e+00 : f32
    %18 = vector.broadcast %cst_12 : f32 to vector<16x256xf32>
    %19 = arith.cmpf ogt, %17, %18 : vector<16x256xf32>
    %cst_13 = arith.constant 2.000000e-01 : f32
    %20 = vector.broadcast %cst_13 : f32 to vector<16x256xf32>
    %21 = arith.mulf %20, %17 : vector<16x256xf32>
    %22 = arith.select %19, %17, %21 : vector<16x256xi1>, vector<16x256xf32>
    %23 = arith.truncf %22 : vector<16x256xf32> to vector<16x256xbf16>
    %c0_14 = arith.constant 0 : index
    %c0_15 = arith.constant 0 : index
    %24 = vector.load %arg6[%c0_14, %c0_15] : memref<256x128xbf16, #tpu.memory_space<vmem>>, vector<256x128xbf16>
    %cst_16 = arith.constant dense<0.000000e+00> : vector<16x128xf32>
    %25 = tpu.matmul %23, %24, %cst_16 {dimension_numbers = #tpu.dot_dimension_numbers<[1], [0], [0], [1], [0, 0, 1, 1], [], []>} : vector<16x256xbf16>, vector<256x128xbf16>, vector<16x128xf32> -> vector<16x128xf32>
    %c0_17 = arith.constant 0 : index
    %c0_18 = arith.constant 0 : index
    %26 = vector.load %arg7[%c0_17, %c0_18] : memref<1x128xf32, #tpu.memory_space<vmem>>, vector<1x128xf32>
    %27 = vector.broadcast %26 : vector<1x128xf32> to vector<16x128xf32>
    %28 = arith.addf %25, %27 : vector<16x128xf32>
    %29 = arith.negf %28 : vector<16x128xf32>
    %30 = math.exp %29 : vector<16x128xf32>
    %cst_19 = arith.constant 1.000000e+00 : f32
    %31 = vector.broadcast %cst_19 : f32 to vector<16x128xf32>
    %32 = arith.addf %31, %30 : vector<16x128xf32>
    %33 = arith.divf %31, %32 : vector<16x128xf32>
    %34 = arith.truncf %33 : vector<16x128xf32> to vector<16x128xbf16>
    %c0_20 = arith.constant 0 : index
    %c0_21 = arith.constant 0 : index
    %35 = vector.load %arg8[%c0_20, %c0_21] : memref<16x128xbf16, #tpu.memory_space<vmem>>, vector<16x128xbf16>
    tpu.vector_store %arg8[%c0_20, %c0_21], %34 {strides = array<i32>} : memref<16x128xbf16, #tpu.memory_space<vmem>>, vector<16x128xbf16>,
    return
  }
  func.func @transform_0(%arg0: i32) -> (i32, i32) {
    %c0_i32 = arith.constant 0 : i32
    %c0_i32_0 = arith.constant 0 : i32
    return %arg0, %c0_i32 : i32, i32
  }
  func.func @transform_1(%arg0: i32) -> (i32, i32) {
    %c0_i32 = arith.constant 0 : i32
    %c0_i32_0 = arith.constant 0 : i32
    %c0_i32_1 = arith.constant 0 : i32
    return %c0_i32, %c0_i32_0 : i32, i32
  }
  func.func @transform_2(%arg0: i32) -> (i32, i32) {
    %c0_i32 = arith.constant 0 : i32
    %c0_i32_0 = arith.constant 0 : i32
    %c0_i32_1 = arith.constant 0 : i32
    return %c0_i32, %c0_i32_0 : i32, i32
  }
  func.func @transform_3(%arg0: i32) -> (i32, i32) {
    %c0_i32 = arith.constant 0 : i32
    %c0_i32_0 = arith.constant 0 : i32
    %c0_i32_1 = arith.constant 0 : i32
    return %c0_i32, %c0_i32_0 : i32, i32
  }
  func.func @transform_4(%arg0: i32) -> (i32, i32) {
    %c0_i32 = arith.constant 0 : i32
    %c0_i32_0 = arith.constant 0 : i32
    %c0_i32_1 = arith.constant 0 : i32
    return %c0_i32, %c0_i32_0 : i32, i32
  }
  func.func @transform_5(%arg0: i32) -> (i32, i32) {
    %c0_i32 = arith.constant 0 : i32
    %c0_i32_0 = arith.constant 0 : i32
    %c0_i32_1 = arith.constant 0 : i32
    return %c0_i32, %c0_i32_0 : i32, i32
  }
  func.func @transform_6(%arg0: i32) -> (i32, i32) {
    %c0_i32 = arith.constant 0 : i32
    %c0_i32_0 = arith.constant 0 : i32
    %c0_i32_1 = arith.constant 0 : i32
    return %c0_i32, %c0_i32_0 : i32, i32
  }
  func.func @transform_7(%arg0: i32) -> (i32, i32) {
    %c0_i32 = arith.constant 0 : i32
    %c0_i32_0 = arith.constant 0 : i32
    return %arg0, %c0_i32 : i32, i32
  }
}

</mosaic_0001>

<bundles_post_ra>
// kernel: tpu_custom_call.1
= control target key start
LH: loop header
LB: loop body
LE: loop exit
PB: predicated region body
PF: predicated region fallthrough
CT: control target
= control target key end

     0   :  { %12 = vsyncpa [#allocation3], 0  ;;  %s9716_s0 = inlined_call_operand.hbm [shape: f32[16,3200], index: 0, kind: input, shape index: {}]   ;;  %s9717_s1 = inlined_call_operand.hbm [shape: bf16[3200,512], index: 1, kind: input, shape index: {}]   ;;  %s9718_s2 = inlined_call_operand.hbm [shape: f32[1,512], index: 2, kind: input, shape index: {}]   ;;  %s9719_s3 = inlined_call_operand.hbm [shape: bf16[512,256], index: 3, kind: input, shape index: {}]   ;;  %s9720_s4 = inlined_call_operand.hbm [shape: f32[1,256], index: 4, kind: input, shape index: {}]   ;;  %s9721_s5 = inlined_call_operand.hbm [shape: bf16[256,128], index: 5, kind: input, shape index: {}]   ;;  %s9722_s6 = inlined_call_operand.hbm [shape: f32[1,128], index: 6, kind: input, shape index: {}]   ;;  %s9723_s7 = inlined_call_operand.hbm [shape: bf16[16,128], index: 7, kind: output, shape index: {}]  }
   0x1   :  { %13 = vsyncpa [#allocation6], 0 }
   0x2   :  { %14 = vsyncpa [#allocation9], 0 }
   0x3   :  { %15 = vsyncpa [#allocation12], 0 }
   0x4   :  { %16 = vsyncpa [#allocation4], 0  ;;  %s9423_s24 = smov [#allocation5]   ;;  %s9237_s28 = scalar_lea.hbm %s9717_s1, 102400 }
   0x5   :  { %s34_s25 = sshll.u32 %s9423_s24, 4  ;;  %p9238_p0 = scmp.ne.s32.totalorder %s9717_s1, %s9237_s28  ;;  %s35_s25 = int_to_ptr.vmem [resolvable:$true] %s34_s25 }
   0x6   :  { %p9241_p1 = scmp.lt.u32.totalorder %s9237_s28, %s9717_s1 }
   0x8   :  { %p9243_p2 = pnand %p9241_p1, %p9238_p0 }
   0xa   :  { %9246 = shalt.err (!%p9243_p2)
}
   0xb   :  { %s9247_s10 = scalar_lea.vmem %s35_s25, 102400  ;;  %p9252_p4 = scmp.lt.s32.totalorder %s35_s25, %s35_s25 }
   0xc   :  { %p9248_p3 = scmp.ne.s32.totalorder %s35_s25, %s9247_s10  ;;  %p9253_p5 = scmp.lt.s32.totalorder %s9247_s10, %s9247_s10 }
   0xe   :  { %p9254_p6 = por %p9253_p5, %p9252_p4 }
  0x10   :  { %p9255_p7 = pnand %p9254_p6, %p9248_p3 }
  0x12   :  { %9258 = shalt.err (!%p9255_p7)
}
  0x13   :  { %s9424_s11 = smov 256   ;;  %s9425_s12 = smov 16  }
  0x14   :  { %40 = dma.hbm_to_vmem [thread:$0]  %s9717_s1, 102400, %s35_s25, [#allocation6], %s9424_s11, %s9424_s11, %s9425_s12  }
  0x15   :  { %s9426_s15 = smov [#allocation8]   ;;  %s9259_s19 = scalar_lea.hbm %s9719_s3, 8192 }
  0x16   :  { %s56_s16 = sshll.u32 %s9426_s15, 4  ;;  %p9260_p8 = scmp.ne.s32.totalorder %s9719_s3, %s9259_s19  ;;  %s57_s16 = int_to_ptr.vmem [resolvable:$true] %s56_s16 }
  0x17   :  { %p9263_p9 = scmp.lt.u32.totalorder %s9259_s19, %s9719_s3 }
  0x19   :  { %p9265_p10 = pnand %p9263_p9, %p9260_p8 }
  0x1b   :  { %9268 = shalt.err (!%p9265_p10)
}
  0x1c   :  { %s9269_s24 = scalar_lea.vmem %s57_s16, 8192  ;;  %p9274_p12 = scmp.lt.s32.totalorder %s57_s16, %s57_s16 }
  0x1d   :  { %p9270_p11 = scmp.ne.s32.totalorder %s57_s16, %s9269_s24  ;;  %p9275_p13 = scmp.lt.s32.totalorder %s9269_s24, %s9269_s24 }
  0x1f   :  { %p9276_p0 = por %p9275_p13, %p9274_p12 }
  0x21   :  { %p9277_p1 = pnand %p9276_p0, %p9270_p11 }
  0x23   :  { %9280 = shalt.err (!%p9277_p1)
}
  0x24   :  { %s9427_s1 = smov 128   ;;  %s9428_s25 = smov 8  }
  0x25   :  { %62 = dma.hbm_to_vmem [thread:$0]  %s9719_s3, 8192, %s57_s16, [#allocation9], %s9427_s1, %s9427_s1, %s9428_s25  }
  0x26   :  { %s9429_s28 = smov [#allocation11]   ;;  %s9281_s9 = scalar_lea.hbm %s9721_s5, 2048 }
  0x27   :  { %s78_s29 = sshll.u32 %s9429_s28, 4  ;;  %p9282_p2 = scmp.ne.s32.totalorder %s9721_s5, %s9281_s9  ;;  %s79_s29 = int_to_ptr.vmem [resolvable:$true] %s78_s29 }
  0x28   :  { %p9285_p3 = scmp.lt.u32.totalorder %s9281_s9, %s9721_s5 }
  0x2a   :  { %p9287_p4 = pnand %p9285_p3, %p9282_p2 }
  0x2c   :  { %9290 = shalt.err (!%p9287_p4)
}
  0x2d   :  { %s9291_s14 = scalar_lea.vmem %s79_s29, 2048  ;;  %p9296_p6 = scmp.lt.s32.totalorder %s79_s29, %s79_s29 }
  0x2e   :  { %p9292_p5 = scmp.ne.s32.totalorder %s79_s29, %s9291_s14  ;;  %p9297_p7 = scmp.lt.s32.totalorder %s9291_s14, %s9291_s14 }
  0x30   :  { %p9298_p8 = por %p9297_p7, %p9296_p6 }
  0x32   :  { %p9299_p9 = pnand %p9298_p8, %p9292_p5 }
  0x34   :  { %9302 = shalt.err (!%p9299_p9)
}
  0x35   :  { %s9430_s3 = smov 64   ;;  %s9431_s15 = smov 4  }
  0x36   :  { %84 = dma.hbm_to_vmem [thread:$0]  %s9721_s5, 2048, %s79_s29, [#allocation12], %s9430_s3, %s9430_s3, %s9431_s15  }
  0x37   :  { %s9432_s18 = smov [#allocation2]   ;;  %s9303_s22 = scalar_lea.hbm %s9716_s0, 6400 }
  0x38   :  { %s22_s19 = sshll.u32 %s9432_s18, 4  ;;  %p9304_p10 = scmp.ne.s32.totalorder %s9716_s0, %s9303_s22  ;;  %s23_s19 = int_to_ptr.vmem [resolvable:$true] %s22_s19 }
  0x39   :  { %p9307_p11 = scmp.lt.u32.totalorder %s9303_s22, %s9716_s0 }
  0x3b   :  { %p9309_p12 = pnand %p9307_p11, %p9304_p10 }
  0x3d   :  { %9312 = shalt.err (!%p9309_p12)
}
  0x3e   :  { %s9313_s26 = scalar_lea.vmem %s23_s19, 6400  ;;  %p9318_p0 = scmp.lt.s32.totalorder %s23_s19, %s23_s19 }
  0x3f   :  { %p9314_p13 = scmp.ne.s32.totalorder %s23_s19, %s9313_s26  ;;  %p9319_p1 = scmp.lt.s32.totalorder %s9313_s26, %s9313_s26 }
  0x41   :  { %p9320_p2 = por %p9319_p1, %p9318_p0 }
  0x43   :  { %p9321_p3 = pnand %p9320_p2, %p9314_p13 }
  0x45   :  { %9324 = shalt.err (!%p9321_p3)
}
  0x46   :  { %s9433_s5 = smov 3200   ;;  %s9434_s27 = smov 200  }
  0x47   :  { %28 = dma.hbm_to_vmem [thread:$0]  %s9716_s0, 6400, %s23_s19, [#allocation3], %s9433_s5, %s9433_s5, %s9434_s27  }
  0x48   :  { %s9435_s30 = smov [#allocation7]   ;;  %s9436_s9 = smov [#allocation10]  }
  0x49   :  { %s47_s8 = sshll.u32 %s9435_s30, 4  ;;  %s69_s10 = sshll.u32 %s9436_s9, 4  ;;  %s48_s8 = int_to_ptr.vmem [resolvable:$true] %s47_s8  ;;  %s70_s10 = int_to_ptr.vmem [resolvable:$true] %s69_s10 }
  0x4a   :  { %s9325_s13 = scalar_lea.hbm %s9718_s2, 64 }
  0x4b   :  { %p9326_p4 = scmp.ne.s32.totalorder %s9718_s2, %s9325_s13  ;;  %p9329_p5 = scmp.lt.u32.totalorder %s9325_s13, %s9718_s2 }
  0x4d   :  { %p9331_p6 = pnand %p9329_p5, %p9326_p4 }
  0x4f   :  { %9334 = shalt.err (!%p9331_p6)
}
  0x50   :  { %s9335_s0 = scalar_lea.vmem %s48_s8, 64  ;;  %p9340_p8 = scmp.lt.s32.totalorder %s48_s8, %s48_s8 }
  0x51   :  { %p9336_p7 = scmp.ne.s32.totalorder %s48_s8, %s9335_s0  ;;  %p9341_p9 = scmp.lt.s32.totalorder %s9335_s0, %s9335_s0 }
  0x53   :  { %p9342_p10 = por %p9341_p9, %p9340_p8 }
  0x55   :  { %p9343_p11 = pnand %p9342_p10, %p9336_p7 }
  0x57   :  { %9346 = shalt.err (!%p9343_p11)
}
  0x58   :  { %50 = dma.hbm_to_vmem [thread:$0]  %s9718_s2, 64, %s48_s8, [#allocation6]  }
  0x59   :  { %s9347_s23 = scalar_lea.hbm %s9720_s4, 32 }
  0x5a   :  { %p9348_p12 = scmp.ne.s32.totalorder %s9720_s4, %s9347_s23  ;;  %p9351_p13 = scmp.lt.u32.totalorder %s9347_s23, %s9720_s4 }
  0x5c   :  { %p9353_p0 = pnand %p9351_p13, %p9348_p12 }
  0x5e   :  { %9356 = shalt.err (!%p9353_p0)
}
  0x5f   :  { %s9357_s5 = scalar_lea.vmem %s70_s10, 32  ;;  %p9362_p2 = scmp.lt.s32.totalorder %s70_s10, %s70_s10 }
  0x60   :  { %p9358_p1 = scmp.ne.s32.totalorder %s70_s10, %s9357_s5  ;;  %p9363_p3 = scmp.lt.s32.totalorder %s9357_s5, %s9357_s5 }
  0x62   :  { %p9364_p4 = por %p9363_p3, %p9362_p2 }
  0x64   :  { %p9365_p5 = pnand %p9364_p4, %p9358_p1 }
  0x66   :  { %9368 = shalt.err (!%p9365_p5)
}
  0x67   :  { %72 = dma.hbm_to_vmem [thread:$0]  %s9720_s4, 32, %s70_s10, [#allocation9]  }
  0x68   :  { %s9437_s28 = smov [#allocation13]   ;;  %s9369_s9 = scalar_lea.hbm %s9722_s6, 16 }
  0x69   :  { %s91_s29 = sshll.u32 %s9437_s28, 4  ;;  %p9370_p6 = scmp.ne.s32.totalorder %s9722_s6, %s9369_s9  ;;  %s92_s29 = int_to_ptr.vmem [resolvable:$true] %s91_s29 }
  0x6a   :  { %p9373_p7 = scmp.lt.u32.totalorder %s9369_s9, %s9722_s6 }
  0x6c   :  { %p9375_p8 = pnand %p9373_p7, %p9370_p6 }
  0x6e   :  { %9378 = shalt.err (!%p9375_p8)
}
  0x6f   :  { %s9379_s16 = scalar_lea.vmem %s92_s29, 16  ;;  %s9383_s4 = scalar_lea.vmem %s92_s29, 32 }
  0x70   :  { %p9380_p9 = scmp.ne.s32.totalorder %s92_s29, %s9379_s16  ;;  %p9384_p10 = scmp.lt.s32.totalorder %s92_s29, %s92_s29 }
  0x71   :  { %p9385_p11 = scmp.lt.s32.totalorder %s9383_s4, %s9379_s16 }
  0x73   :  { %p9386_p12 = por %p9385_p11, %p9384_p10 }
  0x75   :  { %p9387_p13 = pnand %p9386_p12, %p9380_p9 }
  0x77   :  { %9390 = shalt.err (!%p9387_p13)
}
  0x78   :  { %94 = dma.hbm_to_vmem [thread:$0]  %s9722_s6, 16, %s92_s29, [#allocation12]  }
  0x79   :  { %9413 = dma.done.wait [#allocation3], 6400  }
  0x7a   :  { %9414 = vsyncadd [#allocation3], 4294960896 }
  0x7b   :  { %9415 = dma.done.wait [#allocation6], 102464  }
  0x7c   :  { %9416 = vsyncadd [#allocation6], 4294864832 }
  0x7d   :  { %9417 = dma.done.wait [#allocation9], 8224  }
  0x7e   :  { %9418 = vsyncadd [#allocation9], 4294959072 }
  0x7f   :  { %9419 = dma.done.wait [#allocation12], 2064  }
  0x80   :  { %9420 = vsyncadd [#allocation12], 4294965232  ;;  %v7917_v0 = vld [vmem:[#allocation5 + $0x4] ss:$16 sps:$4 sm:$0xff]   ;;  %v7921_v2 = vld [vmem:[#allocation5] ss:$16 sps:$4 sm:$0xff]  }
  0x81   :  { %v7919_v1 = vld [vmem:[#allocation5 + $0x204] ss:$16 sps:$4 sm:$0xff]   ;;  %5014 = vmatprep.subr.bf16.mxu1 %v7917_v0  ;;  %v7922_v3 = vld [vmem:[#allocation5 + $0x200] ss:$16 sps:$4 sm:$0xff]   ;;  %v118_v46 = vld [vmem:[#allocation2 + $0x8] sm:$0xff]  ;;  %s9439_s6 = smov [#allocation14]  }
  0x82   :  { %5057 = vmatprep.subr.bf16.mxu0 %v7919_v1  ;;  %v7923_v4 = vld [vmem:[#allocation5 + $0x24] ss:$16 sps:$4 sm:$0xff]   ;;  %5015 = vmatpush1.bf16.msra.mxu1 %v7921_v2  ;;  %v7927_v6 = vld [vmem:[#allocation5 + $0x20] ss:$16 sps:$4 sm:$0xff]   ;;  %v120_v51 = vld [vmem:[#allocation2 + $0x18] sm:$0xff]  ;;  %s6859_s18 = sshll.u32 %s9439_s6, 4  ;;  %s6860_s18 = int_to_ptr.vmem [resolvable:$true] %s6859_s18 }
  0x83   :  { %5058 = vmatpush1.bf16.msra.mxu0 %v7922_v3  ;;  %v7925_v5 = vld [vmem:[#allocation5 + $0x224] ss:$16 sps:$4 sm:$0xff]   ;;  %5016 = vmatprep.subr.bf16.mxu1 %v7923_v4  ;;  %v7928_v7 = vld [vmem:[#allocation5 + $0x220] ss:$16 sps:$4 sm:$0xff]   ;;  %s9391_s0 = scalar_lea.vmem %s6860_s18, 128  ;;  %p9396_p1 = scmp.lt.s32.totalorder %s6860_s18, %s6860_s18 }
  0x84   :  { %5059 = vmatprep.subr.bf16.mxu0 %v7925_v5  ;;  %v7929_v8 = vld [vmem:[#allocation5 + $0x44] ss:$16 sps:$4 sm:$0xff]   ;;  %v7933_v10 = vld [vmem:[#allocation5 + $0x40] ss:$16 sps:$4 sm:$0xff]   ;;  %p9392_p0 = scmp.ne.s32.totalorder %s6860_s18, %s9391_s0  ;;  %p9397_p2 = scmp.lt.s32.totalorder %s9391_s0, %s9391_s0 }
  0x85   :  { %v7931_v9 = vld [vmem:[#allocation5 + $0x244] ss:$16 sps:$4 sm:$0xff]   ;;  %v7934_v11 = vld [vmem:[#allocation5 + $0x240] ss:$16 sps:$4 sm:$0xff]  }
  0x86   :  { %5017 = vmatpush1.bf16.msra.mxu1 %v7927_v6  ;;  %v7935_v12 = vld [vmem:[#allocation5 + $0x64] ss:$16 sps:$4 sm:$0xff]   ;;  %v7939_v14 = vld [vmem:[#allocation5 + $0x60] ss:$16 sps:$4 sm:$0xff]   ;;  %p9398_p3 = por %p9397_p2, %p9396_p1 }
  0x87   :  { %5060 = vmatpush1.bf16.msra.mxu0 %v7928_v7  ;;  %5018 = vmatprep.subr.bf16.mxu1 %v7929_v8  ;;  %v7937_v13 = vld [vmem:[#allocation5 + $0x264] ss:$16 sps:$4 sm:$0xff]   ;;  %v7940_v15 = vld [vmem:[#allocation5 + $0x260] ss:$16 sps:$4 sm:$0xff]   ;;  %v142_v7 = vld [vmem:[#allocation2 + $0xc8] sm:$0xff] }
  0x88   :  { %5061 = vmatprep.subr.bf16.mxu0 %v7931_v9  ;;  %v7941_v16 = vld [vmem:[#allocation5 + $0x84] ss:$16 sps:$4 sm:$0xff]   ;;  %v7945_v18 = vld [vmem:[#allocation5 + $0x80] ss:$16 sps:$4 sm:$0xff]   ;;  %p9399_p4 = pnand %p9398_p3, %p9392_p0 }
  0x89   :  { %v7943_v17 = vld [vmem:[#allocation5 + $0x284] ss:$16 sps:$4 sm:$0xff]   ;;  %v7946_v19 = vld [vmem:[#allocation5 + $0x280] ss:$16 sps:$4 sm:$0xff]  }
  0x8a   :  { %5019 = vmatpush1.bf16.msra.mxu1 %v7933_v10  ;;  %v7947_v20 = vld [vmem:[#allocation5 + $0xa4] ss:$16 sps:$4 sm:$0xff]   ;;  %v7951_v22 = vld [vmem:[#allocation5 + $0xa0] ss:$16 sps:$4 sm:$0xff]   ;;  %v144_v10 = vld [vmem:[#allocation2 + $0xd8] sm:$0xff] }
  0x8b   :  { %5062 = vmatpush1.bf16.msra.mxu0 %v7934_v11  ;;  %5020 = vmatprep.subr.bf16.mxu1 %v7935_v12  ;;  %v7949_v21 = vld [vmem:[#allocation5 + $0x2a4] ss:$16 sps:$4 sm:$0xff]   ;;  %v7952_v23 = vld [vmem:[#allocation5 + $0x2a0] ss:$16 sps:$4 sm:$0xff]   ;;  %v8018_v11 = vld [vmem:[#allocation5 + $0xc] ss:$16 sps:$4 sm:$0xff]  }
  0x8c   :  { %5063 = vmatprep.subr.bf16.mxu0 %v7937_v13  ;;  %v7953_v24 = vld [vmem:[#allocation5 + $0xc4] ss:$16 sps:$4 sm:$0xff]   ;;  %v7957_v26 = vld [vmem:[#allocation5 + $0xc0] ss:$16 sps:$4 sm:$0xff]  }
  0x8d   :  { %v7955_v25 = vld [vmem:[#allocation5 + $0x2c4] ss:$16 sps:$4 sm:$0xff]   ;;  %v7958_v27 = vld [vmem:[#allocation5 + $0x2c0] ss:$16 sps:$4 sm:$0xff]  }
  0x8e   :  { %5021 = vmatpush1.bf16.msra.mxu1 %v7939_v14  ;;  %v7959_v28 = vld [vmem:[#allocation5 + $0xe4] ss:$16 sps:$4 sm:$0xff]   ;;  %v7963_v30 = vld [vmem:[#allocation5 + $0xe0] ss:$16 sps:$4 sm:$0xff]   ;;  %v8016_v14 = vld [vmem:[#allocation5 + $0x8] ss:$16 sps:$4 sm:$0xff]  }
  0x8f   :  { %5064 = vmatpush1.bf16.msra.mxu0 %v7940_v15  ;;  %5022 = vmatprep.subr.bf16.mxu1 %v7941_v16  ;;  %v7961_v29 = vld [vmem:[#allocation5 + $0x2e4] ss:$16 sps:$4 sm:$0xff]   ;;  %v7964_v31 = vld [vmem:[#allocation5 + $0x2e0] ss:$16 sps:$4 sm:$0xff]  }
  0x90   :  { %5065 = vmatprep.subr.bf16.mxu0 %v7943_v17  ;;  %v7965_v32 = vld [vmem:[#allocation5 + $0x104] ss:$16 sps:$4 sm:$0xff]   ;;  %v7969_v34 = vld [vmem:[#allocation5 + $0x100] ss:$16 sps:$4 sm:$0xff]   ;;  %v8024_v17 = vld [vmem:[#allocation5 + $0x2c] ss:$16 sps:$4 sm:$0xff]  }
  0x91   :  { %v7967_v33 = vld [vmem:[#allocation5 + $0x304] ss:$16 sps:$4 sm:$0xff]   ;;  %v7970_v35 = vld [vmem:[#allocation5 + $0x300] ss:$16 sps:$4 sm:$0xff]  }
  0x92   :  { %5023 = vmatpush1.bf16.msra.mxu1 %v7945_v18  ;;  %v7971_v36 = vld [vmem:[#allocation5 + $0x124] ss:$16 sps:$4 sm:$0xff]   ;;  %v7975_v38 = vld [vmem:[#allocation5 + $0x120] ss:$16 sps:$4 sm:$0xff]  }
  0x93   :  { %5066 = vmatpush1.bf16.msra.mxu0 %v7946_v19  ;;  %5024 = vmatprep.subr.bf16.mxu1 %v7947_v20  ;;  %v7973_v37 = vld [vmem:[#allocation5 + $0x324] ss:$16 sps:$4 sm:$0xff]   ;;  %v7976_v39 = vld [vmem:[#allocation5 + $0x320] ss:$16 sps:$4 sm:$0xff]   ;;  %v8022_v19 = vld [vmem:[#allocation5 + $0x28] ss:$16 sps:$4 sm:$0xff]  }
  0x94   :  { %5067 = vmatprep.subr.bf16.mxu0 %v7949_v21  ;;  %v7977_v40 = vld [vmem:[#allocation5 + $0x144] ss:$16 sps:$4 sm:$0xff]   ;;  %v7981_v42 = vld [vmem:[#allocation5 + $0x140] ss:$16 sps:$4 sm:$0xff]   ;;  %v8030_v21 = vld [vmem:[#allocation5 + $0x4c] ss:$16 sps:$4 sm:$0xff]  }
  0x95   :  { %v7979_v41 = vld [vmem:[#allocation5 + $0x344] ss:$16 sps:$4 sm:$0xff]   ;;  %v7982_v43 = vld [vmem:[#allocation5 + $0x340] ss:$16 sps:$4 sm:$0xff]  }
  0x96   :  { %5025 = vmatpush1.bf16.msra.mxu1 %v7951_v22  ;;  %v7983_v44 = vld [vmem:[#allocation5 + $0x164] ss:$16 sps:$4 sm:$0xff]   ;;  %v7987_v47 = vld [vmem:[#allocation5 + $0x160] ss:$16 sps:$4 sm:$0xff]  }
  0x97   :  { %5068 = vmatpush1.bf16.msra.mxu0 %v7952_v23  ;;  %5026 = vmatprep.subr.bf16.mxu1 %v7953_v24  ;;  %v7985_v45 = vld [vmem:[#allocation5 + $0x364] ss:$16 sps:$4 sm:$0xff]   ;;  %v7988_v48 = vld [vmem:[#allocation5 + $0x360] ss:$16 sps:$4 sm:$0xff]   ;;  %v8028_v23 = vld [vmem:[#allocation5 + $0x48] ss:$16 sps:$4 sm:$0xff]  }
  0x98   :  { %5069 = vmatprep.subr.bf16.mxu0 %v7955_v25  ;;  %v143_v49 = vld [vmem:[#allocation2 + $0xd0] sm:$0xff]  ;;  %v145_v52 = vld [vmem:[#allocation2 + $0xe0] sm:$0xff]  ;;  %v8036_v25 = vld [vmem:[#allocation5 + $0x6c] ss:$16 sps:$4 sm:$0xff]  }
  0x99   :  { %v9567_v50 = vpack.c.bf16 %v143_v49, %v118_v46  ;;  %v7989_v53 = vld [vmem:[#allocation5 + $0x184] ss:$16 sps:$4 sm:$0xff]   ;;  %v9569_v55 = vpack.c.bf16 %v145_v52, %v120_v51  ;;  %v7993_v56 = vld [vmem:[#allocation5 + $0x180] ss:$16 sps:$4 sm:$0xff]   ;;  %v8058_v46 = vld [vmem:[#allocation5 + $0xe8] ss:$16 sps:$4 sm:$0xff]  }
  0x9a   :  { %5027 = vmatpush1.bf16.msra.mxu1 %v7957_v26  ;;  %v7991_v54 = vld [vmem:[#allocation5 + $0x384] ss:$16 sps:$4 sm:$0xff]   ;;  %v7994_v57 = vld [vmem:[#allocation5 + $0x380] ss:$16 sps:$4 sm:$0xff]   ;;  %v8072_v52 = vld [vmem:[#allocation5 + $0x12c] ss:$16 sps:$4 sm:$0xff]  }
  0x9b   :  { %5070 = vmatpush1.bf16.msra.mxu0 %v7958_v27  ;;  %5028 = vmatprep.subr.bf16.mxu1 %v7959_v28  ;;  %v7995_v58 = vld [vmem:[#allocation5 + $0x1a4] ss:$16 sps:$4 sm:$0xff]   ;;  %v7999_v60 = vld [vmem:[#allocation5 + $0x1a0] ss:$16 sps:$4 sm:$0xff]   ;;  %v8034_v27 = vld [vmem:[#allocation5 + $0x68] ss:$16 sps:$4 sm:$0xff]  }
  0x9c   :  { %5071 = vmatprep.subr.bf16.mxu0 %v7961_v29  ;;  %5046 = vmatprep.mubr.bf16.mxu1 %v9567_v50  ;;  %v7997_v59 = vld [vmem:[#allocation5 + $0x3a4] ss:$16 sps:$4 sm:$0xff]   ;;  %v8000_v61 = vld [vmem:[#allocation5 + $0x3a0] ss:$16 sps:$4 sm:$0xff]   ;;  %v8042_v29 = vld [vmem:[#allocation5 + $0x8c] ss:$16 sps:$4 sm:$0xff]  }
  0x9d   :  { %5089 = vmatprep.mubr.bf16.mxu0 %v9569_v55  ;;  %v8001_v62 = vld [vmem:[#allocation5 + $0x1c4] ss:$16 sps:$4 sm:$0xff]   ;;  %v8005_v0 = vld [vmem:[#allocation5 + $0x1c0] ss:$16 sps:$4 sm:$0xff]  }
  0x9e   :  { %5029 = vmatpush1.bf16.msra.mxu1 %v7963_v30  ;;  %v8003_v63 = vld [vmem:[#allocation5 + $0x3c4] ss:$16 sps:$4 sm:$0xff]   ;;  %v8006_v1 = vld [vmem:[#allocation5 + $0x3c0] ss:$16 sps:$4 sm:$0xff]  }
  0x9f   :  { %5072 = vmatpush1.bf16.msra.mxu0 %v7964_v31  ;;  %5030 = vmatprep.subr.bf16.mxu1 %v7965_v32  ;;  %v8007_v2 = vld [vmem:[#allocation5 + $0x1e4] ss:$16 sps:$4 sm:$0xff]   ;;  %v8011_v4 = vld [vmem:[#allocation5 + $0x1e0] ss:$16 sps:$4 sm:$0xff]   ;;  %v8040_v31 = vld [vmem:[#allocation5 + $0x88] ss:$16 sps:$4 sm:$0xff]  }
  0xa0   :  { %5073 = vmatprep.subr.bf16.mxu0 %v7967_v33  ;;  %v8009_v3 = vld [vmem:[#allocation5 + $0x3e4] ss:$16 sps:$4 sm:$0xff]   ;;  %v8012_v5 = vld [vmem:[#allocation5 + $0x3e0] ss:$16 sps:$4 sm:$0xff]   ;;  %v8048_v33 = vld [vmem:[#allocation5 + $0xac] ss:$16 sps:$4 sm:$0xff]  }
  0xa1   :  { %v117_v6 = vld [vmem:[#allocation2] sm:$0xff]  ;;  %v119_v9 = vld [vmem:[#allocation2 + $0x10] sm:$0xff] }
  0xa2   :  { %5031 = vmatpush1.bf16.msra.mxu1 %v7969_v34  ;;  %v8015_v8 = vld [vmem:[#allocation5 + $0x404] ss:$16 sps:$4 sm:$0xff]   ;;  %v9573_v12 = vpack.c.bf16 %v142_v7, %v117_v6  ;;  %v8013_v13 = vld [vmem:[#allocation5 + $0x400] ss:$16 sps:$4 sm:$0xff]   ;;  %v9575_v15 = vpack.c.bf16 %v144_v10, %v119_v9  ;;  %v8094_v7 = vld [vmem:[#allocation5 + $0x1a8] ss:$16 sps:$4 sm:$0xff]  }
  0xa3   :  { %5074 = vmatpush1.bf16.msra.mxu0 %v7970_v35  ;;  %5032 = vmatprep.subr.bf16.mxu1 %v7971_v36  ;;  %v8021_v16 = vld [vmem:[#allocation5 + $0x424] ss:$16 sps:$4 sm:$0xff]   ;;  %v8019_v18 = vld [vmem:[#allocation5 + $0x420] ss:$16 sps:$4 sm:$0xff]   ;;  %v8046_v35 = vld [vmem:[#allocation5 + $0xa8] ss:$16 sps:$4 sm:$0xff]  }
  0xa4   :  { %5075 = vmatprep.subr.bf16.mxu0 %v7973_v37  ;;  %v8027_v20 = vld [vmem:[#allocation5 + $0x444] ss:$16 sps:$4 sm:$0xff]   ;;  %v8025_v22 = vld [vmem:[#allocation5 + $0x440] ss:$16 sps:$4 sm:$0xff]   ;;  %v8054_v37 = vld [vmem:[#allocation5 + $0xcc] ss:$16 sps:$4 sm:$0xff]  }
  0xa5   :  { %v8033_v24 = vld [vmem:[#allocation5 + $0x464] ss:$16 sps:$4 sm:$0xff]   ;;  %v8031_v26 = vld [vmem:[#allocation5 + $0x460] ss:$16 sps:$4 sm:$0xff]   ;;  %v8102_v9 = vld [vmem:[#allocation5 + $0x1cc] ss:$16 sps:$4 sm:$0xff]  }
  0xa6   :  { %5033 = vmatpush1.bf16.msra.mxu1 %v7975_v38  ;;  %v8039_v28 = vld [vmem:[#allocation5 + $0x484] ss:$16 sps:$4 sm:$0xff]   ;;  %v8037_v30 = vld [vmem:[#allocation5 + $0x480] ss:$16 sps:$4 sm:$0xff]  }
  0xa7   :  { %5076 = vmatpush1.bf16.msra.mxu0 %v7976_v39  ;;  %5034 = vmatprep.subr.bf16.mxu1 %v7977_v40  ;;  %v8045_v32 = vld [vmem:[#allocation5 + $0x4a4] ss:$16 sps:$4 sm:$0xff]   ;;  %v8043_v34 = vld [vmem:[#allocation5 + $0x4a0] ss:$16 sps:$4 sm:$0xff]   ;;  %v8052_v39 = vld [vmem:[#allocation5 + $0xc8] ss:$16 sps:$4 sm:$0xff]  }
  0xa8   :  { %5077 = vmatprep.subr.bf16.mxu0 %v7979_v41  ;;  %v8051_v36 = vld [vmem:[#allocation5 + $0x4c4] ss:$16 sps:$4 sm:$0xff]   ;;  %v8049_v38 = vld [vmem:[#allocation5 + $0x4c0] ss:$16 sps:$4 sm:$0xff]   ;;  %v122_v40 = vld [vmem:[#allocation2 + $0x28] sm:$0xff] }
  0xa9   :  { %v147_v41 = vld [vmem:[#allocation2 + $0xf0] sm:$0xff] }
  0xaa   :  { %5035 = vmatpush1.bf16.msra.mxu1 %v7981_v42  ;;  %v8057_v42 = vld [vmem:[#allocation5 + $0x4e4] ss:$16 sps:$4 sm:$0xff]   ;;  %v8061_v49 = vld [vmem:[#allocation5 + $0x500] ss:$16 sps:$4 sm:$0xff]  }
  0xab   :  { %5078 = vmatpush1.bf16.msra.mxu0 %v7982_v43  ;;  %5036 = vmatprep.subr.bf16.mxu1 %v7983_v44  ;;  %v8060_v43 = vld [vmem:[#allocation5 + $0xec] ss:$16 sps:$4 sm:$0xff]   ;;  %v9580_v44 = vpack.c.bf16 %v147_v41, %v122_v40  ;;  %v8069_v51 = vld [vmem:[#allocation5 + $0x524] ss:$16 sps:$4 sm:$0xff]   ;;  %v8091_v6 = vld [vmem:[#allocation5 + $0x5a0] ss:$16 sps:$4 sm:$0xff]  }
  0xac   :  { %5079 = vmatprep.subr.bf16.mxu0 %v7985_v45  ;;  %v8055_v45 = vld [vmem:[#allocation5 + $0x4e0] ss:$16 sps:$4 sm:$0xff]   ;;  %v8138_v40 = vld [vmem:[#allocation5 + $0x28c] ss:$16 sps:$4 sm:$0xff]  }
  0xad   :  { %v8097_v10 = vld [vmem:[#allocation5 + $0x5c0] ss:$16 sps:$4 sm:$0xff]  }
  0xae   :  { %5037 = vmatpush1.bf16.msra.mxu1 %v7987_v47  ;;  %v8063_v47 = vld [vmem:[#allocation5 + $0x504] ss:$16 sps:$4 sm:$0xff]   ;;  %v8133_v41 = vld [vmem:[#allocation5 + $0x680] ss:$16 sps:$4 sm:$0xff]  }
  0xaf   :  { %5080 = vmatpush1.bf16.msra.mxu0 %v7988_v48  ;;  %5038 = vmatprep.subr.bf16.mxu1 %v7989_v53  ;;  %v8066_v48 = vld [vmem:[#allocation5 + $0x10c] ss:$16 sps:$4 sm:$0xff]   ;;  %v8067_v53 = vld [vmem:[#allocation5 + $0x520] ss:$16 sps:$4 sm:$0xff]  }
  0xb0   :  { %5081 = vmatprep.subr.bf16.mxu0 %v7991_v54  ;;  %v8070_v54 = vld [vmem:[#allocation5 + $0x128] ss:$16 sps:$4 sm:$0xff]  }
  0xb2   :  { %5039 = vmatpush1.bf16.msra.mxu1 %v7993_v56  ;;  %v8075_v56 = vld [vmem:[#allocation5 + $0x544] ss:$16 sps:$4 sm:$0xff]  }
  0xb3   :  { %5082 = vmatpush1.bf16.msra.mxu0 %v7994_v57  ;;  %5040 = vmatprep.subr.bf16.mxu1 %v7995_v58  ;;  %v8078_v57 = vld [vmem:[#allocation5 + $0x14c] ss:$16 sps:$4 sm:$0xff]   ;;  %v8073_v58 = vld [vmem:[#allocation5 + $0x540] ss:$16 sps:$4 sm:$0xff]  }
  0xb4   :  { %5083 = vmatprep.subr.bf16.mxu0 %v7997_v59  ;;  %v8076_v59 = vld [vmem:[#allocation5 + $0x148] ss:$16 sps:$4 sm:$0xff]  }
  0xb6   :  { %5041 = vmatpush1.bf16.msra.mxu1 %v7999_v60  ;;  %v8081_v60 = vld [vmem:[#allocation5 + $0x564] ss:$16 sps:$4 sm:$0xff]  }
  0xb7   :  { %5084 = vmatpush1.bf16.msra.mxu0 %v8000_v61  ;;  %5042 = vmatprep.subr.bf16.mxu1 %v8001_v62  ;;  %v8084_v61 = vld [vmem:[#allocation5 + $0x16c] ss:$16 sps:$4 sm:$0xff]   ;;  %v8079_v62 = vld [vmem:[#allocation5 + $0x560] ss:$16 sps:$4 sm:$0xff]  }
  0xb8   :  { %5085 = vmatprep.subr.bf16.mxu0 %v8003_v63  ;;  %v8082_v63 = vld [vmem:[#allocation5 + $0x168] ss:$16 sps:$4 sm:$0xff]  }
  0xba   :  { %5043 = vmatpush1.bf16.msra.mxu1 %v8005_v0  ;;  %v8087_v0 = vld [vmem:[#allocation5 + $0x584] ss:$16 sps:$4 sm:$0xff]  }
  0xbb   :  { %5086 = vmatpush1.bf16.msra.mxu0 %v8006_v1  ;;  %5044 = vmatprep.subr.bf16.mxu1 %v8007_v2  ;;  %v8090_v1 = vld [vmem:[#allocation5 + $0x18c] ss:$16 sps:$4 sm:$0xff]   ;;  %v8085_v2 = vld [vmem:[#allocation5 + $0x580] ss:$16 sps:$4 sm:$0xff]  }
  0xbc   :  { %5087 = vmatprep.subr.bf16.mxu0 %v8009_v3  ;;  %v8088_v3 = vld [vmem:[#allocation5 + $0x188] ss:$16 sps:$4 sm:$0xff]  }
  0xbe   :  { %5045 = vmatpush1.bf16.msra.mxu1 %v8011_v4  ;;  %v8093_v4 = vld [vmem:[#allocation5 + $0x5a4] ss:$16 sps:$4 sm:$0xff]  }
  0xbf   :  { %5088 = vmatpush1.bf16.msra.mxu0 %v8012_v5  ;;  %5573 = vmatprep.subr.bf16.mxu1 %v8018_v11  ;;  %v8096_v5 = vld [vmem:[#allocation5 + $0x1ac] ss:$16 sps:$4 sm:$0xff]   ;;  %v8100_v11 = vld [vmem:[#allocation5 + $0x1c8] ss:$16 sps:$4 sm:$0xff]  }
  0xc0   :  { %5100 = vmatprep.subr.bf16.mxu0 %v8015_v8  ;;  %v8099_v8 = vld [vmem:[#allocation5 + $0x5c4] ss:$16 sps:$4 sm:$0xff]  }
  0xc1   :  { %5047 = vmatmul.mubr.bf16.vlgmr.msra.gmra.mrb[0].mxu1 %v9573_v12 }
  0xc2   :  { %5090 = vmatmul.mubr.bf16.vlgmr.msra.gmra.mrb[0].mxu0 %v9575_v15  ;;  %5574 = vmatpush1.bf16.msra.mxu1 %v8016_v14  ;;  %v8108_v14 = vld [vmem:[#allocation5 + $0x1ec] ss:$16 sps:$4 sm:$0xff]  }
  0xc3   :  { %5101 = vmatpush1.bf16.msra.mxu0 %v8013_v13  ;;  %5575 = vmatprep.subr.bf16.mxu1 %v8024_v17  ;;  %v8105_v13 = vld [vmem:[#allocation5 + $0x5e4] ss:$16 sps:$4 sm:$0xff]   ;;  %v8106_v17 = vld [vmem:[#allocation5 + $0x1e8] ss:$16 sps:$4 sm:$0xff]  }
  0xc4   :  { %5102 = vmatprep.subr.bf16.mxu0 %v8021_v16  ;;  %5605 = vmatprep.mubr.bf16.mxu1 %v9567_v50  ;;  %v8064_v50 = vld [vmem:[#allocation5 + $0x108] ss:$16 sps:$4 sm:$0xff]   ;;  %v8103_v16 = vld [vmem:[#allocation5 + $0x5e0] ss:$16 sps:$4 sm:$0xff]  }
  0xc5   :  { %5132 = vmatprep.mubr.bf16.mxu0 %v9580_v44 }
  0xc6   :  { %5576 = vmatpush1.bf16.msra.mxu1 %v8022_v19  ;;  %v121_v19 = vld [vmem:[#allocation2 + $0x20] sm:$0xff] }
  0xc7   :  { %5103 = vmatpush1.bf16.msra.mxu0 %v8019_v18  ;;  %5577 = vmatprep.subr.bf16.mxu1 %v8030_v21  ;;  %v8111_v18 = vld [vmem:[#allocation5 + $0x604] ss:$16 sps:$4 sm:$0xff]   ;;  %v8114_v21 = vld [vmem:[#allocation5 + $0x20c] ss:$16 sps:$4 sm:$0xff]  }
  0xc8   :  { %5104 = vmatprep.subr.bf16.mxu0 %v8027_v20  ;;  %v146_v20 = vld [vmem:[#allocation2 + $0xe8] sm:$0xff] }
  0xca   :  { %5578 = vmatpush1.bf16.msra.mxu1 %v8028_v23  ;;  %v8112_v23 = vld [vmem:[#allocation5 + $0x208] ss:$16 sps:$4 sm:$0xff]  }
  0xcb   :  { %5105 = vmatpush1.bf16.msra.mxu0 %v8025_v22  ;;  %5579 = vmatprep.subr.bf16.mxu1 %v8036_v25  ;;  %v8109_v22 = vld [vmem:[#allocation5 + $0x600] ss:$16 sps:$4 sm:$0xff]   ;;  %v8117_v25 = vld [vmem:[#allocation5 + $0x624] ss:$16 sps:$4 sm:$0xff]  }
  0xcc   :  { %5106 = vmatprep.subr.bf16.mxu0 %v8033_v24  ;;  %v9583_v24 = vpack.c.bf16 %v146_v20, %v121_v19  ;;  %v8198_v19 = vld [vmem:[#allocation5 + $0x3cc] ss:$16 sps:$4 sm:$0xff]   ;;  %v8193_v20 = vld [vmem:[#allocation5 + $0x7c0] ss:$16 sps:$4 sm:$0xff]  }
  0xce   :  { %5580 = vmatpush1.bf16.msra.mxu1 %v8034_v27  ;;  %v8115_v27 = vld [vmem:[#allocation5 + $0x620] ss:$16 sps:$4 sm:$0xff]  }
  0xcf   :  { %5107 = vmatpush1.bf16.msra.mxu0 %v8031_v26  ;;  %5581 = vmatprep.subr.bf16.mxu1 %v8042_v29  ;;  %v8120_v26 = vld [vmem:[#allocation5 + $0x22c] ss:$16 sps:$4 sm:$0xff]  }
  0xd0   :  { %5108 = vmatprep.subr.bf16.mxu0 %v8039_v28  ;;  %v8118_v28 = vld [vmem:[#allocation5 + $0x228] ss:$16 sps:$4 sm:$0xff]  }
  0xd1   :  { %v124_v29 = vld [vmem:[#allocation2 + $0x38] sm:$0xff] }
  0xd2   :  { %5582 = vmatpush1.bf16.msra.mxu1 %v8040_v31  ;;  %v8123_v31 = vld [vmem:[#allocation5 + $0x644] ss:$16 sps:$4 sm:$0xff]  }
  0xd3   :  { %5109 = vmatpush1.bf16.msra.mxu0 %v8037_v30  ;;  %5583 = vmatprep.subr.bf16.mxu1 %v8048_v33  ;;  %v149_v30 = vld [vmem:[#allocation2 + $0x100] sm:$0xff] }
  0xd4   :  { %5110 = vmatprep.subr.bf16.mxu0 %v8045_v32  ;;  %v8126_v32 = vld [vmem:[#allocation5 + $0x24c] ss:$16 sps:$4 sm:$0xff]   ;;  %v9587_v33 = vpack.c.bf16 %v149_v30, %v124_v29 }
  0xd5   :  { %v148_v29 = vld [vmem:[#allocation2 + $0xf8] sm:$0xff] }
  0xd6   :  { %5584 = vmatpush1.bf16.msra.mxu1 %v8046_v35  ;;  %v8124_v35 = vld [vmem:[#allocation5 + $0x248] ss:$16 sps:$4 sm:$0xff]   ;;  %v8210_v30 = vld [vmem:[#allocation5 + $0x40c] ss:$16 sps:$4 sm:$0xff]  }
  0xd7   :  { %5111 = vmatpush1.bf16.msra.mxu0 %v8043_v34  ;;  %5585 = vmatprep.subr.bf16.mxu1 %v8054_v37  ;;  %v8121_v34 = vld [vmem:[#allocation5 + $0x640] ss:$16 sps:$4 sm:$0xff]  }
  0xd8   :  { %5112 = vmatprep.subr.bf16.mxu0 %v8051_v36  ;;  %v8132_v36 = vld [vmem:[#allocation5 + $0x26c] ss:$16 sps:$4 sm:$0xff]   ;;  %v8127_v37 = vld [vmem:[#allocation5 + $0x660] ss:$16 sps:$4 sm:$0xff]  }
  0xda   :  { %5586 = vmatpush1.bf16.msra.mxu1 %v8052_v39  ;;  %v8135_v39 = vld [vmem:[#allocation5 + $0x684] ss:$16 sps:$4 sm:$0xff]  }
  0xdb   :  { %5113 = vmatpush1.bf16.msra.mxu0 %v8049_v38  ;;  %5587 = vmatprep.subr.bf16.mxu1 %v8060_v43  ;;  %v8130_v38 = vld [vmem:[#allocation5 + $0x268] ss:$16 sps:$4 sm:$0xff]   ;;  %v8144_v43 = vld [vmem:[#allocation5 + $0x2ac] ss:$16 sps:$4 sm:$0xff]  }
  0xdc   :  { %5114 = vmatprep.subr.bf16.mxu0 %v8057_v42  ;;  %v8141_v42 = vld [vmem:[#allocation5 + $0x6a4] ss:$16 sps:$4 sm:$0xff]  }
  0xde   :  { %5588 = vmatpush1.bf16.msra.mxu1 %v8058_v46  ;;  %v8142_v46 = vld [vmem:[#allocation5 + $0x2a8] ss:$16 sps:$4 sm:$0xff]  }
  0xdf   :  { %5115 = vmatpush1.bf16.msra.mxu0 %v8055_v45  ;;  %5589 = vmatprep.subr.bf16.mxu1 %v8066_v48  ;;  %v8139_v45 = vld [vmem:[#allocation5 + $0x6a0] ss:$16 sps:$4 sm:$0xff]   ;;  %v8150_v48 = vld [vmem:[#allocation5 + $0x2cc] ss:$16 sps:$4 sm:$0xff]  }
  0xe0   :  { %5116 = vmatprep.subr.bf16.mxu0 %v8063_v47  ;;  %v8147_v47 = vld [vmem:[#allocation5 + $0x6c4] ss:$16 sps:$4 sm:$0xff]  }
  0xe2   :  { %5590 = vmatpush1.bf16.msra.mxu1 %v8064_v50  ;;  %v8148_v50 = vld [vmem:[#allocation5 + $0x2c8] ss:$16 sps:$4 sm:$0xff]  }
  0xe3   :  { %5117 = vmatpush1.bf16.msra.mxu0 %v8061_v49  ;;  %5591 = vmatprep.subr.bf16.mxu1 %v8072_v52  ;;  %v8145_v49 = vld [vmem:[#allocation5 + $0x6c0] ss:$16 sps:$4 sm:$0xff]   ;;  %v8156_v52 = vld [vmem:[#allocation5 + $0x2ec] ss:$16 sps:$4 sm:$0xff]  }
  0xe4   :  { %5118 = vmatprep.subr.bf16.mxu0 %v8069_v51  ;;  %v8153_v51 = vld [vmem:[#allocation5 + $0x6e4] ss:$16 sps:$4 sm:$0xff]  }
  0xe6   :  { %5592 = vmatpush1.bf16.msra.mxu1 %v8070_v54  ;;  %v8154_v54 = vld [vmem:[#allocation5 + $0x2e8] ss:$16 sps:$4 sm:$0xff]  }
  0xe7   :  { %5119 = vmatpush1.bf16.msra.mxu0 %v8067_v53  ;;  %5593 = vmatprep.subr.bf16.mxu1 %v8078_v57  ;;  %v8151_v53 = vld [vmem:[#allocation5 + $0x6e0] ss:$16 sps:$4 sm:$0xff]   ;;  %v8162_v57 = vld [vmem:[#allocation5 + $0x30c] ss:$16 sps:$4 sm:$0xff]  }
  0xe8   :  { %5120 = vmatprep.subr.bf16.mxu0 %v8075_v56  ;;  %v8159_v56 = vld [vmem:[#allocation5 + $0x704] ss:$16 sps:$4 sm:$0xff]  }
  0xea   :  { %5594 = vmatpush1.bf16.msra.mxu1 %v8076_v59  ;;  %v8160_v59 = vld [vmem:[#allocation5 + $0x308] ss:$16 sps:$4 sm:$0xff]  }
  0xeb   :  { %5121 = vmatpush1.bf16.msra.mxu0 %v8073_v58  ;;  %5595 = vmatprep.subr.bf16.mxu1 %v8084_v61  ;;  %v8157_v58 = vld [vmem:[#allocation5 + $0x700] ss:$16 sps:$4 sm:$0xff]   ;;  %v8168_v61 = vld [vmem:[#allocation5 + $0x32c] ss:$16 sps:$4 sm:$0xff]  }
  0xec   :  { %5122 = vmatprep.subr.bf16.mxu0 %v8081_v60  ;;  %v8165_v60 = vld [vmem:[#allocation5 + $0x724] ss:$16 sps:$4 sm:$0xff]  }
  0xee   :  { %5596 = vmatpush1.bf16.msra.mxu1 %v8082_v63  ;;  %v8166_v63 = vld [vmem:[#allocation5 + $0x328] ss:$16 sps:$4 sm:$0xff]  }
  0xef   :  { %5123 = vmatpush1.bf16.msra.mxu0 %v8079_v62  ;;  %5597 = vmatprep.subr.bf16.mxu1 %v8090_v1  ;;  %v8163_v62 = vld [vmem:[#allocation5 + $0x720] ss:$16 sps:$4 sm:$0xff]   ;;  %v8174_v1 = vld [vmem:[#allocation5 + $0x34c] ss:$16 sps:$4 sm:$0xff]  }
  0xf0   :  { %5124 = vmatprep.subr.bf16.mxu0 %v8087_v0  ;;  %v8171_v0 = vld [vmem:[#allocation5 + $0x744] ss:$16 sps:$4 sm:$0xff]  }
  0xf2   :  { %5598 = vmatpush1.bf16.msra.mxu1 %v8088_v3  ;;  %v8172_v3 = vld [vmem:[#allocation5 + $0x348] ss:$16 sps:$4 sm:$0xff]  }
  0xf3   :  { %5125 = vmatpush1.bf16.msra.mxu0 %v8085_v2  ;;  %5599 = vmatprep.subr.bf16.mxu1 %v8096_v5  ;;  %v8169_v2 = vld [vmem:[#allocation5 + $0x740] ss:$16 sps:$4 sm:$0xff]   ;;  %v8180_v5 = vld [vmem:[#allocation5 + $0x36c] ss:$16 sps:$4 sm:$0xff]  }
  0xf4   :  { %5126 = vmatprep.subr.bf16.mxu0 %v8093_v4  ;;  %v8177_v4 = vld [vmem:[#allocation5 + $0x764] ss:$16 sps:$4 sm:$0xff]  }
  0xf6   :  { %5600 = vmatpush1.bf16.msra.mxu1 %v8094_v7  ;;  %v8178_v7 = vld [vmem:[#allocation5 + $0x368] ss:$16 sps:$4 sm:$0xff]  }
  0xf7   :  { %5127 = vmatpush1.bf16.msra.mxu0 %v8091_v6  ;;  %5601 = vmatprep.subr.bf16.mxu1 %v8102_v9  ;;  %v8175_v6 = vld [vmem:[#allocation5 + $0x760] ss:$16 sps:$4 sm:$0xff]   ;;  %v8186_v9 = vld [vmem:[#allocation5 + $0x38c] ss:$16 sps:$4 sm:$0xff]  }
  0xf8   :  { %5128 = vmatprep.subr.bf16.mxu0 %v8099_v8  ;;  %v8183_v8 = vld [vmem:[#allocation5 + $0x784] ss:$16 sps:$4 sm:$0xff]  }
  0xfa   :  { %5602 = vmatpush1.bf16.msra.mxu1 %v8100_v11  ;;  %v8184_v11 = vld [vmem:[#allocation5 + $0x388] ss:$16 sps:$4 sm:$0xff]  }
  0xfb   :  { %5129 = vmatpush1.bf16.msra.mxu0 %v8097_v10  ;;  %5603 = vmatprep.subr.bf16.mxu1 %v8108_v14  ;;  %v8181_v10 = vld [vmem:[#allocation5 + $0x780] ss:$16 sps:$4 sm:$0xff]   ;;  %v8192_v14 = vld [vmem:[#allocation5 + $0x3ac] ss:$16 sps:$4 sm:$0xff]  }
  0xfc   :  { %5130 = vmatprep.subr.bf16.mxu0 %v8105_v13  ;;  %v8189_v13 = vld [vmem:[#allocation5 + $0x7a4] ss:$16 sps:$4 sm:$0xff]  }
  0xfe   :  { %5604 = vmatpush1.bf16.msra.mxu1 %v8106_v17  ;;  %v8190_v17 = vld [vmem:[#allocation5 + $0x3a8] ss:$16 sps:$4 sm:$0xff]  }
  0xff   :  { %5131 = vmatpush1.bf16.msra.mxu0 %v8103_v16  ;;  %5616 = vmatprep.subr.bf16.mxu1 %v8114_v21  ;;  %v8187_v16 = vld [vmem:[#allocation5 + $0x7a0] ss:$16 sps:$4 sm:$0xff]   ;;  %v8196_v21 = vld [vmem:[#allocation5 + $0x3c8] ss:$16 sps:$4 sm:$0xff]  }
 0x100   :  { %5143 = vmatprep.subr.bf16.mxu0 %v8111_v18  ;;  %v8195_v18 = vld [vmem:[#allocation5 + $0x7c4] ss:$16 sps:$4 sm:$0xff]  }
 0x101   :  { %5606 = vmatmul.mubr.bf16.vlgmr.msra.gmra.mrb[4].mxu1 %v9573_v12  ;;  %v8129_v12 = vld [vmem:[#allocation5 + $0x664] ss:$16 sps:$4 sm:$0xff]  }
 0x102   :  { %5133 = vmatmul.mubr.bf16.vlgmr.msra.gmra.mrb[0].mxu0 %v9583_v24  ;;  %5617 = vmatpush1.bf16.msra.mxu1 %v8112_v23  ;;  %v8204_v23 = vld [vmem:[#allocation5 + $0x3ec] ss:$16 sps:$4 sm:$0xff]  }
 0x103   :  { %5144 = vmatpush1.bf16.msra.mxu0 %v8109_v22  ;;  %5618 = vmatprep.subr.bf16.mxu1 %v8120_v26  ;;  %v8201_v22 = vld [vmem:[#allocation5 + $0x7e4] ss:$16 sps:$4 sm:$0xff]   ;;  %v8202_v26 = vld [vmem:[#allocation5 + $0x3e8] ss:$16 sps:$4 sm:$0xff]  }
 0x104   :  { %5145 = vmatprep.subr.bf16.mxu0 %v8117_v25  ;;  %5648 = vmatprep.mubr.bf16.mxu1 %v9569_v55  ;;  %v8136_v55 = vld [vmem:[#allocation5 + $0x288] ss:$16 sps:$4 sm:$0xff]   ;;  %v8199_v25 = vld [vmem:[#allocation5 + $0x7e0] ss:$16 sps:$4 sm:$0xff]  }
 0x105   :  { %5175 = vmatprep.mubr.bf16.mxu0 %v9587_v33 }
 0x106   :  { %5619 = vmatpush1.bf16.msra.mxu1 %v8118_v28  ;;  %v123_v28 = vld [vmem:[#allocation2 + $0x30] sm:$0xff] }
 0x107   :  { %5146 = vmatpush1.bf16.msra.mxu0 %v8115_v27  ;;  %5620 = vmatprep.subr.bf16.mxu1 %v8126_v32  ;;  %v8207_v27 = vld [vmem:[#allocation5 + $0x804] ss:$16 sps:$4 sm:$0xff]   ;;  %v126_v32 = vld [vmem:[#allocation2 + $0x48] sm:$0xff] }
 0x108   :  { %5147 = vmatprep.subr.bf16.mxu0 %v8123_v31  ;;  %v8205_v31 = vld [vmem:[#allocation5 + $0x800] ss:$16 sps:$4 sm:$0xff]  }
 0x10a   :  { %5621 = vmatpush1.bf16.msra.mxu1 %v8124_v35  ;;  %v151_v35 = vld [vmem:[#allocation2 + $0x110] sm:$0xff] }
 0x10b   :  { %5148 = vmatpush1.bf16.msra.mxu0 %v8121_v34  ;;  %5622 = vmatprep.subr.bf16.mxu1 %v8132_v36  ;;  %v9591_v34 = vpack.c.bf16 %v148_v29, %v123_v28  ;;  %v8213_v36 = vld [vmem:[#allocation5 + $0x824] ss:$16 sps:$4 sm:$0xff]   ;;  %v8294_v28 = vld [vmem:[#allocation5 + $0x5cc] ss:$16 sps:$4 sm:$0xff]   ;;  %v8289_v29 = vld [vmem:[#allocation5 + $0x9c0] ss:$16 sps:$4 sm:$0xff]  }
 0x10c   :  { %5149 = vmatprep.subr.bf16.mxu0 %v8129_v12  ;;  %v8208_v12 = vld [vmem:[#allocation5 + $0x408] ss:$16 sps:$4 sm:$0xff]  }
 0x10e   :  { %5623 = vmatpush1.bf16.msra.mxu1 %v8130_v38  ;;  %v9593_v38 = vpack.c.bf16 %v151_v35, %v126_v32  ;;  %v8300_v32 = vld [vmem:[#allocation5 + $0x5ec] ss:$16 sps:$4 sm:$0xff]   ;;  %v8295_v35 = vld [vmem:[#allocation5 + $0x9e0] ss:$16 sps:$4 sm:$0xff]  }
 0x10f   :  { %5150 = vmatpush1.bf16.msra.mxu0 %v8127_v37  ;;  %5624 = vmatprep.subr.bf16.mxu1 %v8138_v40  ;;  %v8216_v37 = vld [vmem:[#allocation5 + $0x42c] ss:$16 sps:$4 sm:$0xff]   ;;  %v8214_v40 = vld [vmem:[#allocation5 + $0x428] ss:$16 sps:$4 sm:$0xff]  }
 0x110   :  { %5151 = vmatprep.subr.bf16.mxu0 %v8135_v39  ;;  %v8211_v39 = vld [vmem:[#allocation5 + $0x820] ss:$16 sps:$4 sm:$0xff]  }
 0x112   :  { %5625 = vmatpush1.bf16.msra.mxu1 %v8136_v55  ;;  %v8222_v55 = vld [vmem:[#allocation5 + $0x44c] ss:$16 sps:$4 sm:$0xff]  }
 0x113   :  { %5152 = vmatpush1.bf16.msra.mxu0 %v8133_v41  ;;  %5626 = vmatprep.subr.bf16.mxu1 %v8144_v43  ;;  %v8219_v41 = vld [vmem:[#allocation5 + $0x844] ss:$16 sps:$4 sm:$0xff]   ;;  %v8220_v43 = vld [vmem:[#allocation5 + $0x448] ss:$16 sps:$4 sm:$0xff]  }
 0x114   :  { %5153 = vmatprep.subr.bf16.mxu0 %v8141_v42  ;;  %v8217_v42 = vld [vmem:[#allocation5 + $0x840] ss:$16 sps:$4 sm:$0xff]  }
 0x116   :  { %5627 = vmatpush1.bf16.msra.mxu1 %v8142_v46  ;;  %v8223_v46 = vld [vmem:[#allocation5 + $0x860] ss:$16 sps:$4 sm:$0xff]  }
 0x117   :  { %5154 = vmatpush1.bf16.msra.mxu0 %v8139_v45  ;;  %5628 = vmatprep.subr.bf16.mxu1 %v8150_v48  ;;  %v8225_v45 = vld [vmem:[#allocation5 + $0x864] ss:$16 sps:$4 sm:$0xff]  }
 0x118   :  { %5155 = vmatprep.subr.bf16.mxu0 %v8147_v47  ;;  %v8226_v47 = vld [vmem:[#allocation5 + $0x468] ss:$16 sps:$4 sm:$0xff]   ;;  %v8231_v48 = vld [vmem:[#allocation5 + $0x884] ss:$16 sps:$4 sm:$0xff]  }
 0x11a   :  { %5629 = vmatpush1.bf16.msra.mxu1 %v8148_v50  ;;  %v8229_v50 = vld [vmem:[#allocation5 + $0x880] ss:$16 sps:$4 sm:$0xff]  }
 0x11b   :  { %5156 = vmatpush1.bf16.msra.mxu0 %v8145_v49  ;;  %5630 = vmatprep.subr.bf16.mxu1 %v8156_v52  ;;  %v8234_v49 = vld [vmem:[#allocation5 + $0x48c] ss:$16 sps:$4 sm:$0xff]  }
 0x11c   :  { %5157 = vmatprep.subr.bf16.mxu0 %v8153_v51  ;;  %v8237_v51 = vld [vmem:[#allocation5 + $0x8a4] ss:$16 sps:$4 sm:$0xff]   ;;  %v8240_v52 = vld [vmem:[#allocation5 + $0x4ac] ss:$16 sps:$4 sm:$0xff]  }
 0x11e   :  { %5631 = vmatpush1.bf16.msra.mxu1 %v8154_v54  ;;  %v8238_v54 = vld [vmem:[#allocation5 + $0x4a8] ss:$16 sps:$4 sm:$0xff]  }
 0x11f   :  { %5158 = vmatpush1.bf16.msra.mxu0 %v8151_v53  ;;  %5632 = vmatprep.subr.bf16.mxu1 %v8162_v57  ;;  %v8235_v53 = vld [vmem:[#allocation5 + $0x8a0] ss:$16 sps:$4 sm:$0xff]   ;;  %v8246_v57 = vld [vmem:[#allocation5 + $0x4cc] ss:$16 sps:$4 sm:$0xff]  }
 0x120   :  { %5159 = vmatprep.subr.bf16.mxu0 %v8159_v56  ;;  %v8243_v56 = vld [vmem:[#allocation5 + $0x8c4] ss:$16 sps:$4 sm:$0xff]  }
 0x122   :  { %5633 = vmatpush1.bf16.msra.mxu1 %v8160_v59  ;;  %v8244_v59 = vld [vmem:[#allocation5 + $0x4c8] ss:$16 sps:$4 sm:$0xff]  }
 0x123   :  { %5160 = vmatpush1.bf16.msra.mxu0 %v8157_v58  ;;  %5634 = vmatprep.subr.bf16.mxu1 %v8168_v61  ;;  %v8241_v58 = vld [vmem:[#allocation5 + $0x8c0] ss:$16 sps:$4 sm:$0xff]   ;;  %v8252_v61 = vld [vmem:[#allocation5 + $0x4ec] ss:$16 sps:$4 sm:$0xff]  }
 0x124   :  { %5161 = vmatprep.subr.bf16.mxu0 %v8165_v60  ;;  %v8249_v60 = vld [vmem:[#allocation5 + $0x8e4] ss:$16 sps:$4 sm:$0xff]  }
 0x126   :  { %5635 = vmatpush1.bf16.msra.mxu1 %v8166_v63  ;;  %v8250_v63 = vld [vmem:[#allocation5 + $0x4e8] ss:$16 sps:$4 sm:$0xff]  }
 0x127   :  { %5162 = vmatpush1.bf16.msra.mxu0 %v8163_v62  ;;  %5636 = vmatprep.subr.bf16.mxu1 %v8174_v1  ;;  %v8247_v62 = vld [vmem:[#allocation5 + $0x8e0] ss:$16 sps:$4 sm:$0xff]   ;;  %v8258_v1 = vld [vmem:[#allocation5 + $0x50c] ss:$16 sps:$4 sm:$0xff]  }
 0x128   :  { %5163 = vmatprep.subr.bf16.mxu0 %v8171_v0  ;;  %v8255_v0 = vld [vmem:[#allocation5 + $0x904] ss:$16 sps:$4 sm:$0xff]  }
 0x12a   :  { %5637 = vmatpush1.bf16.msra.mxu1 %v8172_v3  ;;  %v8256_v3 = vld [vmem:[#allocation5 + $0x508] ss:$16 sps:$4 sm:$0xff]  }
 0x12b   :  { %5164 = vmatpush1.bf16.msra.mxu0 %v8169_v2  ;;  %5638 = vmatprep.subr.bf16.mxu1 %v8180_v5  ;;  %v8253_v2 = vld [vmem:[#allocation5 + $0x900] ss:$16 sps:$4 sm:$0xff]   ;;  %v8264_v5 = vld [vmem:[#allocation5 + $0x52c] ss:$16 sps:$4 sm:$0xff]  }
 0x12c   :  { %5165 = vmatprep.subr.bf16.mxu0 %v8177_v4  ;;  %v8261_v4 = vld [vmem:[#allocation5 + $0x924] ss:$16 sps:$4 sm:$0xff]  }
 0x12e   :  { %5639 = vmatpush1.bf16.msra.mxu1 %v8178_v7  ;;  %v8262_v7 = vld [vmem:[#allocation5 + $0x528] ss:$16 sps:$4 sm:$0xff]  }
 0x12f   :  { %5166 = vmatpush1.bf16.msra.mxu0 %v8175_v6  ;;  %5640 = vmatprep.subr.bf16.mxu1 %v8186_v9  ;;  %v8259_v6 = vld [vmem:[#allocation5 + $0x920] ss:$16 sps:$4 sm:$0xff]   ;;  %v8270_v9 = vld [vmem:[#allocation5 + $0x54c] ss:$16 sps:$4 sm:$0xff]  }
 0x130   :  { %5167 = vmatprep.subr.bf16.mxu0 %v8183_v8  ;;  %v8267_v8 = vld [vmem:[#allocation5 + $0x944] ss:$16 sps:$4 sm:$0xff]  }
 0x132   :  { %5641 = vmatpush1.bf16.msra.mxu1 %v8184_v11  ;;  %v8268_v11 = vld [vmem:[#allocation5 + $0x548] ss:$16 sps:$4 sm:$0xff]  }
 0x133   :  { %5168 = vmatpush1.bf16.msra.mxu0 %v8181_v10  ;;  %5642 = vmatprep.subr.bf16.mxu1 %v8192_v14  ;;  %v8265_v10 = vld [vmem:[#allocation5 + $0x940] ss:$16 sps:$4 sm:$0xff]   ;;  %v8276_v14 = vld [vmem:[#allocation5 + $0x56c] ss:$16 sps:$4 sm:$0xff]  }
 0x134   :  { %5169 = vmatprep.subr.bf16.mxu0 %v8189_v13  ;;  %v8273_v13 = vld [vmem:[#allocation5 + $0x964] ss:$16 sps:$4 sm:$0xff]  }
 0x136   :  { %5643 = vmatpush1.bf16.msra.mxu1 %v8190_v17  ;;  %v8274_v17 = vld [vmem:[#allocation5 + $0x568] ss:$16 sps:$4 sm:$0xff]  }
 0x137   :  { %5170 = vmatpush1.bf16.msra.mxu0 %v8187_v16  ;;  %5644 = vmatprep.subr.bf16.mxu1 %v8198_v19  ;;  %v8271_v16 = vld [vmem:[#allocation5 + $0x960] ss:$16 sps:$4 sm:$0xff]   ;;  %v8282_v19 = vld [vmem:[#allocation5 + $0x58c] ss:$16 sps:$4 sm:$0xff]  }
 0x138   :  { %5171 = vmatprep.subr.bf16.mxu0 %v8195_v18  ;;  %v8279_v18 = vld [vmem:[#allocation5 + $0x984] ss:$16 sps:$4 sm:$0xff]  }
 0x13a   :  { %5645 = vmatpush1.bf16.msra.mxu1 %v8196_v21  ;;  %v8280_v21 = vld [vmem:[#allocation5 + $0x588] ss:$16 sps:$4 sm:$0xff]  }
 0x13b   :  { %5172 = vmatpush1.bf16.msra.mxu0 %v8193_v20  ;;  %5646 = vmatprep.subr.bf16.mxu1 %v8204_v23  ;;  %v8277_v20 = vld [vmem:[#allocation5 + $0x980] ss:$16 sps:$4 sm:$0xff]   ;;  %v8288_v23 = vld [vmem:[#allocation5 + $0x5ac] ss:$16 sps:$4 sm:$0xff]  }
 0x13c   :  { %5173 = vmatprep.subr.bf16.mxu0 %v8201_v22  ;;  %v8285_v22 = vld [vmem:[#allocation5 + $0x9a4] ss:$16 sps:$4 sm:$0xff]  }
 0x13e   :  { %5647 = vmatpush1.bf16.msra.mxu1 %v8202_v26  ;;  %v8286_v26 = vld [vmem:[#allocation5 + $0x5a8] ss:$16 sps:$4 sm:$0xff]  }
 0x13f   :  { %5174 = vmatpush1.bf16.msra.mxu0 %v8199_v25  ;;  %5659 = vmatprep.subr.bf16.mxu1 %v8210_v30  ;;  %v8283_v25 = vld [vmem:[#allocation5 + $0x9a0] ss:$16 sps:$4 sm:$0xff]   ;;  %v8292_v30 = vld [vmem:[#allocation5 + $0x5c8] ss:$16 sps:$4 sm:$0xff]  }
 0x140   :  { %5186 = vmatprep.subr.bf16.mxu0 %v8207_v27  ;;  %v8291_v27 = vld [vmem:[#allocation5 + $0x9c4] ss:$16 sps:$4 sm:$0xff]  }
 0x141   :  { %5649 = vmatmul.mubr.bf16.vlgmr.msra.gmra.mrb[4].mxu1 %v9575_v15  ;;  %v8228_v15 = vld [vmem:[#allocation5 + $0x46c] ss:$16 sps:$4 sm:$0xff]  }
 0x142   :  { %5176 = vmatmul.mubr.bf16.vlgmr.msra.gmra.mrb[0].mxu0 %v9591_v34  ;;  %5660 = vmatpush1.bf16.msra.mxu1 %v8208_v12  ;;  %v8298_v12 = vld [vmem:[#allocation5 + $0x5e8] ss:$16 sps:$4 sm:$0xff]  }
 0x143   :  { %5187 = vmatpush1.bf16.msra.mxu0 %v8205_v31  ;;  %5661 = vmatprep.subr.bf16.mxu1 %v8216_v37  ;;  %v8297_v31 = vld [vmem:[#allocation5 + $0x9e4] ss:$16 sps:$4 sm:$0xff]   ;;  %v150_v37 = vld [vmem:[#allocation2 + $0x108] sm:$0xff] }
 0x144   :  { %5188 = vmatprep.subr.bf16.mxu0 %v8213_v36  ;;  %5218 = vmatprep.mubr.bf16.mxu0 %v9593_v38  ;;  %v125_v36 = vld [vmem:[#allocation2 + $0x40] sm:$0xff] }
 0x145   :  { %5691 = vmatprep.mubr.bf16.mxu1 %v9580_v44  ;;  %v8232_v44 = vld [vmem:[#allocation5 + $0x488] ss:$16 sps:$4 sm:$0xff]  }
 0x146   :  { %5662 = vmatpush1.bf16.msra.mxu1 %v8214_v40  ;;  %v8306_v40 = vld [vmem:[#allocation5 + $0x60c] ss:$16 sps:$4 sm:$0xff]  }
 0x147   :  { %5189 = vmatpush1.bf16.msra.mxu0 %v8211_v39  ;;  %5663 = vmatprep.subr.bf16.mxu1 %v8222_v55  ;;  %v8303_v39 = vld [vmem:[#allocation5 + $0xa04] ss:$16 sps:$4 sm:$0xff]   ;;  %v128_v55 = vld [vmem:[#allocation2 + $0x58] sm:$0xff] }
 0x148   :  { %5190 = vmatprep.subr.bf16.mxu0 %v8219_v41  ;;  %v8301_v41 = vld [vmem:[#allocation5 + $0xa00] ss:$16 sps:$4 sm:$0xff]  }
 0x14a   :  { %5664 = vmatpush1.bf16.msra.mxu1 %v8220_v43  ;;  %v153_v43 = vld [vmem:[#allocation2 + $0x120] sm:$0xff] }
 0x14b   :  { %5191 = vmatpush1.bf16.msra.mxu0 %v8217_v42  ;;  %5665 = vmatprep.subr.bf16.mxu1 %v8228_v15  ;;  %v9599_v42 = vpack.c.bf16 %v150_v37, %v125_v36  ;;  %v8309_v15 = vld [vmem:[#allocation5 + $0xa24] ss:$16 sps:$4 sm:$0xff]   ;;  %v8384_v37 = vld [vmem:[#allocation5 + $0x7ac] ss:$16 sps:$4 sm:$0xff]  }
 0x14c   :  { %5192 = vmatprep.subr.bf16.mxu0 %v8225_v45  ;;  %v8304_v45 = vld [vmem:[#allocation5 + $0x608] ss:$16 sps:$4 sm:$0xff]   ;;  %v8381_v36 = vld [vmem:[#allocation5 + $0xba4] ss:$16 sps:$4 sm:$0xff]  }
 0x14e   :  { %5666 = vmatpush1.bf16.msra.mxu1 %v8226_v47  ;;  %v9601_v47 = vpack.c.bf16 %v153_v43, %v128_v55  ;;  %v8390_v55 = vld [vmem:[#allocation5 + $0x7cc] ss:$16 sps:$4 sm:$0xff]   ;;  %v8385_v43 = vld [vmem:[#allocation5 + $0xbc0] ss:$16 sps:$4 sm:$0xff]  }
 0x14f   :  { %5193 = vmatpush1.bf16.msra.mxu0 %v8223_v46  ;;  %5667 = vmatprep.subr.bf16.mxu1 %v8234_v49  ;;  %v8312_v46 = vld [vmem:[#allocation5 + $0x62c] ss:$16 sps:$4 sm:$0xff]   ;;  %v8310_v49 = vld [vmem:[#allocation5 + $0x628] ss:$16 sps:$4 sm:$0xff]  }
 0x150   :  { %5194 = vmatprep.subr.bf16.mxu0 %v8231_v48  ;;  %v8307_v48 = vld [vmem:[#allocation5 + $0xa20] ss:$16 sps:$4 sm:$0xff]  }
 0x152   :  { %5668 = vmatpush1.bf16.msra.mxu1 %v8232_v44  ;;  %v8318_v44 = vld [vmem:[#allocation5 + $0x64c] ss:$16 sps:$4 sm:$0xff]  }
 0x153   :  { %5195 = vmatpush1.bf16.msra.mxu0 %v8229_v50  ;;  %5669 = vmatprep.subr.bf16.mxu1 %v8240_v52  ;;  %v8315_v50 = vld [vmem:[#allocation5 + $0xa44] ss:$16 sps:$4 sm:$0xff]   ;;  %v8316_v52 = vld [vmem:[#allocation5 + $0x648] ss:$16 sps:$4 sm:$0xff]  }
 0x154   :  { %5196 = vmatprep.subr.bf16.mxu0 %v8237_v51  ;;  %v8313_v51 = vld [vmem:[#allocation5 + $0xa40] ss:$16 sps:$4 sm:$0xff]  }
 0x156   :  { %5670 = vmatpush1.bf16.msra.mxu1 %v8238_v54  ;;  %v8319_v54 = vld [vmem:[#allocation5 + $0xa60] ss:$16 sps:$4 sm:$0xff]  }
 0x157   :  { %5197 = vmatpush1.bf16.msra.mxu0 %v8235_v53  ;;  %5671 = vmatprep.subr.bf16.mxu1 %v8246_v57  ;;  %v8321_v53 = vld [vmem:[#allocation5 + $0xa64] ss:$16 sps:$4 sm:$0xff]  }
 0x158   :  { %5198 = vmatprep.subr.bf16.mxu0 %v8243_v56  ;;  %v8322_v56 = vld [vmem:[#allocation5 + $0x668] ss:$16 sps:$4 sm:$0xff]   ;;  %v8327_v57 = vld [vmem:[#allocation5 + $0xa84] ss:$16 sps:$4 sm:$0xff]  }
 0x15a   :  { %5672 = vmatpush1.bf16.msra.mxu1 %v8244_v59  ;;  %v8325_v59 = vld [vmem:[#allocation5 + $0xa80] ss:$16 sps:$4 sm:$0xff]  }
 0x15b   :  { %5199 = vmatpush1.bf16.msra.mxu0 %v8241_v58  ;;  %5673 = vmatprep.subr.bf16.mxu1 %v8252_v61  ;;  %v8330_v58 = vld [vmem:[#allocation5 + $0x68c] ss:$16 sps:$4 sm:$0xff]  }
 0x15c   :  { %5200 = vmatprep.subr.bf16.mxu0 %v8249_v60  ;;  %v8333_v60 = vld [vmem:[#allocation5 + $0xaa4] ss:$16 sps:$4 sm:$0xff]   ;;  %v8336_v61 = vld [vmem:[#allocation5 + $0x6ac] ss:$16 sps:$4 sm:$0xff]  }
 0x15e   :  { %5674 = vmatpush1.bf16.msra.mxu1 %v8250_v63  ;;  %v8334_v63 = vld [vmem:[#allocation5 + $0x6a8] ss:$16 sps:$4 sm:$0xff]  }
 0x15f   :  { %5201 = vmatpush1.bf16.msra.mxu0 %v8247_v62  ;;  %5675 = vmatprep.subr.bf16.mxu1 %v8258_v1  ;;  %v8331_v62 = vld [vmem:[#allocation5 + $0xaa0] ss:$16 sps:$4 sm:$0xff]   ;;  %v8342_v1 = vld [vmem:[#allocation5 + $0x6cc] ss:$16 sps:$4 sm:$0xff]  }
 0x160   :  { %5202 = vmatprep.subr.bf16.mxu0 %v8255_v0  ;;  %v8339_v0 = vld [vmem:[#allocation5 + $0xac4] ss:$16 sps:$4 sm:$0xff]  }
 0x162   :  { %5676 = vmatpush1.bf16.msra.mxu1 %v8256_v3 }
 0x163   :  { %5203 = vmatpush1.bf16.msra.mxu0 %v8253_v2  ;;  %5677 = vmatprep.subr.bf16.mxu1 %v8264_v5 }
 0x164   :  { %5204 = vmatprep.subr.bf16.mxu0 %v8261_v4  ;;  %v8337_v4 = vld [vmem:[#allocation5 + $0xac0] ss:$16 sps:$4 sm:$0xff]  }
 0x166   :  { %5678 = vmatpush1.bf16.msra.mxu1 %v8262_v7 }
 0x167   :  { %5205 = vmatpush1.bf16.msra.mxu0 %v8259_v6  ;;  %5679 = vmatprep.subr.bf16.mxu1 %v8270_v9  ;;  %v8340_v6 = vld [vmem:[#allocation5 + $0x6c8] ss:$16 sps:$4 sm:$0xff]   ;;  %v8348_v9 = vld [vmem:[#allocation5 + $0x6ec] ss:$16 sps:$4 sm:$0xff]  }
 0x168   :  { %5206 = vmatprep.subr.bf16.mxu0 %v8267_v8  ;;  %v8345_v8 = vld [vmem:[#allocation5 + $0xae4] ss:$16 sps:$4 sm:$0xff]  }
 0x16a   :  { %5680 = vmatpush1.bf16.msra.mxu1 %v8268_v11  ;;  %v8346_v11 = vld [vmem:[#allocation5 + $0x6e8] ss:$16 sps:$4 sm:$0xff]  }
 0x16b   :  { %5207 = vmatpush1.bf16.msra.mxu0 %v8265_v10  ;;  %5681 = vmatprep.subr.bf16.mxu1 %v8276_v14  ;;  %v8343_v10 = vld [vmem:[#allocation5 + $0xae0] ss:$16 sps:$4 sm:$0xff]   ;;  %v8354_v14 = vld [vmem:[#allocation5 + $0x70c] ss:$16 sps:$4 sm:$0xff]  }
 0x16c   :  { %5208 = vmatprep.subr.bf16.mxu0 %v8273_v13  ;;  %v8351_v13 = vld [vmem:[#allocation5 + $0xb04] ss:$16 sps:$4 sm:$0xff]  }
 0x16e   :  { %5682 = vmatpush1.bf16.msra.mxu1 %v8274_v17  ;;  %v8352_v17 = vld [vmem:[#allocation5 + $0x708] ss:$16 sps:$4 sm:$0xff]  }
 0x16f   :  { %5209 = vmatpush1.bf16.msra.mxu0 %v8271_v16  ;;  %5683 = vmatprep.subr.bf16.mxu1 %v8282_v19  ;;  %v8349_v16 = vld [vmem:[#allocation5 + $0xb00] ss:$16 sps:$4 sm:$0xff]   ;;  %v8360_v19 = vld [vmem:[#allocation5 + $0x72c] ss:$16 sps:$4 sm:$0xff]  }
 0x170   :  { %5210 = vmatprep.subr.bf16.mxu0 %v8279_v18  ;;  %v8357_v18 = vld [vmem:[#allocation5 + $0xb24] ss:$16 sps:$4 sm:$0xff]  }
 0x172   :  { %5684 = vmatpush1.bf16.msra.mxu1 %v8280_v21  ;;  %v8358_v21 = vld [vmem:[#allocation5 + $0x728] ss:$16 sps:$4 sm:$0xff]  }
 0x173   :  { %5211 = vmatpush1.bf16.msra.mxu0 %v8277_v20  ;;  %5685 = vmatprep.subr.bf16.mxu1 %v8288_v23  ;;  %v8355_v20 = vld [vmem:[#allocation5 + $0xb20] ss:$16 sps:$4 sm:$0xff]   ;;  %v8366_v23 = vld [vmem:[#allocation5 + $0x74c] ss:$16 sps:$4 sm:$0xff]  }
 0x174   :  { %5212 = vmatprep.subr.bf16.mxu0 %v8285_v22  ;;  %v8363_v22 = vld [vmem:[#allocation5 + $0xb44] ss:$16 sps:$4 sm:$0xff]  }
 0x176   :  { %5686 = vmatpush1.bf16.msra.mxu1 %v8286_v26  ;;  %v8364_v26 = vld [vmem:[#allocation5 + $0x748] ss:$16 sps:$4 sm:$0xff]  }
 0x177   :  { %5213 = vmatpush1.bf16.msra.mxu0 %v8283_v25  ;;  %5687 = vmatprep.subr.bf16.mxu1 %v8294_v28  ;;  %v8361_v25 = vld [vmem:[#allocation5 + $0xb40] ss:$16 sps:$4 sm:$0xff]   ;;  %v8372_v28 = vld [vmem:[#allocation5 + $0x76c] ss:$16 sps:$4 sm:$0xff]  }
 0x178   :  { %5214 = vmatprep.subr.bf16.mxu0 %v8291_v27  ;;  %v8369_v27 = vld [vmem:[#allocation5 + $0xb64] ss:$16 sps:$4 sm:$0xff]  }
 0x17a   :  { %5688 = vmatpush1.bf16.msra.mxu1 %v8292_v30  ;;  %v8370_v30 = vld [vmem:[#allocation5 + $0x768] ss:$16 sps:$4 sm:$0xff]  }
 0x17b   :  { %5215 = vmatpush1.bf16.msra.mxu0 %v8289_v29  ;;  %5689 = vmatprep.subr.bf16.mxu1 %v8300_v32  ;;  %v8367_v29 = vld [vmem:[#allocation5 + $0xb60] ss:$16 sps:$4 sm:$0xff]   ;;  %v8378_v32 = vld [vmem:[#allocation5 + $0x78c] ss:$16 sps:$4 sm:$0xff]  }
 0x17c   :  { %5216 = vmatprep.subr.bf16.mxu0 %v8297_v31  ;;  %v8375_v31 = vld [vmem:[#allocation5 + $0xb84] ss:$16 sps:$4 sm:$0xff]  }
 0x17e   :  { %5690 = vmatpush1.bf16.msra.mxu1 %v8298_v12  ;;  %v8376_v12 = vld [vmem:[#allocation5 + $0x788] ss:$16 sps:$4 sm:$0xff]  }
 0x17f   :  { %5217 = vmatpush1.bf16.msra.mxu0 %v8295_v35  ;;  %5702 = vmatprep.subr.bf16.mxu1 %v8306_v40  ;;  %v8373_v35 = vld [vmem:[#allocation5 + $0xb80] ss:$16 sps:$4 sm:$0xff]   ;;  %v8382_v40 = vld [vmem:[#allocation5 + $0x7a8] ss:$16 sps:$4 sm:$0xff]  }
 0x180   :  { %5229 = vmatprep.subr.bf16.mxu0 %v8303_v39  ;;  %v8379_v39 = vld [vmem:[#allocation5 + $0xba0] ss:$16 sps:$4 sm:$0xff]  }
 0x181   :  { %5692 = vmatmul.mubr.bf16.vlgmr.msra.gmra.mrb[4].mxu1 %v9583_v24  ;;  %v8324_v24 = vld [vmem:[#allocation5 + $0x66c] ss:$16 sps:$4 sm:$0xff]  }
 0x182   :  { %5219 = vmatmul.mubr.bf16.vlgmr.msra.gmra.mrb[0].mxu0 %v9599_v42  ;;  %5703 = vmatpush1.bf16.msra.mxu1 %v8304_v45  ;;  %v8388_v45 = vld [vmem:[#allocation5 + $0x7c8] ss:$16 sps:$4 sm:$0xff]  }
 0x183   :  { %5230 = vmatpush1.bf16.msra.mxu0 %v8301_v41  ;;  %5704 = vmatprep.subr.bf16.mxu1 %v8312_v46  ;;  %v8387_v41 = vld [vmem:[#allocation5 + $0xbc4] ss:$16 sps:$4 sm:$0xff]   ;;  %v8396_v46 = vld [vmem:[#allocation5 + $0x7ec] ss:$16 sps:$4 sm:$0xff]  }
 0x184   :  { %5231 = vmatprep.subr.bf16.mxu0 %v8309_v15  ;;  %5261 = vmatprep.mubr.bf16.mxu0 %v9601_v47  ;;  %v8393_v15 = vld [vmem:[#allocation5 + $0xbe4] ss:$16 sps:$4 sm:$0xff]  }
 0x185   :  { %5734 = vmatprep.mubr.bf16.mxu1 %v9587_v33  ;;  %v8328_v33 = vld [vmem:[#allocation5 + $0x688] ss:$16 sps:$4 sm:$0xff]  }
 0x186   :  { %5705 = vmatpush1.bf16.msra.mxu1 %v8310_v49  ;;  %v8394_v49 = vld [vmem:[#allocation5 + $0x7e8] ss:$16 sps:$4 sm:$0xff]  }
 0x187   :  { %5232 = vmatpush1.bf16.msra.mxu0 %v8307_v48  ;;  %5706 = vmatprep.subr.bf16.mxu1 %v8318_v44  ;;  %v8391_v48 = vld [vmem:[#allocation5 + $0xbe0] ss:$16 sps:$4 sm:$0xff]   ;;  %v8402_v44 = vld [vmem:[#allocation5 + $0x80c] ss:$16 sps:$4 sm:$0xff]  }
 0x188   :  { %5233 = vmatprep.subr.bf16.mxu0 %v8315_v50  ;;  %v8399_v50 = vld [vmem:[#allocation5 + $0xc04] ss:$16 sps:$4 sm:$0xff]  }
 0x18a   :  { %5707 = vmatpush1.bf16.msra.mxu1 %v8316_v52  ;;  %v152_v52 = vld [vmem:[#allocation2 + $0x118] sm:$0xff] }
 0x18b   :  { %5234 = vmatpush1.bf16.msra.mxu0 %v8313_v51  ;;  %5708 = vmatprep.subr.bf16.mxu1 %v8324_v24  ;;  %v127_v51 = vld [vmem:[#allocation2 + $0x50] sm:$0xff] }
 0x18c   :  { %5235 = vmatprep.subr.bf16.mxu0 %v8321_v53  ;;  %v130_v53 = vld [vmem:[#allocation2 + $0x68] sm:$0xff]  ;;  %v155_v24 = vld [vmem:[#allocation2 + $0x130] sm:$0xff] }
 0x18e   :  { %5709 = vmatpush1.bf16.msra.mxu1 %v8322_v56  ;;  %v8397_v56 = vld [vmem:[#allocation5 + $0xc00] ss:$16 sps:$4 sm:$0xff]  }
 0x18f   :  { %5236 = vmatpush1.bf16.msra.mxu0 %v8319_v54  ;;  %5710 = vmatprep.subr.bf16.mxu1 %v8330_v58  ;;  %v9615_v54 = vpack.c.bf16 %v152_v52, %v127_v51  ;;  %v8405_v58 = vld [vmem:[#allocation5 + $0xc24] ss:$16 sps:$4 sm:$0xff]   ;;  %v8475_v51 = vld [vmem:[#allocation5 + $0xda0] ss:$16 sps:$4 sm:$0xff]   ;;  %v8478_v52 = vld [vmem:[#allocation5 + $0x9a8] ss:$16 sps:$4 sm:$0xff]  }
 0x190   :  { %5237 = vmatprep.subr.bf16.mxu0 %v8327_v57  ;;  %v8400_v57 = vld [vmem:[#allocation5 + $0x808] ss:$16 sps:$4 sm:$0xff]  }
 0x192   :  { %5711 = vmatpush1.bf16.msra.mxu1 %v8328_v33  ;;  %v9617_v33 = vpack.c.bf16 %v155_v24, %v130_v53  ;;  %v8483_v53 = vld [vmem:[#allocation5 + $0xdc4] ss:$16 sps:$4 sm:$0xff]   ;;  %v8486_v24 = vld [vmem:[#allocation5 + $0x9cc] ss:$16 sps:$4 sm:$0xff]  }
 0x193   :  { %5238 = vmatpush1.bf16.msra.mxu0 %v8325_v59  ;;  %5712 = vmatprep.subr.bf16.mxu1 %v8336_v61  ;;  %v8408_v59 = vld [vmem:[#allocation5 + $0x82c] ss:$16 sps:$4 sm:$0xff]   ;;  %v8406_v61 = vld [vmem:[#allocation5 + $0x828] ss:$16 sps:$4 sm:$0xff]  }
 0x194   :  { %5239 = vmatprep.subr.bf16.mxu0 %v8333_v60  ;;  %v9607_v2 = vpop.f32.mrb[0].mxu1  ;;  %v8403_v60 = vld [vmem:[#allocation5 + $0xc20] ss:$16 sps:$4 sm:$0xff]  }
 0x195   :  { %v9609_v3 = vpop.f32.mrb[1].mxu1 }
 0x196   :  { %v9611_v5 = vpop.f32.mrb[2].mxu1  ;;  %5713 = vmatpush1.bf16.msra.mxu1 %v8334_v63  ;;  %v8414_v63 = vld [vmem:[#allocation5 + $0x84c] ss:$16 sps:$4 sm:$0xff]  }
 0x197   :  { %5240 = vmatpush1.bf16.msra.mxu0 %v8331_v62  ;;  %v9613_v7 = vpop.f32.mrb[3].mxu1  ;;  %5714 = vmatprep.subr.bf16.mxu1 %v8342_v1  ;;  %v8411_v62 = vld [vmem:[#allocation5 + $0xc44] ss:$16 sps:$4 sm:$0xff]   ;;  %v8412_v1 = vld [vmem:[#allocation5 + $0x848] ss:$16 sps:$4 sm:$0xff]  }
 0x198   :  { %5241 = vmatprep.subr.bf16.mxu0 %v8339_v0  ;;  %v8409_v0 = vld [vmem:[#allocation5 + $0xc40] ss:$16 sps:$4 sm:$0xff]  }
 0x19a   :  { %5715 = vmatpush1.bf16.msra.mxu1 %v8340_v6  ;;  %v8415_v6 = vld [vmem:[#allocation5 + $0xc60] ss:$16 sps:$4 sm:$0xff]  }
 0x19b   :  { %5242 = vmatpush1.bf16.msra.mxu0 %v8337_v4  ;;  %5716 = vmatprep.subr.bf16.mxu1 %v8348_v9  ;;  %v8417_v4 = vld [vmem:[#allocation5 + $0xc64] ss:$16 sps:$4 sm:$0xff]  }
 0x19c   :  { %5243 = vmatprep.subr.bf16.mxu0 %v8345_v8  ;;  %v8418_v8 = vld [vmem:[#allocation5 + $0x868] ss:$16 sps:$4 sm:$0xff]   ;;  %v8423_v9 = vld [vmem:[#allocation5 + $0xc84] ss:$16 sps:$4 sm:$0xff]  }
 0x19e   :  { %5717 = vmatpush1.bf16.msra.mxu1 %v8346_v11  ;;  %v8421_v11 = vld [vmem:[#allocation5 + $0xc80] ss:$16 sps:$4 sm:$0xff]  }
 0x19f   :  { %5244 = vmatpush1.bf16.msra.mxu0 %v8343_v10  ;;  %5718 = vmatprep.subr.bf16.mxu1 %v8354_v14  ;;  %v8426_v10 = vld [vmem:[#allocation5 + $0x88c] ss:$16 sps:$4 sm:$0xff]  }
 0x1a0   :  { %5245 = vmatprep.subr.bf16.mxu0 %v8351_v13  ;;  %v8429_v13 = vld [vmem:[#allocation5 + $0xca4] ss:$16 sps:$4 sm:$0xff]   ;;  %v8432_v14 = vld [vmem:[#allocation5 + $0x8ac] ss:$16 sps:$4 sm:$0xff]  }
 0x1a2   :  { %5719 = vmatpush1.bf16.msra.mxu1 %v8352_v17  ;;  %v8430_v17 = vld [vmem:[#allocation5 + $0x8a8] ss:$16 sps:$4 sm:$0xff]  }
 0x1a3   :  { %5246 = vmatpush1.bf16.msra.mxu0 %v8349_v16  ;;  %5720 = vmatprep.subr.bf16.mxu1 %v8360_v19  ;;  %v8427_v16 = vld [vmem:[#allocation5 + $0xca0] ss:$16 sps:$4 sm:$0xff]   ;;  %v8438_v19 = vld [vmem:[#allocation5 + $0x8cc] ss:$16 sps:$4 sm:$0xff]  }
 0x1a4   :  { %5247 = vmatprep.subr.bf16.mxu0 %v8357_v18  ;;  %v8435_v18 = vld [vmem:[#allocation5 + $0xcc4] ss:$16 sps:$4 sm:$0xff]  }
 0x1a6   :  { %5721 = vmatpush1.bf16.msra.mxu1 %v8358_v21  ;;  %v8436_v21 = vld [vmem:[#allocation5 + $0x8c8] ss:$16 sps:$4 sm:$0xff]  }
 0x1a7   :  { %5248 = vmatpush1.bf16.msra.mxu0 %v8355_v20  ;;  %5722 = vmatprep.subr.bf16.mxu1 %v8366_v23  ;;  %v8433_v20 = vld [vmem:[#allocation5 + $0xcc0] ss:$16 sps:$4 sm:$0xff]   ;;  %v8444_v23 = vld [vmem:[#allocation5 + $0x8ec] ss:$16 sps:$4 sm:$0xff]  }
 0x1a8   :  { %5249 = vmatprep.subr.bf16.mxu0 %v8363_v22  ;;  %v8441_v22 = vld [vmem:[#allocation5 + $0xce4] ss:$16 sps:$4 sm:$0xff]  }
 0x1aa   :  { %5723 = vmatpush1.bf16.msra.mxu1 %v8364_v26  ;;  %v8442_v26 = vld [vmem:[#allocation5 + $0x8e8] ss:$16 sps:$4 sm:$0xff]  }
 0x1ab   :  { %5250 = vmatpush1.bf16.msra.mxu0 %v8361_v25  ;;  %5724 = vmatprep.subr.bf16.mxu1 %v8372_v28  ;;  %v8439_v25 = vld [vmem:[#allocation5 + $0xce0] ss:$16 sps:$4 sm:$0xff]   ;;  %v8450_v28 = vld [vmem:[#allocation5 + $0x90c] ss:$16 sps:$4 sm:$0xff]  }
 0x1ac   :  { %5251 = vmatprep.subr.bf16.mxu0 %v8369_v27  ;;  %v8447_v27 = vld [vmem:[#allocation5 + $0xd04] ss:$16 sps:$4 sm:$0xff]  }
 0x1ae   :  { %5725 = vmatpush1.bf16.msra.mxu1 %v8370_v30  ;;  %v8448_v30 = vld [vmem:[#allocation5 + $0x908] ss:$16 sps:$4 sm:$0xff]  }
 0x1af   :  { %5252 = vmatpush1.bf16.msra.mxu0 %v8367_v29  ;;  %5726 = vmatprep.subr.bf16.mxu1 %v8378_v32  ;;  %v8445_v29 = vld [vmem:[#allocation5 + $0xd00] ss:$16 sps:$4 sm:$0xff]   ;;  %v8456_v32 = vld [vmem:[#allocation5 + $0x92c] ss:$16 sps:$4 sm:$0xff]  }
 0x1b0   :  { %5253 = vmatprep.subr.bf16.mxu0 %v8375_v31  ;;  %v8453_v31 = vld [vmem:[#allocation5 + $0xd24] ss:$16 sps:$4 sm:$0xff]  }
 0x1b2   :  { %5727 = vmatpush1.bf16.msra.mxu1 %v8376_v12  ;;  %v8454_v12 = vld [vmem:[#allocation5 + $0x928] ss:$16 sps:$4 sm:$0xff]  }
 0x1b3   :  { %5254 = vmatpush1.bf16.msra.mxu0 %v8373_v35  ;;  %5728 = vmatprep.subr.bf16.mxu1 %v8384_v37  ;;  %v8451_v35 = vld [vmem:[#allocation5 + $0xd20] ss:$16 sps:$4 sm:$0xff]   ;;  %v8462_v37 = vld [vmem:[#allocation5 + $0x94c] ss:$16 sps:$4 sm:$0xff]  }
 0x1b4   :  { %5255 = vmatprep.subr.bf16.mxu0 %v8381_v36  ;;  %v8459_v36 = vld [vmem:[#allocation5 + $0xd44] ss:$16 sps:$4 sm:$0xff]  }
 0x1b6   :  { %5729 = vmatpush1.bf16.msra.mxu1 %v8382_v40  ;;  %v8460_v40 = vld [vmem:[#allocation5 + $0x948] ss:$16 sps:$4 sm:$0xff]  }
 0x1b7   :  { %5256 = vmatpush1.bf16.msra.mxu0 %v8379_v39  ;;  %5730 = vmatprep.subr.bf16.mxu1 %v8390_v55  ;;  %v8457_v39 = vld [vmem:[#allocation5 + $0xd40] ss:$16 sps:$4 sm:$0xff]   ;;  %v8468_v55 = vld [vmem:[#allocation5 + $0x96c] ss:$16 sps:$4 sm:$0xff]  }
 0x1b8   :  { %5257 = vmatprep.subr.bf16.mxu0 %v8387_v41  ;;  %v8465_v41 = vld [vmem:[#allocation5 + $0xd64] ss:$16 sps:$4 sm:$0xff]  }
 0x1ba   :  { %5731 = vmatpush1.bf16.msra.mxu1 %v8388_v45  ;;  %v8466_v45 = vld [vmem:[#allocation5 + $0x968] ss:$16 sps:$4 sm:$0xff]  }
 0x1bb   :  { %5258 = vmatpush1.bf16.msra.mxu0 %v8385_v43  ;;  %5732 = vmatprep.subr.bf16.mxu1 %v8396_v46  ;;  %v8463_v43 = vld [vmem:[#allocation5 + $0xd60] ss:$16 sps:$4 sm:$0xff]   ;;  %v8474_v46 = vld [vmem:[#allocation5 + $0x98c] ss:$16 sps:$4 sm:$0xff]  }
 0x1bc   :  { %5259 = vmatprep.subr.bf16.mxu0 %v8393_v15  ;;  %v8471_v15 = vld [vmem:[#allocation5 + $0xd84] ss:$16 sps:$4 sm:$0xff]  }
 0x1be   :  { %5733 = vmatpush1.bf16.msra.mxu1 %v8394_v49  ;;  %v8472_v49 = vld [vmem:[#allocation5 + $0x988] ss:$16 sps:$4 sm:$0xff]  }
 0x1bf   :  { %5260 = vmatpush1.bf16.msra.mxu0 %v8391_v48  ;;  %5745 = vmatprep.subr.bf16.mxu1 %v8402_v44  ;;  %v8469_v48 = vld [vmem:[#allocation5 + $0xd80] ss:$16 sps:$4 sm:$0xff]   ;;  %v8480_v44 = vld [vmem:[#allocation5 + $0x9ac] ss:$16 sps:$4 sm:$0xff]  }
 0x1c0   :  { %5272 = vmatprep.subr.bf16.mxu0 %v8399_v50  ;;  %v8477_v50 = vld [vmem:[#allocation5 + $0xda4] ss:$16 sps:$4 sm:$0xff]  }
 0x1c1   :  { %5735 = vmatmul.mubr.bf16.vlgmr.msra.gmra.mrb[4].mxu1 %v9591_v34  ;;  %v8420_v34 = vld [vmem:[#allocation5 + $0x86c] ss:$16 sps:$4 sm:$0xff]  }
 0x1c2   :  { %5262 = vmatmul.mubr.bf16.vlgmr.msra.gmra.mrb[0].mxu0 %v9615_v54  ;;  %5746 = vmatpush1.bf16.msra.mxu1 %v8400_v57  ;;  %v8484_v57 = vld [vmem:[#allocation5 + $0x9c8] ss:$16 sps:$4 sm:$0xff]  }
 0x1c3   :  { %5273 = vmatpush1.bf16.msra.mxu0 %v8397_v56  ;;  %5747 = vmatprep.subr.bf16.mxu1 %v8408_v59  ;;  %v8481_v56 = vld [vmem:[#allocation5 + $0xdc0] ss:$16 sps:$4 sm:$0xff]   ;;  %v8492_v59 = vld [vmem:[#allocation5 + $0x9ec] ss:$16 sps:$4 sm:$0xff]  }
 0x1c4   :  { %5274 = vmatprep.subr.bf16.mxu0 %v8405_v58  ;;  %5304 = vmatprep.mubr.bf16.mxu0 %v9617_v33  ;;  %v8489_v58 = vld [vmem:[#allocation5 + $0xde4] ss:$16 sps:$4 sm:$0xff]  }
 0x1c5   :  { %5777 = vmatprep.mubr.bf16.mxu1 %v9593_v38  ;;  %v8424_v38 = vld [vmem:[#allocation5 + $0x888] ss:$16 sps:$4 sm:$0xff]  }
 0x1c6   :  { %5748 = vmatpush1.bf16.msra.mxu1 %v8406_v61  ;;  %v8490_v61 = vld [vmem:[#allocation5 + $0x9e8] ss:$16 sps:$4 sm:$0xff]  }
 0x1c7   :  { %5275 = vmatpush1.bf16.msra.mxu0 %v8403_v60  ;;  %5749 = vmatprep.subr.bf16.mxu1 %v8414_v63  ;;  %v8487_v60 = vld [vmem:[#allocation5 + $0xde0] ss:$16 sps:$4 sm:$0xff]   ;;  %v8498_v63 = vld [vmem:[#allocation5 + $0xa0c] ss:$16 sps:$4 sm:$0xff]  }
 0x1c8   :  { %5276 = vmatprep.subr.bf16.mxu0 %v8411_v62  ;;  %v8495_v62 = vld [vmem:[#allocation5 + $0xe04] ss:$16 sps:$4 sm:$0xff]  }
 0x1ca   :  { %5750 = vmatpush1.bf16.msra.mxu1 %v8412_v1  ;;  %v154_v1 = vld [vmem:[#allocation2 + $0x128] sm:$0xff] }
 0x1cb   :  { %5277 = vmatpush1.bf16.msra.mxu0 %v8409_v0  ;;  %5751 = vmatprep.subr.bf16.mxu1 %v8420_v34  ;;  %v129_v0 = vld [vmem:[#allocation2 + $0x60] sm:$0xff] }
 0x1cc   :  { %5278 = vmatprep.subr.bf16.mxu0 %v8417_v4  ;;  %v132_v4 = vld [vmem:[#allocation2 + $0x78] sm:$0xff]  ;;  %v157_v34 = vld [vmem:[#allocation2 + $0x140] sm:$0xff] }
 0x1ce   :  { %5752 = vmatpush1.bf16.msra.mxu1 %v8418_v8  ;;  %v8493_v8 = vld [vmem:[#allocation5 + $0xe00] ss:$16 sps:$4 sm:$0xff]  }
 0x1cf   :  { %5279 = vmatpush1.bf16.msra.mxu0 %v8415_v6  ;;  %5753 = vmatprep.subr.bf16.mxu1 %v8426_v10  ;;  %v9623_v6 = vpack.c.bf16 %v154_v1, %v129_v0  ;;  %v8501_v10 = vld [vmem:[#allocation5 + $0xe24] ss:$16 sps:$4 sm:$0xff]   ;;  %v8571_v0 = vld [vmem:[#allocation5 + $0xfa0] ss:$16 sps:$4 sm:$0xff]   ;;  %v8574_v1 = vld [vmem:[#allocation5 + $0xba8] ss:$16 sps:$4 sm:$0xff]  }
 0x1d0   :  { %5280 = vmatprep.subr.bf16.mxu0 %v8423_v9  ;;  %v8496_v9 = vld [vmem:[#allocation5 + $0xa08] ss:$16 sps:$4 sm:$0xff]  }
 0x1d2   :  { %5754 = vmatpush1.bf16.msra.mxu1 %v8424_v38  ;;  %v9625_v38 = vpack.c.bf16 %v157_v34, %v132_v4  ;;  %v8579_v4 = vld [vmem:[#allocation5 + $0xfc4] ss:$16 sps:$4 sm:$0xff]   ;;  %v8582_v34 = vld [vmem:[#allocation5 + $0xbcc] ss:$16 sps:$4 sm:$0xff]  }
 0x1d3   :  { %5281 = vmatpush1.bf16.msra.mxu0 %v8421_v11  ;;  %5755 = vmatprep.subr.bf16.mxu1 %v8432_v14  ;;  %v8504_v11 = vld [vmem:[#allocation5 + $0xa2c] ss:$16 sps:$4 sm:$0xff]   ;;  %v8502_v14 = vld [vmem:[#allocation5 + $0xa28] ss:$16 sps:$4 sm:$0xff]  }
 0x1d4   :  { %5282 = vmatprep.subr.bf16.mxu0 %v8429_v13  ;;  %v8499_v13 = vld [vmem:[#allocation5 + $0xe20] ss:$16 sps:$4 sm:$0xff]  }
 0x1d6   :  { %5756 = vmatpush1.bf16.msra.mxu1 %v8430_v17  ;;  %v8510_v17 = vld [vmem:[#allocation5 + $0xa4c] ss:$16 sps:$4 sm:$0xff]  }
 0x1d7   :  { %5283 = vmatpush1.bf16.msra.mxu0 %v8427_v16  ;;  %5757 = vmatprep.subr.bf16.mxu1 %v8438_v19  ;;  %v8507_v16 = vld [vmem:[#allocation5 + $0xe44] ss:$16 sps:$4 sm:$0xff]   ;;  %v8508_v19 = vld [vmem:[#allocation5 + $0xa48] ss:$16 sps:$4 sm:$0xff]  }
 0x1d8   :  { %5284 = vmatprep.subr.bf16.mxu0 %v8435_v18  ;;  %v8505_v18 = vld [vmem:[#allocation5 + $0xe40] ss:$16 sps:$4 sm:$0xff]  }
 0x1da   :  { %5758 = vmatpush1.bf16.msra.mxu1 %v8436_v21  ;;  %v8511_v21 = vld [vmem:[#allocation5 + $0xe60] ss:$16 sps:$4 sm:$0xff]  }
 0x1db   :  { %5285 = vmatpush1.bf16.msra.mxu0 %v8433_v20  ;;  %5759 = vmatprep.subr.bf16.mxu1 %v8444_v23  ;;  %v8513_v20 = vld [vmem:[#allocation5 + $0xe64] ss:$16 sps:$4 sm:$0xff]  }
 0x1dc   :  { %5286 = vmatprep.subr.bf16.mxu0 %v8441_v22  ;;  %v8514_v22 = vld [vmem:[#allocation5 + $0xa68] ss:$16 sps:$4 sm:$0xff]   ;;  %v8519_v23 = vld [vmem:[#allocation5 + $0xe84] ss:$16 sps:$4 sm:$0xff]  }
 0x1de   :  { %5760 = vmatpush1.bf16.msra.mxu1 %v8442_v26  ;;  %v8517_v26 = vld [vmem:[#allocation5 + $0xe80] ss:$16 sps:$4 sm:$0xff]  }
 0x1df   :  { %5287 = vmatpush1.bf16.msra.mxu0 %v8439_v25  ;;  %5761 = vmatprep.subr.bf16.mxu1 %v8450_v28  ;;  %v8522_v25 = vld [vmem:[#allocation5 + $0xa8c] ss:$16 sps:$4 sm:$0xff]  }
 0x1e0   :  { %5288 = vmatprep.subr.bf16.mxu0 %v8447_v27  ;;  %v8525_v27 = vld [vmem:[#allocation5 + $0xea4] ss:$16 sps:$4 sm:$0xff]   ;;  %v8528_v28 = vld [vmem:[#allocation5 + $0xaac] ss:$16 sps:$4 sm:$0xff]  }
 0x1e2   :  { %5762 = vmatpush1.bf16.msra.mxu1 %v8448_v30  ;;  %v8526_v30 = vld [vmem:[#allocation5 + $0xaa8] ss:$16 sps:$4 sm:$0xff]  }
 0x1e3   :  { %5289 = vmatpush1.bf16.msra.mxu0 %v8445_v29  ;;  %5763 = vmatprep.subr.bf16.mxu1 %v8456_v32  ;;  %v8523_v29 = vld [vmem:[#allocation5 + $0xea0] ss:$16 sps:$4 sm:$0xff]   ;;  %v8534_v32 = vld [vmem:[#allocation5 + $0xacc] ss:$16 sps:$4 sm:$0xff]  }
 0x1e4   :  { %5290 = vmatprep.subr.bf16.mxu0 %v8453_v31  ;;  %v8531_v31 = vld [vmem:[#allocation5 + $0xec4] ss:$16 sps:$4 sm:$0xff]  }
 0x1e6   :  { %5764 = vmatpush1.bf16.msra.mxu1 %v8454_v12  ;;  %v8532_v12 = vld [vmem:[#allocation5 + $0xac8] ss:$16 sps:$4 sm:$0xff]  }
 0x1e7   :  { %5291 = vmatpush1.bf16.msra.mxu0 %v8451_v35  ;;  %5765 = vmatprep.subr.bf16.mxu1 %v8462_v37  ;;  %v8529_v35 = vld [vmem:[#allocation5 + $0xec0] ss:$16 sps:$4 sm:$0xff]   ;;  %v8540_v37 = vld [vmem:[#allocation5 + $0xaec] ss:$16 sps:$4 sm:$0xff]  }
 0x1e8   :  { %5292 = vmatprep.subr.bf16.mxu0 %v8459_v36  ;;  %v8537_v36 = vld [vmem:[#allocation5 + $0xee4] ss:$16 sps:$4 sm:$0xff]  }
 0x1ea   :  { %5766 = vmatpush1.bf16.msra.mxu1 %v8460_v40  ;;  %v8538_v40 = vld [vmem:[#allocation5 + $0xae8] ss:$16 sps:$4 sm:$0xff]  }
 0x1eb   :  { %5293 = vmatpush1.bf16.msra.mxu0 %v8457_v39  ;;  %5767 = vmatprep.subr.bf16.mxu1 %v8468_v55  ;;  %v8535_v39 = vld [vmem:[#allocation5 + $0xee0] ss:$16 sps:$4 sm:$0xff]   ;;  %v8546_v55 = vld [vmem:[#allocation5 + $0xb0c] ss:$16 sps:$4 sm:$0xff]  }
 0x1ec   :  { %5294 = vmatprep.subr.bf16.mxu0 %v8465_v41  ;;  %v8543_v41 = vld [vmem:[#allocation5 + $0xf04] ss:$16 sps:$4 sm:$0xff]  }
 0x1ee   :  { %5768 = vmatpush1.bf16.msra.mxu1 %v8466_v45  ;;  %v8544_v45 = vld [vmem:[#allocation5 + $0xb08] ss:$16 sps:$4 sm:$0xff]  }
 0x1ef   :  { %5295 = vmatpush1.bf16.msra.mxu0 %v8463_v43  ;;  %5769 = vmatprep.subr.bf16.mxu1 %v8474_v46  ;;  %v8541_v43 = vld [vmem:[#allocation5 + $0xf00] ss:$16 sps:$4 sm:$0xff]   ;;  %v8552_v46 = vld [vmem:[#allocation5 + $0xb2c] ss:$16 sps:$4 sm:$0xff]  }
 0x1f0   :  { %5296 = vmatprep.subr.bf16.mxu0 %v8471_v15  ;;  %v8549_v15 = vld [vmem:[#allocation5 + $0xf24] ss:$16 sps:$4 sm:$0xff]  }
 0x1f2   :  { %5770 = vmatpush1.bf16.msra.mxu1 %v8472_v49  ;;  %v8550_v49 = vld [vmem:[#allocation5 + $0xb28] ss:$16 sps:$4 sm:$0xff]  }
 0x1f3   :  { %5297 = vmatpush1.bf16.msra.mxu0 %v8469_v48  ;;  %5771 = vmatprep.subr.bf16.mxu1 %v8480_v44  ;;  %v8547_v48 = vld [vmem:[#allocation5 + $0xf20] ss:$16 sps:$4 sm:$0xff]   ;;  %v8558_v44 = vld [vmem:[#allocation5 + $0xb4c] ss:$16 sps:$4 sm:$0xff]  }
 0x1f4   :  { %5298 = vmatprep.subr.bf16.mxu0 %v8477_v50  ;;  %v8555_v50 = vld [vmem:[#allocation5 + $0xf44] ss:$16 sps:$4 sm:$0xff]  }
 0x1f6   :  { %5772 = vmatpush1.bf16.msra.mxu1 %v8478_v52  ;;  %v8556_v52 = vld [vmem:[#allocation5 + $0xb48] ss:$16 sps:$4 sm:$0xff]  }
 0x1f7   :  { %5299 = vmatpush1.bf16.msra.mxu0 %v8475_v51  ;;  %5773 = vmatprep.subr.bf16.mxu1 %v8486_v24  ;;  %v8553_v51 = vld [vmem:[#allocation5 + $0xf40] ss:$16 sps:$4 sm:$0xff]   ;;  %v8564_v24 = vld [vmem:[#allocation5 + $0xb6c] ss:$16 sps:$4 sm:$0xff]  }
 0x1f8   :  { %5300 = vmatprep.subr.bf16.mxu0 %v8483_v53  ;;  %v8561_v53 = vld [vmem:[#allocation5 + $0xf64] ss:$16 sps:$4 sm:$0xff]  }
 0x1fa   :  { %5774 = vmatpush1.bf16.msra.mxu1 %v8484_v57  ;;  %v8562_v57 = vld [vmem:[#allocation5 + $0xb68] ss:$16 sps:$4 sm:$0xff]  }
 0x1fb   :  { %5301 = vmatpush1.bf16.msra.mxu0 %v8481_v56  ;;  %5775 = vmatprep.subr.bf16.mxu1 %v8492_v59  ;;  %v8559_v56 = vld [vmem:[#allocation5 + $0xf60] ss:$16 sps:$4 sm:$0xff]   ;;  %v8570_v59 = vld [vmem:[#allocation5 + $0xb8c] ss:$16 sps:$4 sm:$0xff]  }
 0x1fc   :  { %5302 = vmatprep.subr.bf16.mxu0 %v8489_v58  ;;  %v8567_v58 = vld [vmem:[#allocation5 + $0xf84] ss:$16 sps:$4 sm:$0xff]  }
 0x1fe   :  { %5776 = vmatpush1.bf16.msra.mxu1 %v8490_v61  ;;  %v8568_v61 = vld [vmem:[#allocation5 + $0xb88] ss:$16 sps:$4 sm:$0xff]  }
 0x1ff   :  { %5303 = vmatpush1.bf16.msra.mxu0 %v8487_v60  ;;  %5788 = vmatprep.subr.bf16.mxu1 %v8498_v63  ;;  %v8565_v60 = vld [vmem:[#allocation5 + $0xf80] ss:$16 sps:$4 sm:$0xff]   ;;  %v8576_v63 = vld [vmem:[#allocation5 + $0xbac] ss:$16 sps:$4 sm:$0xff]  }
 0x200   :  { %5315 = vmatprep.subr.bf16.mxu0 %v8495_v62  ;;  %v8573_v62 = vld [vmem:[#allocation5 + $0xfa4] ss:$16 sps:$4 sm:$0xff]  }
 0x201   :  { %5778 = vmatmul.mubr.bf16.vlgmr.msra.gmra.mrb[4].mxu1 %v9599_v42  ;;  %v8516_v42 = vld [vmem:[#allocation5 + $0xa6c] ss:$16 sps:$4 sm:$0xff]  }
 0x202   :  { %5305 = vmatmul.mubr.bf16.vlgmr.msra.gmra.mrb[0].mxu0 %v9623_v6  ;;  %5789 = vmatpush1.bf16.msra.mxu1 %v8496_v9  ;;  %v8580_v9 = vld [vmem:[#allocation5 + $0xbc8] ss:$16 sps:$4 sm:$0xff]  }
 0x203   :  { %5316 = vmatpush1.bf16.msra.mxu0 %v8493_v8  ;;  %5790 = vmatprep.subr.bf16.mxu1 %v8504_v11  ;;  %v8577_v8 = vld [vmem:[#allocation5 + $0xfc0] ss:$16 sps:$4 sm:$0xff]   ;;  %v8588_v11 = vld [vmem:[#allocation5 + $0xbec] ss:$16 sps:$4 sm:$0xff]  }
 0x204   :  { %5317 = vmatprep.subr.bf16.mxu0 %v8501_v10  ;;  %5347 = vmatprep.mubr.bf16.mxu0 %v9625_v38  ;;  %v8585_v10 = vld [vmem:[#allocation5 + $0xfe4] ss:$16 sps:$4 sm:$0xff]  }
 0x205   :  { %5820 = vmatprep.mubr.bf16.mxu1 %v9601_v47  ;;  %v8520_v47 = vld [vmem:[#allocation5 + $0xa88] ss:$16 sps:$4 sm:$0xff]  }
 0x206   :  { %5791 = vmatpush1.bf16.msra.mxu1 %v8502_v14  ;;  %v8586_v14 = vld [vmem:[#allocation5 + $0xbe8] ss:$16 sps:$4 sm:$0xff]  }
 0x207   :  { %5318 = vmatpush1.bf16.msra.mxu0 %v8499_v13  ;;  %5792 = vmatprep.subr.bf16.mxu1 %v8510_v17  ;;  %v8583_v13 = vld [vmem:[#allocation5 + $0xfe0] ss:$16 sps:$4 sm:$0xff]   ;;  %v8594_v17 = vld [vmem:[#allocation5 + $0xc0c] ss:$16 sps:$4 sm:$0xff]  }
 0x208   :  { %5319 = vmatprep.subr.bf16.mxu0 %v8507_v16  ;;  %v8591_v16 = vld [vmem:[#allocation5 + $0x1004] ss:$16 sps:$4 sm:$0xff]  }
 0x20a   :  { %5793 = vmatpush1.bf16.msra.mxu1 %v8508_v19  ;;  %v156_v19 = vld [vmem:[#allocation2 + $0x138] sm:$0xff] }
 0x20b   :  { %5320 = vmatpush1.bf16.msra.mxu0 %v8505_v18  ;;  %5794 = vmatprep.subr.bf16.mxu1 %v8516_v42  ;;  %v131_v18 = vld [vmem:[#allocation2 + $0x70] sm:$0xff] }
 0x20c   :  { %5321 = vmatprep.subr.bf16.mxu0 %v8513_v20  ;;  %v134_v20 = vld [vmem:[#allocation2 + $0x88] sm:$0xff]  ;;  %v159_v42 = vld [vmem:[#allocation2 + $0x150] sm:$0xff] }
 0x20e   :  { %5795 = vmatpush1.bf16.msra.mxu1 %v8514_v22  ;;  %v8589_v22 = vld [vmem:[#allocation5 + $0x1000] ss:$16 sps:$4 sm:$0xff]  }
 0x20f   :  { %5322 = vmatpush1.bf16.msra.mxu0 %v8511_v21  ;;  %5796 = vmatprep.subr.bf16.mxu1 %v8522_v25  ;;  %v9631_v21 = vpack.c.bf16 %v156_v19, %v131_v18  ;;  %v8597_v25 = vld [vmem:[#allocation5 + $0x1024] ss:$16 sps:$4 sm:$0xff]   ;;  %v8667_v18 = vld [vmem:[#allocation5 + $0x11a0] ss:$16 sps:$4 sm:$0xff]   ;;  %v8670_v19 = vld [vmem:[#allocation5 + $0xda8] ss:$16 sps:$4 sm:$0xff]  }
 0x210   :  { %5323 = vmatprep.subr.bf16.mxu0 %v8519_v23  ;;  %v8592_v23 = vld [vmem:[#allocation5 + $0xc08] ss:$16 sps:$4 sm:$0xff]  }
 0x212   :  { %5797 = vmatpush1.bf16.msra.mxu1 %v8520_v47  ;;  %v9633_v47 = vpack.c.bf16 %v159_v42, %v134_v20  ;;  %v8675_v20 = vld [vmem:[#allocation5 + $0x11c4] ss:$16 sps:$4 sm:$0xff]   ;;  %v8678_v42 = vld [vmem:[#allocation5 + $0xdcc] ss:$16 sps:$4 sm:$0xff]  }
 0x213   :  { %5324 = vmatpush1.bf16.msra.mxu0 %v8517_v26  ;;  %5798 = vmatprep.subr.bf16.mxu1 %v8528_v28  ;;  %v8600_v26 = vld [vmem:[#allocation5 + $0xc2c] ss:$16 sps:$4 sm:$0xff]   ;;  %v8598_v28 = vld [vmem:[#allocation5 + $0xc28] ss:$16 sps:$4 sm:$0xff]  }
 0x214   :  { %5325 = vmatprep.subr.bf16.mxu0 %v8525_v27  ;;  %v8595_v27 = vld [vmem:[#allocation5 + $0x1020] ss:$16 sps:$4 sm:$0xff]  }
 0x216   :  { %5799 = vmatpush1.bf16.msra.mxu1 %v8526_v30  ;;  %v8606_v30 = vld [vmem:[#allocation5 + $0xc4c] ss:$16 sps:$4 sm:$0xff]  }
 0x217   :  { %5326 = vmatpush1.bf16.msra.mxu0 %v8523_v29  ;;  %5800 = vmatprep.subr.bf16.mxu1 %v8534_v32  ;;  %v8603_v29 = vld [vmem:[#allocation5 + $0x1044] ss:$16 sps:$4 sm:$0xff]   ;;  %v8604_v32 = vld [vmem:[#allocation5 + $0xc48] ss:$16 sps:$4 sm:$0xff]  }
 0x218   :  { %5327 = vmatprep.subr.bf16.mxu0 %v8531_v31  ;;  %v8601_v31 = vld [vmem:[#allocation5 + $0x1040] ss:$16 sps:$4 sm:$0xff]  }
 0x21a   :  { %5801 = vmatpush1.bf16.msra.mxu1 %v8532_v12  ;;  %v8607_v12 = vld [vmem:[#allocation5 + $0x1060] ss:$16 sps:$4 sm:$0xff]  }
 0x21b   :  { %5328 = vmatpush1.bf16.msra.mxu0 %v8529_v35  ;;  %5802 = vmatprep.subr.bf16.mxu1 %v8540_v37  ;;  %v8609_v35 = vld [vmem:[#allocation5 + $0x1064] ss:$16 sps:$4 sm:$0xff]  }
 0x21c   :  { %5329 = vmatprep.subr.bf16.mxu0 %v8537_v36  ;;  %v8610_v36 = vld [vmem:[#allocation5 + $0xc68] ss:$16 sps:$4 sm:$0xff]   ;;  %v8615_v37 = vld [vmem:[#allocation5 + $0x1084] ss:$16 sps:$4 sm:$0xff]  }
 0x21e   :  { %5803 = vmatpush1.bf16.msra.mxu1 %v8538_v40  ;;  %v8613_v40 = vld [vmem:[#allocation5 + $0x1080] ss:$16 sps:$4 sm:$0xff]  }
 0x21f   :  { %5330 = vmatpush1.bf16.msra.mxu0 %v8535_v39  ;;  %5804 = vmatprep.subr.bf16.mxu1 %v8546_v55  ;;  %v8618_v39 = vld [vmem:[#allocation5 + $0xc8c] ss:$16 sps:$4 sm:$0xff]  }
 0x220   :  { %5331 = vmatprep.subr.bf16.mxu0 %v8543_v41  ;;  %v8621_v41 = vld [vmem:[#allocation5 + $0x10a4] ss:$16 sps:$4 sm:$0xff]   ;;  %v8624_v55 = vld [vmem:[#allocation5 + $0xcac] ss:$16 sps:$4 sm:$0xff]  }
 0x222   :  { %5805 = vmatpush1.bf16.msra.mxu1 %v8544_v45  ;;  %v8622_v45 = vld [vmem:[#allocation5 + $0xca8] ss:$16 sps:$4 sm:$0xff]  }
 0x223   :  { %5332 = vmatpush1.bf16.msra.mxu0 %v8541_v43  ;;  %5806 = vmatprep.subr.bf16.mxu1 %v8552_v46  ;;  %v8619_v43 = vld [vmem:[#allocation5 + $0x10a0] ss:$16 sps:$4 sm:$0xff]   ;;  %v8630_v46 = vld [vmem:[#allocation5 + $0xccc] ss:$16 sps:$4 sm:$0xff]  }
 0x224   :  { %5333 = vmatprep.subr.bf16.mxu0 %v8549_v15  ;;  %v8627_v15 = vld [vmem:[#allocation5 + $0x10c4] ss:$16 sps:$4 sm:$0xff]  }
 0x226   :  { %5807 = vmatpush1.bf16.msra.mxu1 %v8550_v49  ;;  %v8628_v49 = vld [vmem:[#allocation5 + $0xcc8] ss:$16 sps:$4 sm:$0xff]  }
 0x227   :  { %5334 = vmatpush1.bf16.msra.mxu0 %v8547_v48  ;;  %5808 = vmatprep.subr.bf16.mxu1 %v8558_v44  ;;  %v8625_v48 = vld [vmem:[#allocation5 + $0x10c0] ss:$16 sps:$4 sm:$0xff]   ;;  %v8636_v44 = vld [vmem:[#allocation5 + $0xcec] ss:$16 sps:$4 sm:$0xff]  }
 0x228   :  { %5335 = vmatprep.subr.bf16.mxu0 %v8555_v50  ;;  %v8633_v50 = vld [vmem:[#allocation5 + $0x10e4] ss:$16 sps:$4 sm:$0xff]  }
 0x22a   :  { %5809 = vmatpush1.bf16.msra.mxu1 %v8556_v52  ;;  %v8634_v52 = vld [vmem:[#allocation5 + $0xce8] ss:$16 sps:$4 sm:$0xff]  }
 0x22b   :  { %5336 = vmatpush1.bf16.msra.mxu0 %v8553_v51  ;;  %5810 = vmatprep.subr.bf16.mxu1 %v8564_v24  ;;  %v8631_v51 = vld [vmem:[#allocation5 + $0x10e0] ss:$16 sps:$4 sm:$0xff]   ;;  %v8642_v24 = vld [vmem:[#allocation5 + $0xd0c] ss:$16 sps:$4 sm:$0xff]  }
 0x22c   :  { %5337 = vmatprep.subr.bf16.mxu0 %v8561_v53  ;;  %v8639_v53 = vld [vmem:[#allocation5 + $0x1104] ss:$16 sps:$4 sm:$0xff]  }
 0x22e   :  { %5811 = vmatpush1.bf16.msra.mxu1 %v8562_v57  ;;  %v8640_v57 = vld [vmem:[#allocation5 + $0xd08] ss:$16 sps:$4 sm:$0xff]  }
 0x22f   :  { %5338 = vmatpush1.bf16.msra.mxu0 %v8559_v56  ;;  %5812 = vmatprep.subr.bf16.mxu1 %v8570_v59  ;;  %v8637_v56 = vld [vmem:[#allocation5 + $0x1100] ss:$16 sps:$4 sm:$0xff]   ;;  %v8648_v59 = vld [vmem:[#allocation5 + $0xd2c] ss:$16 sps:$4 sm:$0xff]  }
 0x230   :  { %5339 = vmatprep.subr.bf16.mxu0 %v8567_v58  ;;  %v8645_v58 = vld [vmem:[#allocation5 + $0x1124] ss:$16 sps:$4 sm:$0xff]  }
 0x232   :  { %5813 = vmatpush1.bf16.msra.mxu1 %v8568_v61  ;;  %v8646_v61 = vld [vmem:[#allocation5 + $0xd28] ss:$16 sps:$4 sm:$0xff]  }
 0x233   :  { %5340 = vmatpush1.bf16.msra.mxu0 %v8565_v60  ;;  %5814 = vmatprep.subr.bf16.mxu1 %v8576_v63  ;;  %v8643_v60 = vld [vmem:[#allocation5 + $0x1120] ss:$16 sps:$4 sm:$0xff]   ;;  %v8654_v63 = vld [vmem:[#allocation5 + $0xd4c] ss:$16 sps:$4 sm:$0xff]  }
 0x234   :  { %5341 = vmatprep.subr.bf16.mxu0 %v8573_v62  ;;  %v8651_v62 = vld [vmem:[#allocation5 + $0x1144] ss:$16 sps:$4 sm:$0xff]  }
 0x236   :  { %5815 = vmatpush1.bf16.msra.mxu1 %v8574_v1  ;;  %v8652_v1 = vld [vmem:[#allocation5 + $0xd48] ss:$16 sps:$4 sm:$0xff]  }
 0x237   :  { %5342 = vmatpush1.bf16.msra.mxu0 %v8571_v0  ;;  %5816 = vmatprep.subr.bf16.mxu1 %v8582_v34  ;;  %v8649_v0 = vld [vmem:[#allocation5 + $0x1140] ss:$16 sps:$4 sm:$0xff]   ;;  %v8660_v34 = vld [vmem:[#allocation5 + $0xd6c] ss:$16 sps:$4 sm:$0xff]  }
 0x238   :  { %5343 = vmatprep.subr.bf16.mxu0 %v8579_v4  ;;  %v8657_v4 = vld [vmem:[#allocation5 + $0x1164] ss:$16 sps:$4 sm:$0xff]  }
 0x23a   :  { %5817 = vmatpush1.bf16.msra.mxu1 %v8580_v9  ;;  %v8658_v9 = vld [vmem:[#allocation5 + $0xd68] ss:$16 sps:$4 sm:$0xff]  }
 0x23b   :  { %5344 = vmatpush1.bf16.msra.mxu0 %v8577_v8  ;;  %5818 = vmatprep.subr.bf16.mxu1 %v8588_v11  ;;  %v8655_v8 = vld [vmem:[#allocation5 + $0x1160] ss:$16 sps:$4 sm:$0xff]   ;;  %v8666_v11 = vld [vmem:[#allocation5 + $0xd8c] ss:$16 sps:$4 sm:$0xff]  }
 0x23c   :  { %5345 = vmatprep.subr.bf16.mxu0 %v8585_v10  ;;  %v8663_v10 = vld [vmem:[#allocation5 + $0x1184] ss:$16 sps:$4 sm:$0xff]  }
 0x23e   :  { %5819 = vmatpush1.bf16.msra.mxu1 %v8586_v14  ;;  %v8664_v14 = vld [vmem:[#allocation5 + $0xd88] ss:$16 sps:$4 sm:$0xff]  }
 0x23f   :  { %5346 = vmatpush1.bf16.msra.mxu0 %v8583_v13  ;;  %5831 = vmatprep.subr.bf16.mxu1 %v8594_v17  ;;  %v8661_v13 = vld [vmem:[#allocation5 + $0x1180] ss:$16 sps:$4 sm:$0xff]   ;;  %v8672_v17 = vld [vmem:[#allocation5 + $0xdac] ss:$16 sps:$4 sm:$0xff]  }
 0x240   :  { %5358 = vmatprep.subr.bf16.mxu0 %v8591_v16  ;;  %v8669_v16 = vld [vmem:[#allocation5 + $0x11a4] ss:$16 sps:$4 sm:$0xff]  }
 0x241   :  { %5821 = vmatmul.mubr.bf16.vlgmr.msra.gmra.mrb[4].mxu1 %v9615_v54  ;;  %v8612_v54 = vld [vmem:[#allocation5 + $0xc6c] ss:$16 sps:$4 sm:$0xff]  }
 0x242   :  { %5348 = vmatmul.mubr.bf16.vlgmr.msra.gmra.mrb[0].mxu0 %v9631_v21  ;;  %5832 = vmatpush1.bf16.msra.mxu1 %v8592_v23  ;;  %v8676_v23 = vld [vmem:[#allocation5 + $0xdc8] ss:$16 sps:$4 sm:$0xff]  }
 0x243   :  { %5359 = vmatpush1.bf16.msra.mxu0 %v8589_v22  ;;  %5833 = vmatprep.subr.bf16.mxu1 %v8600_v26  ;;  %v8673_v22 = vld [vmem:[#allocation5 + $0x11c0] ss:$16 sps:$4 sm:$0xff]   ;;  %v8684_v26 = vld [vmem:[#allocation5 + $0xdec] ss:$16 sps:$4 sm:$0xff]  }
 0x244   :  { %5360 = vmatprep.subr.bf16.mxu0 %v8597_v25  ;;  %5390 = vmatprep.mubr.bf16.mxu0 %v9633_v47  ;;  %v8681_v25 = vld [vmem:[#allocation5 + $0x11e4] ss:$16 sps:$4 sm:$0xff]  }
 0x245   :  { %5863 = vmatprep.mubr.bf16.mxu1 %v9617_v33  ;;  %v8616_v33 = vld [vmem:[#allocation5 + $0xc88] ss:$16 sps:$4 sm:$0xff]  }
 0x246   :  { %5834 = vmatpush1.bf16.msra.mxu1 %v8598_v28  ;;  %v8682_v28 = vld [vmem:[#allocation5 + $0xde8] ss:$16 sps:$4 sm:$0xff]  }
 0x247   :  { %5361 = vmatpush1.bf16.msra.mxu0 %v8595_v27  ;;  %5835 = vmatprep.subr.bf16.mxu1 %v8606_v30  ;;  %v8679_v27 = vld [vmem:[#allocation5 + $0x11e0] ss:$16 sps:$4 sm:$0xff]   ;;  %v8690_v30 = vld [vmem:[#allocation5 + $0xe0c] ss:$16 sps:$4 sm:$0xff]  }
 0x248   :  { %5362 = vmatprep.subr.bf16.mxu0 %v8603_v29  ;;  %v8687_v29 = vld [vmem:[#allocation5 + $0x1204] ss:$16 sps:$4 sm:$0xff]  }
 0x24a   :  { %5836 = vmatpush1.bf16.msra.mxu1 %v8604_v32  ;;  %v158_v32 = vld [vmem:[#allocation2 + $0x148] sm:$0xff] }
 0x24b   :  { %5363 = vmatpush1.bf16.msra.mxu0 %v8601_v31  ;;  %5837 = vmatprep.subr.bf16.mxu1 %v8612_v54  ;;  %v133_v31 = vld [vmem:[#allocation2 + $0x80] sm:$0xff] }
 0x24c   :  { %5364 = vmatprep.subr.bf16.mxu0 %v8609_v35  ;;  %v136_v35 = vld [vmem:[#allocation2 + $0x98] sm:$0xff]  ;;  %v161_v54 = vld [vmem:[#allocation2 + $0x160] sm:$0xff] }
 0x24e   :  { %5838 = vmatpush1.bf16.msra.mxu1 %v8610_v36  ;;  %v8685_v36 = vld [vmem:[#allocation5 + $0x1200] ss:$16 sps:$4 sm:$0xff]  }
 0x24f   :  { %5365 = vmatpush1.bf16.msra.mxu0 %v8607_v12  ;;  %5839 = vmatprep.subr.bf16.mxu1 %v8618_v39  ;;  %v9639_v12 = vpack.c.bf16 %v158_v32, %v133_v31  ;;  %v8693_v39 = vld [vmem:[#allocation5 + $0x1224] ss:$16 sps:$4 sm:$0xff]   ;;  %v8763_v31 = vld [vmem:[#allocation5 + $0x13a0] ss:$16 sps:$4 sm:$0xff]   ;;  %v8766_v32 = vld [vmem:[#allocation5 + $0xfa8] ss:$16 sps:$4 sm:$0xff]  }
 0x250   :  { %5366 = vmatprep.subr.bf16.mxu0 %v8615_v37  ;;  %v8688_v37 = vld [vmem:[#allocation5 + $0xe08] ss:$16 sps:$4 sm:$0xff]  }
 0x252   :  { %5840 = vmatpush1.bf16.msra.mxu1 %v8616_v33  ;;  %v9641_v33 = vpack.c.bf16 %v161_v54, %v136_v35  ;;  %v8771_v35 = vld [vmem:[#allocation5 + $0x13c4] ss:$16 sps:$4 sm:$0xff]   ;;  %v8774_v54 = vld [vmem:[#allocation5 + $0xfcc] ss:$16 sps:$4 sm:$0xff]  }
 0x253   :  { %5367 = vmatpush1.bf16.msra.mxu0 %v8613_v40  ;;  %5841 = vmatprep.subr.bf16.mxu1 %v8624_v55  ;;  %v8696_v40 = vld [vmem:[#allocation5 + $0xe2c] ss:$16 sps:$4 sm:$0xff]   ;;  %v8694_v55 = vld [vmem:[#allocation5 + $0xe28] ss:$16 sps:$4 sm:$0xff]  }
 0x254   :  { %5368 = vmatprep.subr.bf16.mxu0 %v8621_v41  ;;  %v8691_v41 = vld [vmem:[#allocation5 + $0x1220] ss:$16 sps:$4 sm:$0xff]  }
 0x256   :  { %5842 = vmatpush1.bf16.msra.mxu1 %v8622_v45  ;;  %v8702_v45 = vld [vmem:[#allocation5 + $0xe4c] ss:$16 sps:$4 sm:$0xff]  }
 0x257   :  { %5369 = vmatpush1.bf16.msra.mxu0 %v8619_v43  ;;  %5843 = vmatprep.subr.bf16.mxu1 %v8630_v46  ;;  %v8699_v43 = vld [vmem:[#allocation5 + $0x1244] ss:$16 sps:$4 sm:$0xff]   ;;  %v8700_v46 = vld [vmem:[#allocation5 + $0xe48] ss:$16 sps:$4 sm:$0xff]  }
 0x258   :  { %5370 = vmatprep.subr.bf16.mxu0 %v8627_v15  ;;  %v8697_v15 = vld [vmem:[#allocation5 + $0x1240] ss:$16 sps:$4 sm:$0xff]  }
 0x25a   :  { %5844 = vmatpush1.bf16.msra.mxu1 %v8628_v49  ;;  %v8703_v49 = vld [vmem:[#allocation5 + $0x1260] ss:$16 sps:$4 sm:$0xff]  }
 0x25b   :  { %5371 = vmatpush1.bf16.msra.mxu0 %v8625_v48  ;;  %5845 = vmatprep.subr.bf16.mxu1 %v8636_v44  ;;  %v8705_v48 = vld [vmem:[#allocation5 + $0x1264] ss:$16 sps:$4 sm:$0xff]  }
 0x25c   :  { %5372 = vmatprep.subr.bf16.mxu0 %v8633_v50  ;;  %v8706_v50 = vld [vmem:[#allocation5 + $0xe68] ss:$16 sps:$4 sm:$0xff]   ;;  %v8711_v44 = vld [vmem:[#allocation5 + $0x1284] ss:$16 sps:$4 sm:$0xff]  }
 0x25e   :  { %5846 = vmatpush1.bf16.msra.mxu1 %v8634_v52  ;;  %v8709_v52 = vld [vmem:[#allocation5 + $0x1280] ss:$16 sps:$4 sm:$0xff]  }
 0x25f   :  { %5373 = vmatpush1.bf16.msra.mxu0 %v8631_v51  ;;  %5847 = vmatprep.subr.bf16.mxu1 %v8642_v24  ;;  %v8714_v51 = vld [vmem:[#allocation5 + $0xe8c] ss:$16 sps:$4 sm:$0xff]  }
 0x260   :  { %5374 = vmatprep.subr.bf16.mxu0 %v8639_v53  ;;  %v8717_v53 = vld [vmem:[#allocation5 + $0x12a4] ss:$16 sps:$4 sm:$0xff]   ;;  %v8720_v24 = vld [vmem:[#allocation5 + $0xeac] ss:$16 sps:$4 sm:$0xff]  }
 0x262   :  { %5848 = vmatpush1.bf16.msra.mxu1 %v8640_v57  ;;  %v8718_v57 = vld [vmem:[#allocation5 + $0xea8] ss:$16 sps:$4 sm:$0xff]  }
 0x263   :  { %5375 = vmatpush1.bf16.msra.mxu0 %v8637_v56  ;;  %5849 = vmatprep.subr.bf16.mxu1 %v8648_v59  ;;  %v8715_v56 = vld [vmem:[#allocation5 + $0x12a0] ss:$16 sps:$4 sm:$0xff]   ;;  %v8726_v59 = vld [vmem:[#allocation5 + $0xecc] ss:$16 sps:$4 sm:$0xff]  }
 0x264   :  { %5376 = vmatprep.subr.bf16.mxu0 %v8645_v58  ;;  %v8723_v58 = vld [vmem:[#allocation5 + $0x12c4] ss:$16 sps:$4 sm:$0xff]  }
 0x266   :  { %5850 = vmatpush1.bf16.msra.mxu1 %v8646_v61  ;;  %v8724_v61 = vld [vmem:[#allocation5 + $0xec8] ss:$16 sps:$4 sm:$0xff]  }
 0x267   :  { %5377 = vmatpush1.bf16.msra.mxu0 %v8643_v60  ;;  %5851 = vmatprep.subr.bf16.mxu1 %v8654_v63  ;;  %v8721_v60 = vld [vmem:[#allocation5 + $0x12c0] ss:$16 sps:$4 sm:$0xff]   ;;  %v8732_v63 = vld [vmem:[#allocation5 + $0xeec] ss:$16 sps:$4 sm:$0xff]  }
 0x268   :  { %5378 = vmatprep.subr.bf16.mxu0 %v8651_v62  ;;  %v8729_v62 = vld [vmem:[#allocation5 + $0x12e4] ss:$16 sps:$4 sm:$0xff]  }
 0x26a   :  { %5852 = vmatpush1.bf16.msra.mxu1 %v8652_v1  ;;  %v8730_v1 = vld [vmem:[#allocation5 + $0xee8] ss:$16 sps:$4 sm:$0xff]  }
 0x26b   :  { %5379 = vmatpush1.bf16.msra.mxu0 %v8649_v0  ;;  %5853 = vmatprep.subr.bf16.mxu1 %v8660_v34  ;;  %v8727_v0 = vld [vmem:[#allocation5 + $0x12e0] ss:$16 sps:$4 sm:$0xff]   ;;  %v8738_v34 = vld [vmem:[#allocation5 + $0xf0c] ss:$16 sps:$4 sm:$0xff]  }
 0x26c   :  { %5380 = vmatprep.subr.bf16.mxu0 %v8657_v4  ;;  %v8735_v4 = vld [vmem:[#allocation5 + $0x1304] ss:$16 sps:$4 sm:$0xff]  }
 0x26e   :  { %5854 = vmatpush1.bf16.msra.mxu1 %v8658_v9  ;;  %v8736_v9 = vld [vmem:[#allocation5 + $0xf08] ss:$16 sps:$4 sm:$0xff]  }
 0x26f   :  { %5381 = vmatpush1.bf16.msra.mxu0 %v8655_v8  ;;  %5855 = vmatprep.subr.bf16.mxu1 %v8666_v11  ;;  %v8733_v8 = vld [vmem:[#allocation5 + $0x1300] ss:$16 sps:$4 sm:$0xff]   ;;  %v8744_v11 = vld [vmem:[#allocation5 + $0xf2c] ss:$16 sps:$4 sm:$0xff]  }
 0x270   :  { %5382 = vmatprep.subr.bf16.mxu0 %v8663_v10  ;;  %v8741_v10 = vld [vmem:[#allocation5 + $0x1324] ss:$16 sps:$4 sm:$0xff]  }
 0x272   :  { %5856 = vmatpush1.bf16.msra.mxu1 %v8664_v14  ;;  %v8742_v14 = vld [vmem:[#allocation5 + $0xf28] ss:$16 sps:$4 sm:$0xff]  }
 0x273   :  { %5383 = vmatpush1.bf16.msra.mxu0 %v8661_v13  ;;  %5857 = vmatprep.subr.bf16.mxu1 %v8672_v17  ;;  %v8739_v13 = vld [vmem:[#allocation5 + $0x1320] ss:$16 sps:$4 sm:$0xff]   ;;  %v8750_v17 = vld [vmem:[#allocation5 + $0xf4c] ss:$16 sps:$4 sm:$0xff]  }
 0x274   :  { %5384 = vmatprep.subr.bf16.mxu0 %v8669_v16  ;;  %v8747_v16 = vld [vmem:[#allocation5 + $0x1344] ss:$16 sps:$4 sm:$0xff]  }
 0x276   :  { %5858 = vmatpush1.bf16.msra.mxu1 %v8670_v19  ;;  %v8748_v19 = vld [vmem:[#allocation5 + $0xf48] ss:$16 sps:$4 sm:$0xff]  }
 0x277   :  { %5385 = vmatpush1.bf16.msra.mxu0 %v8667_v18  ;;  %5859 = vmatprep.subr.bf16.mxu1 %v8678_v42  ;;  %v8745_v18 = vld [vmem:[#allocation5 + $0x1340] ss:$16 sps:$4 sm:$0xff]   ;;  %v8756_v42 = vld [vmem:[#allocation5 + $0xf6c] ss:$16 sps:$4 sm:$0xff]  }
 0x278   :  { %5386 = vmatprep.subr.bf16.mxu0 %v8675_v20  ;;  %v8753_v20 = vld [vmem:[#allocation5 + $0x1364] ss:$16 sps:$4 sm:$0xff]  }
 0x27a   :  { %5860 = vmatpush1.bf16.msra.mxu1 %v8676_v23  ;;  %v8754_v23 = vld [vmem:[#allocation5 + $0xf68] ss:$16 sps:$4 sm:$0xff]  }
 0x27b   :  { %5387 = vmatpush1.bf16.msra.mxu0 %v8673_v22  ;;  %5861 = vmatprep.subr.bf16.mxu1 %v8684_v26  ;;  %v8751_v22 = vld [vmem:[#allocation5 + $0x1360] ss:$16 sps:$4 sm:$0xff]   ;;  %v8762_v26 = vld [vmem:[#allocation5 + $0xf8c] ss:$16 sps:$4 sm:$0xff]  }
 0x27c   :  { %5388 = vmatprep.subr.bf16.mxu0 %v8681_v25  ;;  %v8759_v25 = vld [vmem:[#allocation5 + $0x1384] ss:$16 sps:$4 sm:$0xff]  }
 0x27e   :  { %5862 = vmatpush1.bf16.msra.mxu1 %v8682_v28  ;;  %v8760_v28 = vld [vmem:[#allocation5 + $0xf88] ss:$16 sps:$4 sm:$0xff]  }
 0x27f   :  { %5389 = vmatpush1.bf16.msra.mxu0 %v8679_v27  ;;  %5874 = vmatprep.subr.bf16.mxu1 %v8690_v30  ;;  %v8757_v27 = vld [vmem:[#allocation5 + $0x1380] ss:$16 sps:$4 sm:$0xff]   ;;  %v8768_v30 = vld [vmem:[#allocation5 + $0xfac] ss:$16 sps:$4 sm:$0xff]  }
 0x280   :  { %5401 = vmatprep.subr.bf16.mxu0 %v8687_v29  ;;  %v8765_v29 = vld [vmem:[#allocation5 + $0x13a4] ss:$16 sps:$4 sm:$0xff]  }
 0x281   :  { %5864 = vmatmul.mubr.bf16.vlgmr.msra.gmra.mrb[4].mxu1 %v9623_v6  ;;  %v8708_v6 = vld [vmem:[#allocation5 + $0xe6c] ss:$16 sps:$4 sm:$0xff]  }
 0x282   :  { %5391 = vmatmul.mubr.bf16.vlgmr.msra.gmra.mrb[0].mxu0 %v9639_v12  ;;  %5875 = vmatpush1.bf16.msra.mxu1 %v8688_v37  ;;  %v8772_v37 = vld [vmem:[#allocation5 + $0xfc8] ss:$16 sps:$4 sm:$0xff]  }
 0x283   :  { %5402 = vmatpush1.bf16.msra.mxu0 %v8685_v36  ;;  %5876 = vmatprep.subr.bf16.mxu1 %v8696_v40  ;;  %v8769_v36 = vld [vmem:[#allocation5 + $0x13c0] ss:$16 sps:$4 sm:$0xff]   ;;  %v8780_v40 = vld [vmem:[#allocation5 + $0xfec] ss:$16 sps:$4 sm:$0xff]  }
 0x284   :  { %5403 = vmatprep.subr.bf16.mxu0 %v8693_v39  ;;  %5433 = vmatprep.mubr.bf16.mxu0 %v9641_v33  ;;  %v8777_v39 = vld [vmem:[#allocation5 + $0x13e4] ss:$16 sps:$4 sm:$0xff]  }
 0x285   :  { %5906 = vmatprep.mubr.bf16.mxu1 %v9625_v38  ;;  %v8712_v38 = vld [vmem:[#allocation5 + $0xe88] ss:$16 sps:$4 sm:$0xff]  }
 0x286   :  { %5877 = vmatpush1.bf16.msra.mxu1 %v8694_v55  ;;  %v8778_v55 = vld [vmem:[#allocation5 + $0xfe8] ss:$16 sps:$4 sm:$0xff]  }
 0x287   :  { %5404 = vmatpush1.bf16.msra.mxu0 %v8691_v41  ;;  %5878 = vmatprep.subr.bf16.mxu1 %v8702_v45  ;;  %v8775_v41 = vld [vmem:[#allocation5 + $0x13e0] ss:$16 sps:$4 sm:$0xff]   ;;  %v160_v45 = vld [vmem:[#allocation2 + $0x158] sm:$0xff] }
 0x288   :  { %5405 = vmatprep.subr.bf16.mxu0 %v8699_v43  ;;  %v135_v43 = vld [vmem:[#allocation2 + $0x90] sm:$0xff] }
 0x28a   :  { %5879 = vmatpush1.bf16.msra.mxu1 %v8700_v46  ;;  %v8786_v46 = vld [vmem:[#allocation5 + $0x100c] ss:$16 sps:$4 sm:$0xff]  }
 0x28b   :  { %5406 = vmatpush1.bf16.msra.mxu0 %v8697_v15  ;;  %5880 = vmatprep.subr.bf16.mxu1 %v8708_v6  ;;  %v8783_v15 = vld [vmem:[#allocation5 + $0x1404] ss:$16 sps:$4 sm:$0xff]   ;;  %v138_v6 = vld [vmem:[#allocation2 + $0xa8] sm:$0xff] }
 0x28c   :  { %5407 = vmatprep.subr.bf16.mxu0 %v8705_v48  ;;  %v9647_v48 = vpack.c.bf16 %v160_v45, %v135_v43  ;;  %v8861_v43 = vld [vmem:[#allocation5 + $0x15a4] ss:$16 sps:$4 sm:$0xff]   ;;  %v8864_v45 = vld [vmem:[#allocation5 + $0x11ac] ss:$16 sps:$4 sm:$0xff]  }
 0x28e   :  { %5881 = vmatpush1.bf16.msra.mxu1 %v8706_v50  ;;  %v8781_v50 = vld [vmem:[#allocation5 + $0x1400] ss:$16 sps:$4 sm:$0xff]  }
 0x28f   :  { %5408 = vmatpush1.bf16.msra.mxu0 %v8703_v49  ;;  %5882 = vmatprep.subr.bf16.mxu1 %v8714_v51  ;;  %v163_v49 = vld [vmem:[#allocation2 + $0x170] sm:$0xff] }
 0x290   :  { %5409 = vmatprep.subr.bf16.mxu0 %v8711_v44  ;;  %v8784_v44 = vld [vmem:[#allocation5 + $0x1008] ss:$16 sps:$4 sm:$0xff]   ;;  %v8789_v51 = vld [vmem:[#allocation5 + $0x1424] ss:$16 sps:$4 sm:$0xff]  }
 0x292   :  { %5883 = vmatpush1.bf16.msra.mxu1 %v8712_v38  ;;  %v9649_v38 = vpack.c.bf16 %v163_v49, %v138_v6  ;;  %v8867_v6 = vld [vmem:[#allocation5 + $0x15c4] ss:$16 sps:$4 sm:$0xff]   ;;  %v8870_v49 = vld [vmem:[#allocation5 + $0x11cc] ss:$16 sps:$4 sm:$0xff]  }
 0x293   :  { %5410 = vmatpush1.bf16.msra.mxu0 %v8709_v52  ;;  %5884 = vmatprep.subr.bf16.mxu1 %v8720_v24  ;;  %v8792_v52 = vld [vmem:[#allocation5 + $0x102c] ss:$16 sps:$4 sm:$0xff]   ;;  %v8790_v24 = vld [vmem:[#allocation5 + $0x1028] ss:$16 sps:$4 sm:$0xff]  }
 0x294   :  { %5411 = vmatprep.subr.bf16.mxu0 %v8717_v53  ;;  %v8787_v53 = vld [vmem:[#allocation5 + $0x1420] ss:$16 sps:$4 sm:$0xff]  }
 0x296   :  { %5885 = vmatpush1.bf16.msra.mxu1 %v8718_v57  ;;  %v8798_v57 = vld [vmem:[#allocation5 + $0x104c] ss:$16 sps:$4 sm:$0xff]  }
 0x297   :  { %5412 = vmatpush1.bf16.msra.mxu0 %v8715_v56  ;;  %5886 = vmatprep.subr.bf16.mxu1 %v8726_v59  ;;  %v8795_v56 = vld [vmem:[#allocation5 + $0x1444] ss:$16 sps:$4 sm:$0xff]   ;;  %v8796_v59 = vld [vmem:[#allocation5 + $0x1048] ss:$16 sps:$4 sm:$0xff]  }
 0x298   :  { %5413 = vmatprep.subr.bf16.mxu0 %v8723_v58  ;;  %v8793_v58 = vld [vmem:[#allocation5 + $0x1440] ss:$16 sps:$4 sm:$0xff]  }
 0x29a   :  { %5887 = vmatpush1.bf16.msra.mxu1 %v8724_v61  ;;  %v8799_v61 = vld [vmem:[#allocation5 + $0x1460] ss:$16 sps:$4 sm:$0xff]  }
 0x29b   :  { %5414 = vmatpush1.bf16.msra.mxu0 %v8721_v60  ;;  %5888 = vmatprep.subr.bf16.mxu1 %v8732_v63  ;;  %v8801_v60 = vld [vmem:[#allocation5 + $0x1464] ss:$16 sps:$4 sm:$0xff]  }
 0x29c   :  { %5415 = vmatprep.subr.bf16.mxu0 %v8729_v62  ;;  %v8802_v62 = vld [vmem:[#allocation5 + $0x1068] ss:$16 sps:$4 sm:$0xff]   ;;  %v8807_v63 = vld [vmem:[#allocation5 + $0x1484] ss:$16 sps:$4 sm:$0xff]  }
 0x29e   :  { %5889 = vmatpush1.bf16.msra.mxu1 %v8730_v1  ;;  %v8805_v1 = vld [vmem:[#allocation5 + $0x1480] ss:$16 sps:$4 sm:$0xff]  }
 0x29f   :  { %5416 = vmatpush1.bf16.msra.mxu0 %v8727_v0  ;;  %5890 = vmatprep.subr.bf16.mxu1 %v8738_v34  ;;  %v8810_v0 = vld [vmem:[#allocation5 + $0x108c] ss:$16 sps:$4 sm:$0xff]  }
 0x2a0   :  { %5417 = vmatprep.subr.bf16.mxu0 %v8735_v4  ;;  %v8813_v4 = vld [vmem:[#allocation5 + $0x14a4] ss:$16 sps:$4 sm:$0xff]   ;;  %v8816_v34 = vld [vmem:[#allocation5 + $0x10ac] ss:$16 sps:$4 sm:$0xff]  }
 0x2a2   :  { %5891 = vmatpush1.bf16.msra.mxu1 %v8736_v9  ;;  %v8814_v9 = vld [vmem:[#allocation5 + $0x10a8] ss:$16 sps:$4 sm:$0xff]  }
 0x2a3   :  { %5418 = vmatpush1.bf16.msra.mxu0 %v8733_v8  ;;  %5892 = vmatprep.subr.bf16.mxu1 %v8744_v11  ;;  %v8811_v8 = vld [vmem:[#allocation5 + $0x14a0] ss:$16 sps:$4 sm:$0xff]   ;;  %v8822_v11 = vld [vmem:[#allocation5 + $0x10cc] ss:$16 sps:$4 sm:$0xff]  }
 0x2a4   :  { %5419 = vmatprep.subr.bf16.mxu0 %v8741_v10  ;;  %v8819_v10 = vld [vmem:[#allocation5 + $0x14c4] ss:$16 sps:$4 sm:$0xff]  }
 0x2a6   :  { %5893 = vmatpush1.bf16.msra.mxu1 %v8742_v14  ;;  %v8820_v14 = vld [vmem:[#allocation5 + $0x10c8] ss:$16 sps:$4 sm:$0xff]  }
 0x2a7   :  { %5420 = vmatpush1.bf16.msra.mxu0 %v8739_v13  ;;  %5894 = vmatprep.subr.bf16.mxu1 %v8750_v17  ;;  %v8817_v13 = vld [vmem:[#allocation5 + $0x14c0] ss:$16 sps:$4 sm:$0xff]   ;;  %v8828_v17 = vld [vmem:[#allocation5 + $0x10ec] ss:$16 sps:$4 sm:$0xff]  }
 0x2a8   :  { %5421 = vmatprep.subr.bf16.mxu0 %v8747_v16  ;;  %v8825_v16 = vld [vmem:[#allocation5 + $0x14e4] ss:$16 sps:$4 sm:$0xff]  }
 0x2aa   :  { %5895 = vmatpush1.bf16.msra.mxu1 %v8748_v19  ;;  %v8826_v19 = vld [vmem:[#allocation5 + $0x10e8] ss:$16 sps:$4 sm:$0xff]  }
 0x2ab   :  { %5422 = vmatpush1.bf16.msra.mxu0 %v8745_v18  ;;  %5896 = vmatprep.subr.bf16.mxu1 %v8756_v42  ;;  %v8823_v18 = vld [vmem:[#allocation5 + $0x14e0] ss:$16 sps:$4 sm:$0xff]   ;;  %v8834_v42 = vld [vmem:[#allocation5 + $0x110c] ss:$16 sps:$4 sm:$0xff]  }
 0x2ac   :  { %5423 = vmatprep.subr.bf16.mxu0 %v8753_v20  ;;  %v8831_v20 = vld [vmem:[#allocation5 + $0x1504] ss:$16 sps:$4 sm:$0xff]  }
 0x2ae   :  { %5897 = vmatpush1.bf16.msra.mxu1 %v8754_v23  ;;  %v8832_v23 = vld [vmem:[#allocation5 + $0x1108] ss:$16 sps:$4 sm:$0xff]  }
 0x2af   :  { %5424 = vmatpush1.bf16.msra.mxu0 %v8751_v22  ;;  %5898 = vmatprep.subr.bf16.mxu1 %v8762_v26  ;;  %v8829_v22 = vld [vmem:[#allocation5 + $0x1500] ss:$16 sps:$4 sm:$0xff]   ;;  %v8840_v26 = vld [vmem:[#allocation5 + $0x112c] ss:$16 sps:$4 sm:$0xff]  }
 0x2b0   :  { %5425 = vmatprep.subr.bf16.mxu0 %v8759_v25  ;;  %v8837_v25 = vld [vmem:[#allocation5 + $0x1524] ss:$16 sps:$4 sm:$0xff]  }
 0x2b2   :  { %5899 = vmatpush1.bf16.msra.mxu1 %v8760_v28  ;;  %v8838_v28 = vld [vmem:[#allocation5 + $0x1128] ss:$16 sps:$4 sm:$0xff]  }
 0x2b3   :  { %5426 = vmatpush1.bf16.msra.mxu0 %v8757_v27  ;;  %5900 = vmatprep.subr.bf16.mxu1 %v8768_v30  ;;  %v8835_v27 = vld [vmem:[#allocation5 + $0x1520] ss:$16 sps:$4 sm:$0xff]   ;;  %v8846_v30 = vld [vmem:[#allocation5 + $0x114c] ss:$16 sps:$4 sm:$0xff]  }
 0x2b4   :  { %5427 = vmatprep.subr.bf16.mxu0 %v8765_v29  ;;  %v8843_v29 = vld [vmem:[#allocation5 + $0x1544] ss:$16 sps:$4 sm:$0xff]  }
 0x2b6   :  { %5901 = vmatpush1.bf16.msra.mxu1 %v8766_v32  ;;  %v8844_v32 = vld [vmem:[#allocation5 + $0x1148] ss:$16 sps:$4 sm:$0xff]  }
 0x2b7   :  { %5428 = vmatpush1.bf16.msra.mxu0 %v8763_v31  ;;  %5902 = vmatprep.subr.bf16.mxu1 %v8774_v54  ;;  %v8841_v31 = vld [vmem:[#allocation5 + $0x1540] ss:$16 sps:$4 sm:$0xff]   ;;  %v8852_v54 = vld [vmem:[#allocation5 + $0x116c] ss:$16 sps:$4 sm:$0xff]  }
 0x2b8   :  { %5429 = vmatprep.subr.bf16.mxu0 %v8771_v35  ;;  %v8849_v35 = vld [vmem:[#allocation5 + $0x1564] ss:$16 sps:$4 sm:$0xff]  }
 0x2ba   :  { %5903 = vmatpush1.bf16.msra.mxu1 %v8772_v37  ;;  %v8850_v37 = vld [vmem:[#allocation5 + $0x1168] ss:$16 sps:$4 sm:$0xff]  }
 0x2bb   :  { %5430 = vmatpush1.bf16.msra.mxu0 %v8769_v36  ;;  %5904 = vmatprep.subr.bf16.mxu1 %v8780_v40  ;;  %v8847_v36 = vld [vmem:[#allocation5 + $0x1560] ss:$16 sps:$4 sm:$0xff]   ;;  %v8858_v40 = vld [vmem:[#allocation5 + $0x118c] ss:$16 sps:$4 sm:$0xff]  }
 0x2bc   :  { %5431 = vmatprep.subr.bf16.mxu0 %v8777_v39  ;;  %v8855_v39 = vld [vmem:[#allocation5 + $0x1584] ss:$16 sps:$4 sm:$0xff]  }
 0x2be   :  { %5905 = vmatpush1.bf16.msra.mxu1 %v8778_v55  ;;  %v8856_v55 = vld [vmem:[#allocation5 + $0x1188] ss:$16 sps:$4 sm:$0xff]  }
 0x2bf   :  { %5432 = vmatpush1.bf16.msra.mxu0 %v8775_v41  ;;  %5917 = vmatprep.subr.bf16.mxu1 %v8786_v46  ;;  %v8853_v41 = vld [vmem:[#allocation5 + $0x1580] ss:$16 sps:$4 sm:$0xff]   ;;  %v8862_v46 = vld [vmem:[#allocation5 + $0x11a8] ss:$16 sps:$4 sm:$0xff]  }
 0x2c0   :  { %5444 = vmatprep.subr.bf16.mxu0 %v8783_v15  ;;  %v8859_v15 = vld [vmem:[#allocation5 + $0x15a0] ss:$16 sps:$4 sm:$0xff]  }
 0x2c1   :  { %5907 = vmatmul.mubr.bf16.vlgmr.msra.gmra.mrb[4].mxu1 %v9631_v21  ;;  %v8804_v21 = vld [vmem:[#allocation5 + $0x106c] ss:$16 sps:$4 sm:$0xff]  }
 0x2c2   :  { %5434 = vmatmul.mubr.bf16.vlgmr.msra.gmra.mrb[0].mxu0 %v9647_v48  ;;  %5918 = vmatpush1.bf16.msra.mxu1 %v8784_v44  ;;  %v8868_v44 = vld [vmem:[#allocation5 + $0x11c8] ss:$16 sps:$4 sm:$0xff]  }
 0x2c3   :  { %5445 = vmatpush1.bf16.msra.mxu0 %v8781_v50  ;;  %5919 = vmatprep.subr.bf16.mxu1 %v8792_v52  ;;  %v8865_v50 = vld [vmem:[#allocation5 + $0x15c0] ss:$16 sps:$4 sm:$0xff]   ;;  %v8876_v52 = vld [vmem:[#allocation5 + $0x11ec] ss:$16 sps:$4 sm:$0xff]  }
 0x2c4   :  { %5446 = vmatprep.subr.bf16.mxu0 %v8789_v51  ;;  %5476 = vmatprep.mubr.bf16.mxu0 %v9649_v38  ;;  %v8873_v51 = vld [vmem:[#allocation5 + $0x15e4] ss:$16 sps:$4 sm:$0xff]  }
 0x2c5   :  { %5949 = vmatprep.mubr.bf16.mxu1 %v9633_v47  ;;  %v8808_v47 = vld [vmem:[#allocation5 + $0x1088] ss:$16 sps:$4 sm:$0xff]  }
 0x2c6   :  { %5920 = vmatpush1.bf16.msra.mxu1 %v8790_v24  ;;  %v8874_v24 = vld [vmem:[#allocation5 + $0x11e8] ss:$16 sps:$4 sm:$0xff]  }
 0x2c7   :  { %5447 = vmatpush1.bf16.msra.mxu0 %v8787_v53  ;;  %5921 = vmatprep.subr.bf16.mxu1 %v8798_v57  ;;  %v8871_v53 = vld [vmem:[#allocation5 + $0x15e0] ss:$16 sps:$4 sm:$0xff]   ;;  %v162_v57 = vld [vmem:[#allocation2 + $0x168] sm:$0xff] }
 0x2c8   :  { %5448 = vmatprep.subr.bf16.mxu0 %v8795_v56  ;;  %v137_v56 = vld [vmem:[#allocation2 + $0xa0] sm:$0xff] }
 0x2ca   :  { %5922 = vmatpush1.bf16.msra.mxu1 %v8796_v59  ;;  %v8882_v59 = vld [vmem:[#allocation5 + $0x120c] ss:$16 sps:$4 sm:$0xff]  }
 0x2cb   :  { %5449 = vmatpush1.bf16.msra.mxu0 %v8793_v58  ;;  %5923 = vmatprep.subr.bf16.mxu1 %v8804_v21  ;;  %v8879_v58 = vld [vmem:[#allocation5 + $0x1604] ss:$16 sps:$4 sm:$0xff]   ;;  %v140_v21 = vld [vmem:[#allocation2 + $0xb8] sm:$0xff] }
 0x2cc   :  { %5450 = vmatprep.subr.bf16.mxu0 %v8801_v60  ;;  %v9655_v60 = vpack.c.bf16 %v162_v57, %v137_v56  ;;  %v8957_v56 = vld [vmem:[#allocation5 + $0x17a4] ss:$16 sps:$4 sm:$0xff]   ;;  %v8960_v57 = vld [vmem:[#allocation5 + $0x13ac] ss:$16 sps:$4 sm:$0xff]  }
 0x2ce   :  { %5924 = vmatpush1.bf16.msra.mxu1 %v8802_v62  ;;  %v8877_v62 = vld [vmem:[#allocation5 + $0x1600] ss:$16 sps:$4 sm:$0xff]  }
 0x2cf   :  { %5451 = vmatpush1.bf16.msra.mxu0 %v8799_v61  ;;  %5925 = vmatprep.subr.bf16.mxu1 %v8810_v0  ;;  %v165_v61 = vld [vmem:[#allocation2 + $0x180] sm:$0xff] }
 0x2d0   :  { %5452 = vmatprep.subr.bf16.mxu0 %v8807_v63  ;;  %v8880_v63 = vld [vmem:[#allocation5 + $0x1208] ss:$16 sps:$4 sm:$0xff]   ;;  %v8885_v0 = vld [vmem:[#allocation5 + $0x1624] ss:$16 sps:$4 sm:$0xff]  }
 0x2d2   :  { %5926 = vmatpush1.bf16.msra.mxu1 %v8808_v47  ;;  %v9657_v47 = vpack.c.bf16 %v165_v61, %v140_v21  ;;  %v8963_v21 = vld [vmem:[#allocation5 + $0x17c4] ss:$16 sps:$4 sm:$0xff]   ;;  %v8966_v61 = vld [vmem:[#allocation5 + $0x13cc] ss:$16 sps:$4 sm:$0xff]  }
 0x2d3   :  { %5453 = vmatpush1.bf16.msra.mxu0 %v8805_v1  ;;  %5927 = vmatprep.subr.bf16.mxu1 %v8816_v34  ;;  %v8888_v1 = vld [vmem:[#allocation5 + $0x122c] ss:$16 sps:$4 sm:$0xff]   ;;  %v8886_v34 = vld [vmem:[#allocation5 + $0x1228] ss:$16 sps:$4 sm:$0xff]  }
 0x2d4   :  { %5454 = vmatprep.subr.bf16.mxu0 %v8813_v4  ;;  %v8883_v4 = vld [vmem:[#allocation5 + $0x1620] ss:$16 sps:$4 sm:$0xff]  }
 0x2d6   :  { %5928 = vmatpush1.bf16.msra.mxu1 %v8814_v9  ;;  %v8894_v9 = vld [vmem:[#allocation5 + $0x124c] ss:$16 sps:$4 sm:$0xff]  }
 0x2d7   :  { %5455 = vmatpush1.bf16.msra.mxu0 %v8811_v8  ;;  %5929 = vmatprep.subr.bf16.mxu1 %v8822_v11  ;;  %v8891_v8 = vld [vmem:[#allocation5 + $0x1644] ss:$16 sps:$4 sm:$0xff]   ;;  %v8892_v11 = vld [vmem:[#allocation5 + $0x1248] ss:$16 sps:$4 sm:$0xff]  }
 0x2d8   :  { %5456 = vmatprep.subr.bf16.mxu0 %v8819_v10  ;;  %v8889_v10 = vld [vmem:[#allocation5 + $0x1640] ss:$16 sps:$4 sm:$0xff]  }
 0x2da   :  { %5930 = vmatpush1.bf16.msra.mxu1 %v8820_v14  ;;  %v8895_v14 = vld [vmem:[#allocation5 + $0x1660] ss:$16 sps:$4 sm:$0xff]  }
 0x2db   :  { %5457 = vmatpush1.bf16.msra.mxu0 %v8817_v13  ;;  %5931 = vmatprep.subr.bf16.mxu1 %v8828_v17  ;;  %v8897_v13 = vld [vmem:[#allocation5 + $0x1664] ss:$16 sps:$4 sm:$0xff]  }
 0x2dc   :  { %5458 = vmatprep.subr.bf16.mxu0 %v8825_v16  ;;  %v8898_v16 = vld [vmem:[#allocation5 + $0x1268] ss:$16 sps:$4 sm:$0xff]   ;;  %v8903_v17 = vld [vmem:[#allocation5 + $0x1684] ss:$16 sps:$4 sm:$0xff]  }
 0x2de   :  { %5932 = vmatpush1.bf16.msra.mxu1 %v8826_v19  ;;  %v8901_v19 = vld [vmem:[#allocation5 + $0x1680] ss:$16 sps:$4 sm:$0xff]  }
 0x2df   :  { %5459 = vmatpush1.bf16.msra.mxu0 %v8823_v18  ;;  %5933 = vmatprep.subr.bf16.mxu1 %v8834_v42  ;;  %v8906_v18 = vld [vmem:[#allocation5 + $0x128c] ss:$16 sps:$4 sm:$0xff]  }
 0x2e0   :  { %5460 = vmatprep.subr.bf16.mxu0 %v8831_v20  ;;  %v8909_v20 = vld [vmem:[#allocation5 + $0x16a4] ss:$16 sps:$4 sm:$0xff]   ;;  %v8912_v42 = vld [vmem:[#allocation5 + $0x12ac] ss:$16 sps:$4 sm:$0xff]  }
 0x2e2   :  { %5934 = vmatpush1.bf16.msra.mxu1 %v8832_v23  ;;  %v8910_v23 = vld [vmem:[#allocation5 + $0x12a8] ss:$16 sps:$4 sm:$0xff]  }
 0x2e3   :  { %5461 = vmatpush1.bf16.msra.mxu0 %v8829_v22  ;;  %5935 = vmatprep.subr.bf16.mxu1 %v8840_v26  ;;  %v8907_v22 = vld [vmem:[#allocation5 + $0x16a0] ss:$16 sps:$4 sm:$0xff]   ;;  %v8918_v26 = vld [vmem:[#allocation5 + $0x12cc] ss:$16 sps:$4 sm:$0xff]  }
 0x2e4   :  { %5462 = vmatprep.subr.bf16.mxu0 %v8837_v25  ;;  %v8915_v25 = vld [vmem:[#allocation5 + $0x16c4] ss:$16 sps:$4 sm:$0xff]  }
 0x2e6   :  { %5936 = vmatpush1.bf16.msra.mxu1 %v8838_v28  ;;  %v8916_v28 = vld [vmem:[#allocation5 + $0x12c8] ss:$16 sps:$4 sm:$0xff]  }
 0x2e7   :  { %5463 = vmatpush1.bf16.msra.mxu0 %v8835_v27  ;;  %5937 = vmatprep.subr.bf16.mxu1 %v8846_v30  ;;  %v8913_v27 = vld [vmem:[#allocation5 + $0x16c0] ss:$16 sps:$4 sm:$0xff]   ;;  %v8924_v30 = vld [vmem:[#allocation5 + $0x12ec] ss:$16 sps:$4 sm:$0xff]  }
 0x2e8   :  { %5464 = vmatprep.subr.bf16.mxu0 %v8843_v29  ;;  %v8921_v29 = vld [vmem:[#allocation5 + $0x16e4] ss:$16 sps:$4 sm:$0xff]  }
 0x2ea   :  { %5938 = vmatpush1.bf16.msra.mxu1 %v8844_v32  ;;  %v8922_v32 = vld [vmem:[#allocation5 + $0x12e8] ss:$16 sps:$4 sm:$0xff]  }
 0x2eb   :  { %5465 = vmatpush1.bf16.msra.mxu0 %v8841_v31  ;;  %5939 = vmatprep.subr.bf16.mxu1 %v8852_v54  ;;  %v8919_v31 = vld [vmem:[#allocation5 + $0x16e0] ss:$16 sps:$4 sm:$0xff]   ;;  %v8930_v54 = vld [vmem:[#allocation5 + $0x130c] ss:$16 sps:$4 sm:$0xff]  }
 0x2ec   :  { %5466 = vmatprep.subr.bf16.mxu0 %v8849_v35  ;;  %v8927_v35 = vld [vmem:[#allocation5 + $0x1704] ss:$16 sps:$4 sm:$0xff]  }
 0x2ee   :  { %5940 = vmatpush1.bf16.msra.mxu1 %v8850_v37  ;;  %v8928_v37 = vld [vmem:[#allocation5 + $0x1308] ss:$16 sps:$4 sm:$0xff]  }
 0x2ef   :  { %5467 = vmatpush1.bf16.msra.mxu0 %v8847_v36  ;;  %5941 = vmatprep.subr.bf16.mxu1 %v8858_v40  ;;  %v8925_v36 = vld [vmem:[#allocation5 + $0x1700] ss:$16 sps:$4 sm:$0xff]   ;;  %v8936_v40 = vld [vmem:[#allocation5 + $0x132c] ss:$16 sps:$4 sm:$0xff]  }
 0x2f0   :  { %5468 = vmatprep.subr.bf16.mxu0 %v8855_v39  ;;  %v8933_v39 = vld [vmem:[#allocation5 + $0x1724] ss:$16 sps:$4 sm:$0xff]  }
 0x2f2   :  { %5942 = vmatpush1.bf16.msra.mxu1 %v8856_v55  ;;  %v8934_v55 = vld [vmem:[#allocation5 + $0x1328] ss:$16 sps:$4 sm:$0xff]  }
 0x2f3   :  { %5469 = vmatpush1.bf16.msra.mxu0 %v8853_v41  ;;  %5943 = vmatprep.subr.bf16.mxu1 %v8864_v45  ;;  %v8931_v41 = vld [vmem:[#allocation5 + $0x1720] ss:$16 sps:$4 sm:$0xff]   ;;  %v8942_v45 = vld [vmem:[#allocation5 + $0x134c] ss:$16 sps:$4 sm:$0xff]  }
 0x2f4   :  { %5470 = vmatprep.subr.bf16.mxu0 %v8861_v43  ;;  %v8939_v43 = vld [vmem:[#allocation5 + $0x1744] ss:$16 sps:$4 sm:$0xff]  }
 0x2f6   :  { %5944 = vmatpush1.bf16.msra.mxu1 %v8862_v46  ;;  %v8940_v46 = vld [vmem:[#allocation5 + $0x1348] ss:$16 sps:$4 sm:$0xff]  }
 0x2f7   :  { %5471 = vmatpush1.bf16.msra.mxu0 %v8859_v15  ;;  %5945 = vmatprep.subr.bf16.mxu1 %v8870_v49  ;;  %v8937_v15 = vld [vmem:[#allocation5 + $0x1740] ss:$16 sps:$4 sm:$0xff]   ;;  %v8948_v49 = vld [vmem:[#allocation5 + $0x136c] ss:$16 sps:$4 sm:$0xff]  }
 0x2f8   :  { %5472 = vmatprep.subr.bf16.mxu0 %v8867_v6  ;;  %v8945_v6 = vld [vmem:[#allocation5 + $0x1764] ss:$16 sps:$4 sm:$0xff]  }
 0x2fa   :  { %5946 = vmatpush1.bf16.msra.mxu1 %v8868_v44  ;;  %v8946_v44 = vld [vmem:[#allocation5 + $0x1368] ss:$16 sps:$4 sm:$0xff]  }
 0x2fb   :  { %5473 = vmatpush1.bf16.msra.mxu0 %v8865_v50  ;;  %5947 = vmatprep.subr.bf16.mxu1 %v8876_v52  ;;  %v8943_v50 = vld [vmem:[#allocation5 + $0x1760] ss:$16 sps:$4 sm:$0xff]   ;;  %v8954_v52 = vld [vmem:[#allocation5 + $0x138c] ss:$16 sps:$4 sm:$0xff]  }
 0x2fc   :  { %5474 = vmatprep.subr.bf16.mxu0 %v8873_v51  ;;  %v8951_v51 = vld [vmem:[#allocation5 + $0x1784] ss:$16 sps:$4 sm:$0xff]  }
 0x2fe   :  { %5948 = vmatpush1.bf16.msra.mxu1 %v8874_v24  ;;  %v8952_v24 = vld [vmem:[#allocation5 + $0x1388] ss:$16 sps:$4 sm:$0xff]  }
 0x2ff   :  { %5475 = vmatpush1.bf16.msra.mxu0 %v8871_v53  ;;  %5960 = vmatprep.subr.bf16.mxu1 %v8882_v59  ;;  %v8949_v53 = vld [vmem:[#allocation5 + $0x1780] ss:$16 sps:$4 sm:$0xff]   ;;  %v8958_v59 = vld [vmem:[#allocation5 + $0x13a8] ss:$16 sps:$4 sm:$0xff]  }
 0x300   :  { %5487 = vmatprep.subr.bf16.mxu0 %v8879_v58  ;;  %v8955_v58 = vld [vmem:[#allocation5 + $0x17a0] ss:$16 sps:$4 sm:$0xff]  }
 0x301   :  { %5950 = vmatmul.mubr.bf16.vlgmr.msra.gmra.mrb[4].mxu1 %v9639_v12  ;;  %v8900_v12 = vld [vmem:[#allocation5 + $0x126c] ss:$16 sps:$4 sm:$0xff]  }
 0x302   :  { %5477 = vmatmul.mubr.bf16.vlgmr.msra.gmra.mrb[0].mxu0 %v9655_v60  ;;  %5961 = vmatpush1.bf16.msra.mxu1 %v8880_v63  ;;  %v8964_v63 = vld [vmem:[#allocation5 + $0x13c8] ss:$16 sps:$4 sm:$0xff]  }
 0x303   :  { %5488 = vmatpush1.bf16.msra.mxu0 %v8877_v62  ;;  %5962 = vmatprep.subr.bf16.mxu1 %v8888_v1  ;;  %v8961_v62 = vld [vmem:[#allocation5 + $0x17c0] ss:$16 sps:$4 sm:$0xff]   ;;  %v8972_v1 = vld [vmem:[#allocation5 + $0x13ec] ss:$16 sps:$4 sm:$0xff]  }
 0x304   :  { %5489 = vmatprep.subr.bf16.mxu0 %v8885_v0  ;;  %5519 = vmatprep.mubr.bf16.mxu0 %v9657_v47  ;;  %v8969_v0 = vld [vmem:[#allocation5 + $0x17e4] ss:$16 sps:$4 sm:$0xff]  }
 0x305   :  { %5992 = vmatprep.mubr.bf16.mxu1 %v9641_v33  ;;  %v8904_v33 = vld [vmem:[#allocation5 + $0x1288] ss:$16 sps:$4 sm:$0xff]  }
 0x306   :  { %5963 = vmatpush1.bf16.msra.mxu1 %v8886_v34  ;;  %v8970_v34 = vld [vmem:[#allocation5 + $0x13e8] ss:$16 sps:$4 sm:$0xff]  }
 0x307   :  { %5490 = vmatpush1.bf16.msra.mxu0 %v8883_v4  ;;  %5964 = vmatprep.subr.bf16.mxu1 %v8894_v9  ;;  %v8967_v4 = vld [vmem:[#allocation5 + $0x17e0] ss:$16 sps:$4 sm:$0xff]   ;;  %v164_v9 = vld [vmem:[#allocation2 + $0x178] sm:$0xff] }
 0x308   :  { %5491 = vmatprep.subr.bf16.mxu0 %v8891_v8  ;;  %v139_v8 = vld [vmem:[#allocation2 + $0xb0] sm:$0xff] }
 0x30a   :  { %5965 = vmatpush1.bf16.msra.mxu1 %v8892_v11  ;;  %v8978_v11 = vld [vmem:[#allocation5 + $0x140c] ss:$16 sps:$4 sm:$0xff]  }
 0x30b   :  { %5492 = vmatpush1.bf16.msra.mxu0 %v8889_v10  ;;  %5966 = vmatprep.subr.bf16.mxu1 %v8900_v12  ;;  %v8975_v10 = vld [vmem:[#allocation5 + $0x1804] ss:$16 sps:$4 sm:$0xff]   ;;  %v8973_v12 = vld [vmem:[#allocation5 + $0x1800] ss:$16 sps:$4 sm:$0xff]  }
 0x30c   :  { %5493 = vmatprep.subr.bf16.mxu0 %v8897_v13  ;;  %v9663_v13 = vpack.c.bf16 %v164_v9, %v139_v8  ;;  %v9038_v8 = vld [vmem:[#allocation5 + $0x15ac] ss:$16 sps:$4 sm:$0xff]  }
 0x30d   :  { %v9129_v9 = vld [vmem:[#allocation8 + $0x40] ss:$8 sps:$4 sm:$0xff]  }
 0x30e   :  { %5967 = vmatpush1.bf16.msra.mxu1 %v8898_v16  ;;  %v8981_v16 = vld [vmem:[#allocation5 + $0x1824] ss:$16 sps:$4 sm:$0xff]  }
 0x30f   :  { %5494 = vmatpush1.bf16.msra.mxu0 %v8895_v14  ;;  %5968 = vmatprep.subr.bf16.mxu1 %v8906_v18  ;;  %v8976_v14 = vld [vmem:[#allocation5 + $0x1408] ss:$16 sps:$4 sm:$0xff]   ;;  %v8979_v18 = vld [vmem:[#allocation5 + $0x1820] ss:$16 sps:$4 sm:$0xff]  }
 0x310   :  { %5495 = vmatprep.subr.bf16.mxu0 %v8903_v17  ;;  %v8984_v17 = vld [vmem:[#allocation5 + $0x142c] ss:$16 sps:$4 sm:$0xff]  }
 0x312   :  { %5969 = vmatpush1.bf16.msra.mxu1 %v8904_v33  ;;  %v8987_v33 = vld [vmem:[#allocation5 + $0x1844] ss:$16 sps:$4 sm:$0xff]  }
 0x313   :  { %5496 = vmatpush1.bf16.msra.mxu0 %v8901_v19  ;;  %5970 = vmatprep.subr.bf16.mxu1 %v8912_v42  ;;  %v8982_v19 = vld [vmem:[#allocation5 + $0x1428] ss:$16 sps:$4 sm:$0xff]   ;;  %v9438_v42 = vmov 0  }
 0x314   :  { %5497 = vmatprep.subr.bf16.mxu0 %v8909_v20  ;;  %v8990_v20 = vld [vmem:[#allocation5 + $0x144c] ss:$16 sps:$4 sm:$0xff]  }
 0x316   :  { %5971 = vmatpush1.bf16.msra.mxu1 %v8910_v23  ;;  %v8988_v23 = vld [vmem:[#allocation5 + $0x1448] ss:$16 sps:$4 sm:$0xff]  }
 0x317   :  { %5498 = vmatpush1.bf16.msra.mxu0 %v8907_v22  ;;  %5972 = vmatprep.subr.bf16.mxu1 %v8918_v26  ;;  %v8985_v22 = vld [vmem:[#allocation5 + $0x1840] ss:$16 sps:$4 sm:$0xff]  }
 0x318   :  { %5499 = vmatprep.subr.bf16.mxu0 %v8915_v25  ;;  %v8996_v25 = vld [vmem:[#allocation5 + $0x146c] ss:$16 sps:$4 sm:$0xff]   ;;  %v8991_v26 = vld [vmem:[#allocation5 + $0x1860] ss:$16 sps:$4 sm:$0xff]  }
 0x31a   :  { %5973 = vmatpush1.bf16.msra.mxu1 %v8916_v28  ;;  %v8999_v28 = vld [vmem:[#allocation5 + $0x1884] ss:$16 sps:$4 sm:$0xff]  }
 0x31b   :  { %5500 = vmatpush1.bf16.msra.mxu0 %v8913_v27  ;;  %5974 = vmatprep.subr.bf16.mxu1 %v8924_v30  ;;  %v8994_v27 = vld [vmem:[#allocation5 + $0x1468] ss:$16 sps:$4 sm:$0xff]   ;;  %v8997_v30 = vld [vmem:[#allocation5 + $0x1880] ss:$16 sps:$4 sm:$0xff]  }
 0x31c   :  { %5501 = vmatprep.subr.bf16.mxu0 %v8921_v29  ;;  %v9002_v29 = vld [vmem:[#allocation5 + $0x148c] ss:$16 sps:$4 sm:$0xff]  }
 0x31e   :  { %5975 = vmatpush1.bf16.msra.mxu1 %v8922_v32  ;;  %v9008_v32 = vld [vmem:[#allocation5 + $0x14ac] ss:$16 sps:$4 sm:$0xff]  }
 0x31f   :  { %5502 = vmatpush1.bf16.msra.mxu0 %v8919_v31  ;;  %5976 = vmatprep.subr.bf16.mxu1 %v8930_v54  ;;  %v9005_v31 = vld [vmem:[#allocation5 + $0x18a4] ss:$16 sps:$4 sm:$0xff]   ;;  %v9006_v54 = vld [vmem:[#allocation5 + $0x14a8] ss:$16 sps:$4 sm:$0xff]  }
 0x320   :  { %5503 = vmatprep.subr.bf16.mxu0 %v8927_v35  ;;  %v9003_v35 = vld [vmem:[#allocation5 + $0x18a0] ss:$16 sps:$4 sm:$0xff]  }
 0x322   :  { %5977 = vmatpush1.bf16.msra.mxu1 %v8928_v37  ;;  %v9014_v37 = vld [vmem:[#allocation5 + $0x14cc] ss:$16 sps:$4 sm:$0xff]  }
 0x323   :  { %5504 = vmatpush1.bf16.msra.mxu0 %v8925_v36  ;;  %5978 = vmatprep.subr.bf16.mxu1 %v8936_v40  ;;  %v9011_v36 = vld [vmem:[#allocation5 + $0x18c4] ss:$16 sps:$4 sm:$0xff]   ;;  %v9012_v40 = vld [vmem:[#allocation5 + $0x14c8] ss:$16 sps:$4 sm:$0xff]  }
 0x324   :  { %5505 = vmatprep.subr.bf16.mxu0 %v8933_v39  ;;  %v9009_v39 = vld [vmem:[#allocation5 + $0x18c0] ss:$16 sps:$4 sm:$0xff]  }
 0x326   :  { %5979 = vmatpush1.bf16.msra.mxu1 %v8934_v55  ;;  %v9020_v55 = vld [vmem:[#allocation5 + $0x14ec] ss:$16 sps:$4 sm:$0xff]  }
 0x327   :  { %5506 = vmatpush1.bf16.msra.mxu0 %v8931_v41  ;;  %5980 = vmatprep.subr.bf16.mxu1 %v8942_v45  ;;  %v9017_v41 = vld [vmem:[#allocation5 + $0x18e4] ss:$16 sps:$4 sm:$0xff]   ;;  %v9018_v45 = vld [vmem:[#allocation5 + $0x14e8] ss:$16 sps:$4 sm:$0xff]  }
 0x328   :  { %5507 = vmatprep.subr.bf16.mxu0 %v8939_v43  ;;  %v9015_v43 = vld [vmem:[#allocation5 + $0x18e0] ss:$16 sps:$4 sm:$0xff]  }
 0x32a   :  { %5981 = vmatpush1.bf16.msra.mxu1 %v8940_v46  ;;  %v166_v46 = vld [vmem:[#allocation2 + $0x188] sm:$0xff] }
 0x32b   :  { %5508 = vmatpush1.bf16.msra.mxu0 %v8937_v15  ;;  %5982 = vmatprep.subr.bf16.mxu1 %v8948_v49  ;;  %v141_v15 = vld [vmem:[#allocation2 + $0xc0] sm:$0xff] }
 0x32c   :  { %5509 = vmatprep.subr.bf16.mxu0 %v8945_v6  ;;  %v9023_v6 = vld [vmem:[#allocation5 + $0x150c] ss:$16 sps:$4 sm:$0xff]   ;;  %v9669_v49 = vpack.c.bf16 %v166_v46, %v141_v15  ;;  %v9063_v15 = vld [vmem:[#allocation5 + $0x16c8] ss:$16 sps:$4 sm:$0xff]  }
 0x32d   :  { %v9068_v46 = vld [vmem:[#allocation5 + $0x16ec] ss:$16 sps:$4 sm:$0xff]  }
 0x32e   :  { %5983 = vmatpush1.bf16.msra.mxu1 %v8946_v44  ;;  %v9026_v44 = vld [vmem:[#allocation5 + $0x152c] ss:$16 sps:$4 sm:$0xff]  }
 0x32f   :  { %5510 = vmatpush1.bf16.msra.mxu0 %v8943_v50  ;;  %5984 = vmatprep.subr.bf16.mxu1 %v8954_v52  ;;  %v9021_v50 = vld [vmem:[#allocation5 + $0x1508] ss:$16 sps:$4 sm:$0xff]  }
 0x330   :  { %5511 = vmatprep.subr.bf16.mxu0 %v8951_v51  ;;  %v9117_v51 = vld [vmem:[#allocation8] ss:$8 sps:$4 sm:$0xff]   ;;  %v9119_v52 = vld [vmem:[#allocation8 + $0x4] ss:$8 sps:$4 sm:$0xff]  }
 0x332   :  { %5985 = vmatpush1.bf16.msra.mxu1 %v8952_v24  ;;  %v9122_v24 = vld [vmem:[#allocation8 + $0x14] ss:$8 sps:$4 sm:$0xff]  }
 0x333   :  { %5512 = vmatpush1.bf16.msra.mxu0 %v8949_v53  ;;  %5986 = vmatprep.subr.bf16.mxu1 %v8960_v57  ;;  %v9024_v53 = vld [vmem:[#allocation5 + $0x1528] ss:$16 sps:$4 sm:$0xff]   ;;  %v9120_v57 = vld [vmem:[#allocation8 + $0x10] ss:$8 sps:$4 sm:$0xff]  }
 0x334   :  { %5513 = vmatprep.subr.bf16.mxu0 %v8957_v56  ;;  %v9029_v56 = vld [vmem:[#allocation5 + $0x154c] ss:$16 sps:$4 sm:$0xff]  }
 0x336   :  { %5987 = vmatpush1.bf16.msra.mxu1 %v8958_v59  ;;  %v9027_v59 = vld [vmem:[#allocation5 + $0x1548] ss:$16 sps:$4 sm:$0xff]  }
 0x337   :  { %5514 = vmatpush1.bf16.msra.mxu0 %v8955_v58  ;;  %5988 = vmatprep.subr.bf16.mxu1 %v8966_v61  ;;  %v9125_v58 = vld [vmem:[#allocation8 + $0x24] ss:$8 sps:$4 sm:$0xff]   ;;  %v9123_v61 = vld [vmem:[#allocation8 + $0x20] ss:$8 sps:$4 sm:$0xff]  }
 0x338   :  { %5515 = vmatprep.subr.bf16.mxu0 %v8963_v21  ;;  %v9032_v21 = vld [vmem:[#allocation5 + $0x156c] ss:$16 sps:$4 sm:$0xff]  }
 0x33a   :  { %5989 = vmatpush1.bf16.msra.mxu1 %v8964_v63  ;;  %v9030_v63 = vld [vmem:[#allocation5 + $0x1568] ss:$16 sps:$4 sm:$0xff]  }
 0x33b   :  { %5516 = vmatpush1.bf16.msra.mxu0 %v8961_v62  ;;  %5990 = vmatprep.subr.bf16.mxu1 %v8972_v1  ;;  %v9128_v62 = vld [vmem:[#allocation8 + $0x34] ss:$8 sps:$4 sm:$0xff]   ;;  %v9126_v1 = vld [vmem:[#allocation8 + $0x30] ss:$8 sps:$4 sm:$0xff]  }
 0x33c   :  { %5517 = vmatprep.subr.bf16.mxu0 %v8969_v0  ;;  %v9035_v0 = vld [vmem:[#allocation5 + $0x158c] ss:$16 sps:$4 sm:$0xff]  }
 0x33e   :  { %5991 = vmatpush1.bf16.msra.mxu1 %v8970_v34  ;;  %v9033_v34 = vld [vmem:[#allocation5 + $0x1588] ss:$16 sps:$4 sm:$0xff]  }
 0x33f   :  { %5518 = vmatpush1.bf16.msra.mxu0 %v8967_v4  ;;  %6003 = vmatprep.subr.bf16.mxu1 %v8978_v11  ;;  %v9131_v4 = vld [vmem:[#allocation8 + $0x44] ss:$8 sps:$4 sm:$0xff]  }
 0x340   :  { %5530 = vmatprep.subr.bf16.mxu0 %v8975_v10  ;;  %v9134_v10 = vld [vmem:[#allocation8 + $0x54] ss:$8 sps:$4 sm:$0xff]  }
 0x341   :  { %5993 = vmatmul.mubr.bf16.vlgmr.msra.gmra.mrb[4].mxu1 %v9647_v48  ;;  %v8993_v48 = vld [vmem:[#allocation5 + $0x1864] ss:$16 sps:$4 sm:$0xff]   ;;  %v9036_v11 = vld [vmem:[#allocation5 + $0x15a8] ss:$16 sps:$4 sm:$0xff]  }
 0x342   :  { %5520 = vmatmul.mubr.bf16.vlgmr.msra.gmra.mrb[0].mxu0 %v9663_v13  ;;  %6004 = vmatpush1.bf16.msra.mxu1 %v8976_v14  ;;  %v9132_v14 = vld [vmem:[#allocation8 + $0x50] ss:$8 sps:$4 sm:$0xff]  }
 0x343   :  { %5531 = vmatpush1.bf16.msra.mxu0 %v8973_v12  ;;  %6005 = vmatprep.subr.bf16.mxu1 %v8984_v17  ;;  %v9041_v12 = vld [vmem:[#allocation5 + $0x15cc] ss:$16 sps:$4 sm:$0xff]   ;;  %v9039_v17 = vld [vmem:[#allocation5 + $0x15c8] ss:$16 sps:$4 sm:$0xff]  }
 0x344   :  { %5532 = vmatprep.subr.bf16.mxu0 %v8981_v16  ;;  %5562 = vmatprep.mubr.bf16.mxu0 %v9438_v42  ;;  %v9137_v16 = vld [vmem:[#allocation8 + $0x64] ss:$8 sps:$4 sm:$0xff]  }
 0x345   :  { %6035 = vmatprep.mubr.bf16.mxu1 %v9649_v38  ;;  %v9000_v38 = vld [vmem:[#allocation5 + $0x1488] ss:$16 sps:$4 sm:$0xff]  }
 0x346   :  { %6006 = vmatpush1.bf16.msra.mxu1 %v8982_v19  ;;  %v9135_v19 = vld [vmem:[#allocation8 + $0x60] ss:$8 sps:$4 sm:$0xff]  }
 0x347   :  { %5533 = vmatpush1.bf16.msra.mxu0 %v8979_v18  ;;  %6007 = vmatprep.subr.bf16.mxu1 %v8990_v20  ;;  %v9044_v18 = vld [vmem:[#allocation5 + $0x15ec] ss:$16 sps:$4 sm:$0xff]   ;;  %v9042_v20 = vld [vmem:[#allocation5 + $0x15e8] ss:$16 sps:$4 sm:$0xff]  }
 0x348   :  { %5534 = vmatprep.subr.bf16.mxu0 %v8987_v33  ;;  %v9140_v33 = vld [vmem:[#allocation8 + $0x74] ss:$8 sps:$4 sm:$0xff]  }
 0x34a   :  { %6008 = vmatpush1.bf16.msra.mxu1 %v8988_v23  ;;  %v9138_v23 = vld [vmem:[#allocation8 + $0x70] ss:$8 sps:$4 sm:$0xff]  }
 0x34b   :  { %5535 = vmatpush1.bf16.msra.mxu0 %v8985_v22  ;;  %6009 = vmatprep.subr.bf16.mxu1 %v8996_v25  ;;  %v9047_v22 = vld [vmem:[#allocation5 + $0x160c] ss:$16 sps:$4 sm:$0xff]   ;;  %v9045_v25 = vld [vmem:[#allocation5 + $0x1608] ss:$16 sps:$4 sm:$0xff]  }
 0x34c   :  { %5536 = vmatprep.subr.bf16.mxu0 %v8993_v48  ;;  %v9143_v48 = vld [vmem:[#allocation8 + $0x84] ss:$8 sps:$4 sm:$0xff]  }
 0x34e   :  { %6010 = vmatpush1.bf16.msra.mxu1 %v8994_v27  ;;  %v9141_v27 = vld [vmem:[#allocation8 + $0x80] ss:$8 sps:$4 sm:$0xff]  }
 0x34f   :  { %5537 = vmatpush1.bf16.msra.mxu0 %v8991_v26  ;;  %6011 = vmatprep.subr.bf16.mxu1 %v9002_v29  ;;  %v9050_v26 = vld [vmem:[#allocation5 + $0x162c] ss:$16 sps:$4 sm:$0xff]   ;;  %v9048_v29 = vld [vmem:[#allocation5 + $0x1628] ss:$16 sps:$4 sm:$0xff]  }
 0x350   :  { %5538 = vmatprep.subr.bf16.mxu0 %v8999_v28  ;;  %v9146_v28 = vld [vmem:[#allocation8 + $0x94] ss:$8 sps:$4 sm:$0xff]  }
 0x352   :  { %6012 = vmatpush1.bf16.msra.mxu1 %v9000_v38  ;;  %v9144_v38 = vld [vmem:[#allocation8 + $0x90] ss:$8 sps:$4 sm:$0xff]  }
 0x353   :  { %5539 = vmatpush1.bf16.msra.mxu0 %v8997_v30  ;;  %6013 = vmatprep.subr.bf16.mxu1 %v9008_v32  ;;  %v9053_v30 = vld [vmem:[#allocation5 + $0x164c] ss:$16 sps:$4 sm:$0xff]   ;;  %v9051_v32 = vld [vmem:[#allocation5 + $0x1648] ss:$16 sps:$4 sm:$0xff]  }
 0x354   :  { %5540 = vmatprep.subr.bf16.mxu0 %v9005_v31  ;;  %v9149_v31 = vld [vmem:[#allocation8 + $0xa4] ss:$8 sps:$4 sm:$0xff]  }
 0x356   :  { %6014 = vmatpush1.bf16.msra.mxu1 %v9006_v54  ;;  %v9147_v54 = vld [vmem:[#allocation8 + $0xa0] ss:$8 sps:$4 sm:$0xff]  }
 0x357   :  { %5541 = vmatpush1.bf16.msra.mxu0 %v9003_v35  ;;  %6015 = vmatprep.subr.bf16.mxu1 %v9014_v37  ;;  %v9056_v35 = vld [vmem:[#allocation5 + $0x166c] ss:$16 sps:$4 sm:$0xff]  }
 0x358   :  { %5542 = vmatprep.subr.bf16.mxu0 %v9011_v36  ;;  %v9054_v36 = vld [vmem:[#allocation5 + $0x1668] ss:$16 sps:$4 sm:$0xff]   ;;  %v9059_v37 = vld [vmem:[#allocation5 + $0x168c] ss:$16 sps:$4 sm:$0xff]  }
 0x35a   :  { %6016 = vmatpush1.bf16.msra.mxu1 %v9012_v40  ;;  %v9057_v40 = vld [vmem:[#allocation5 + $0x1688] ss:$16 sps:$4 sm:$0xff]  }
 0x35b   :  { %5543 = vmatpush1.bf16.msra.mxu0 %v9009_v39  ;;  %6017 = vmatprep.subr.bf16.mxu1 %v9020_v55  ;;  %v9155_v39 = vld [vmem:[#allocation8 + $0xc4] ss:$8 sps:$4 sm:$0xff]   ;;  %v9153_v55 = vld [vmem:[#allocation8 + $0xc0] ss:$8 sps:$4 sm:$0xff]  }
 0x35c   :  { %5544 = vmatprep.subr.bf16.mxu0 %v9017_v41  ;;  %v9062_v41 = vld [vmem:[#allocation5 + $0x16ac] ss:$16 sps:$4 sm:$0xff]  }
 0x35e   :  { %6018 = vmatpush1.bf16.msra.mxu1 %v9018_v45  ;;  %v9065_v45 = vld [vmem:[#allocation5 + $0x16cc] ss:$16 sps:$4 sm:$0xff]  }
 0x35f   :  { %5545 = vmatpush1.bf16.msra.mxu0 %v9015_v43  ;;  %6019 = vmatprep.subr.bf16.mxu1 %v9023_v6  ;;  %v9060_v43 = vld [vmem:[#allocation5 + $0x16a8] ss:$16 sps:$4 sm:$0xff]  }
 0x360   :  { %6556 = vmatprep.subr.bf16.mxu0 %v9119_v52  ;;  %v9066_v6 = vld [vmem:[#allocation5 + $0x16e8] ss:$16 sps:$4 sm:$0xff]  }
 0x361   :  { %v9072_v52 = vld [vmem:[#allocation5 + $0x1728] ss:$16 sps:$4 sm:$0xff]  }
 0x362   :  { %5563 = vmatmul.mubr.bf16.vlgmr.msra.gmra.mrb[0].mxu0 %v9669_v49  ;;  %6020 = vmatpush1.bf16.msra.mxu1 %v9021_v50  ;;  %v9071_v50 = vld [vmem:[#allocation5 + $0x170c] ss:$16 sps:$4 sm:$0xff]  }
 0x363   :  { %6021 = vmatprep.subr.bf16.mxu1 %v9026_v44  ;;  %6557 = vmatpush1.bf16.msra.mxu0 %v9117_v51  ;;  %v9069_v44 = vld [vmem:[#allocation5 + $0x1708] ss:$16 sps:$4 sm:$0xff]   ;;  %v9074_v51 = vld [vmem:[#allocation5 + $0x172c] ss:$16 sps:$4 sm:$0xff]  }
 0x364   :  { %6558 = vmatprep.subr.bf16.mxu0 %v9122_v24  ;;  %v9075_v24 = vld [vmem:[#allocation5 + $0x1748] ss:$16 sps:$4 sm:$0xff]  }
 0x366   :  { %6022 = vmatpush1.bf16.msra.mxu1 %v9024_v53  ;;  %v9077_v53 = vld [vmem:[#allocation5 + $0x174c] ss:$16 sps:$4 sm:$0xff]  }
 0x367   :  { %6023 = vmatprep.subr.bf16.mxu1 %v9029_v56  ;;  %6559 = vmatpush1.bf16.msra.mxu0 %v9120_v57  ;;  %v9080_v56 = vld [vmem:[#allocation5 + $0x176c] ss:$16 sps:$4 sm:$0xff]   ;;  %v9078_v57 = vld [vmem:[#allocation5 + $0x1768] ss:$16 sps:$4 sm:$0xff]  }
 0x368   :  { %6560 = vmatprep.subr.bf16.mxu0 %v9125_v58  ;;  %v9083_v58 = vld [vmem:[#allocation5 + $0x178c] ss:$16 sps:$4 sm:$0xff]  }
 0x36a   :  { %6024 = vmatpush1.bf16.msra.mxu1 %v9027_v59  ;;  %v9081_v59 = vld [vmem:[#allocation5 + $0x1788] ss:$16 sps:$4 sm:$0xff]  }
 0x36b   :  { %6025 = vmatprep.subr.bf16.mxu1 %v9032_v21  ;;  %6561 = vmatpush1.bf16.msra.mxu0 %v9123_v61  ;;  %v9086_v21 = vld [vmem:[#allocation5 + $0x17ac] ss:$16 sps:$4 sm:$0xff]   ;;  %v9084_v61 = vld [vmem:[#allocation5 + $0x17a8] ss:$16 sps:$4 sm:$0xff]  }
 0x36c   :  { %6562 = vmatprep.subr.bf16.mxu0 %v9128_v62  ;;  %v9158_v62 = vld [vmem:[#allocation8 + $0xd4] ss:$8 sps:$4 sm:$0xff]  }
 0x36e   :  { %6026 = vmatpush1.bf16.msra.mxu1 %v9030_v63  ;;  %v9089_v63 = vld [vmem:[#allocation5 + $0x17cc] ss:$16 sps:$4 sm:$0xff]  }
 0x36f   :  { %6027 = vmatprep.subr.bf16.mxu1 %v9035_v0  ;;  %6563 = vmatpush1.bf16.msra.mxu0 %v9126_v1  ;;  %v9156_v0 = vld [vmem:[#allocation8 + $0xd0] ss:$8 sps:$4 sm:$0xff]   ;;  %v9087_v1 = vld [vmem:[#allocation5 + $0x17c8] ss:$16 sps:$4 sm:$0xff]  }
 0x370   :  { %6564 = vmatprep.subr.bf16.mxu0 %v9131_v4  ;;  %v9161_v4 = vld [vmem:[#allocation8 + $0xe4] ss:$8 sps:$4 sm:$0xff]  }
 0x372   :  { %6028 = vmatpush1.bf16.msra.mxu1 %v9033_v34  ;;  %v9092_v34 = vld [vmem:[#allocation5 + $0x17ec] ss:$16 sps:$4 sm:$0xff]  }
 0x373   :  { %6029 = vmatprep.subr.bf16.mxu1 %v9038_v8  ;;  %6565 = vmatpush1.bf16.msra.mxu0 %v9129_v9  ;;  %v9159_v8 = vld [vmem:[#allocation8 + $0xe0] ss:$8 sps:$4 sm:$0xff]   ;;  %v9090_v9 = vld [vmem:[#allocation5 + $0x17e8] ss:$16 sps:$4 sm:$0xff]  }
 0x374   :  { %6566 = vmatprep.subr.bf16.mxu0 %v9134_v10  ;;  %v9164_v10 = vld [vmem:[#allocation8 + $0xf4] ss:$8 sps:$4 sm:$0xff]  }
 0x376   :  { %6030 = vmatpush1.bf16.msra.mxu1 %v9036_v11  ;;  %v9095_v11 = vld [vmem:[#allocation5 + $0x180c] ss:$16 sps:$4 sm:$0xff]  }
 0x377   :  { %6031 = vmatprep.subr.bf16.mxu1 %v9041_v12  ;;  %6567 = vmatpush1.bf16.msra.mxu0 %v9132_v14  ;;  %v9162_v12 = vld [vmem:[#allocation8 + $0xf0] ss:$8 sps:$4 sm:$0xff]   ;;  %v9093_v14 = vld [vmem:[#allocation5 + $0x1808] ss:$16 sps:$4 sm:$0xff]  }
 0x378   :  { %6568 = vmatprep.subr.bf16.mxu0 %v9137_v16  ;;  %v9098_v16 = vld [vmem:[#allocation5 + $0x182c] ss:$16 sps:$4 sm:$0xff]  }
 0x37a   :  { %6032 = vmatpush1.bf16.msra.mxu1 %v9039_v17  ;;  %v9167_v17 = vld [vmem:[#allocation8 + $0x104] ss:$8 sps:$4 sm:$0xff]  }
 0x37b   :  { %6033 = vmatprep.subr.bf16.mxu1 %v9044_v18  ;;  %6569 = vmatpush1.bf16.msra.mxu0 %v9135_v19  ;;  %v9096_v18 = vld [vmem:[#allocation5 + $0x1828] ss:$16 sps:$4 sm:$0xff]   ;;  %v9101_v19 = vld [vmem:[#allocation5 + $0x184c] ss:$16 sps:$4 sm:$0xff]  }
 0x37c   :  { %6570 = vmatprep.subr.bf16.mxu0 %v9140_v33  ;;  %v9099_v33 = vld [vmem:[#allocation5 + $0x1848] ss:$16 sps:$4 sm:$0xff]  }
 0x37e   :  { %6034 = vmatpush1.bf16.msra.mxu1 %v9042_v20  ;;  %v9104_v20 = vld [vmem:[#allocation5 + $0x186c] ss:$16 sps:$4 sm:$0xff]  }
 0x37f   :  { %6046 = vmatprep.subr.bf16.mxu1 %v9047_v22  ;;  %6571 = vmatpush1.bf16.msra.mxu0 %v9138_v23  ;;  %v9102_v22 = vld [vmem:[#allocation5 + $0x1868] ss:$16 sps:$4 sm:$0xff]   ;;  %v9107_v23 = vld [vmem:[#allocation5 + $0x188c] ss:$16 sps:$4 sm:$0xff]  }
 0x380   :  { %6572 = vmatprep.subr.bf16.mxu0 %v9143_v48  ;;  %v9105_v48 = vld [vmem:[#allocation5 + $0x1888] ss:$16 sps:$4 sm:$0xff]  }
 0x381   :  { %6036 = vmatmul.mubr.bf16.vlgmr.msra.gmra.mrb[4].mxu1 %v9655_v60  ;;  %v9152_v60 = vld [vmem:[#allocation8 + $0xb4] ss:$8 sps:$4 sm:$0xff]  }
 0x382   :  { %6047 = vmatpush1.bf16.msra.mxu1 %v9045_v25  ;;  %6078 = vmatprep.mubr.bf16.mxu1 %v9657_v47  ;;  %v9150_v47 = vld [vmem:[#allocation8 + $0xb0] ss:$8 sps:$4 sm:$0xff]  }
 0x383   :  { %6048 = vmatprep.subr.bf16.mxu1 %v9050_v26  ;;  %6573 = vmatpush1.bf16.msra.mxu0 %v9141_v27  ;;  %v9110_v25 = vld [vmem:[#allocation5 + $0x18ac] ss:$16 sps:$4 sm:$0xff]  }
 0x384   :  { %6574 = vmatprep.subr.bf16.mxu0 %v9146_v28  ;;  %v9113_v26 = vld [vmem:[#allocation5 + $0x18cc] ss:$16 sps:$4 sm:$0xff]   ;;  %v9114_v28 = vld [vmem:[#allocation5 + $0x18e8] ss:$16 sps:$4 sm:$0xff]  }
 0x385   :  { %v9116_v27 = vld [vmem:[#allocation5 + $0x18ec] ss:$16 sps:$4 sm:$0xff]  }
 0x386   :  { %6049 = vmatpush1.bf16.msra.mxu1 %v9048_v29  ;;  %v994_v29 = vlaneseq }
 0x387   :  { %6050 = vmatprep.subr.bf16.mxu1 %v9053_v30  ;;  %6575 = vmatpush1.bf16.msra.mxu0 %v9144_v38 }
 0x388   :  { %6576 = vmatprep.subr.bf16.mxu0 %v9149_v31  ;;  %v9677_v30 = vshrl.u32 %v994_v29, 7  ;;  %v9680_v31 = vld [vmem:[#allocation7] sm:$0xf] }
 0x389   :  { %v9206_v29 = vld [vmem:[#allocation8 + $0x1d4] ss:$8 sps:$4 sm:$0xff]  }
 0x38a   :  { %6051 = vmatpush1.bf16.msra.mxu1 %v9051_v32  ;;  %v996_v38 = vsub.s32 0, %v9677_v30  ;;  %v1000_v32 = vsub.s32 1, %v9677_v30 }
 0x38b   :  { %6052 = vmatprep.subr.bf16.mxu1 %v9056_v35  ;;  %6577 = vmatpush1.bf16.msra.mxu0 %v9147_v54 }
 0x38c   :  { %6578 = vmatprep.subr.bf16.mxu0 %v9152_v60  ;;  %v997_v35 = vrot.slane %v9680_v31, %v996_v38  ;;  %v1001_v54 = vrot.slane %v9680_v31, %v1000_v32 }
 0x38e   :  { %6053 = vmatpush1.bf16.msra.mxu1 %v9054_v36  ;;  %v5049_v60 = vadd.f32 %v9607_v2, %v997_v35 }
 0x38f   :  { %6054 = vmatprep.subr.bf16.mxu1 %v9059_v37  ;;  %6579 = vmatpush1.bf16.msra.mxu0 %v9150_v47  ;;  %v5053_v37 = vadd.f32 %v9611_v5, %v997_v35  ;;  %v9204_v35 = vld [vmem:[#allocation8 + $0x1d0] ss:$8 sps:$4 sm:$0xff]  }
 0x390   :  { %6580 = vmatprep.subr.bf16.mxu0 %v9155_v39 }
 0x392   :  { %6055 = vmatpush1.bf16.msra.mxu1 %v9057_v40  ;;  %v5055_v40 = vadd.f32 %v9613_v7, %v1001_v54  ;;  %v9165_v7 = vld [vmem:[#allocation8 + $0x100] ss:$8 sps:$4 sm:$0xff]  }
 0x393   :  { %6056 = vmatprep.subr.bf16.mxu1 %v9062_v41  ;;  %6581 = vmatpush1.bf16.msra.mxu0 %v9153_v55 }
 0x394   :  { %6582 = vmatprep.subr.bf16.mxu0 %v9158_v62  ;;  %v9217_v62 = vld [vmem:[#allocation11 + $0x50] sm:$0xff]  }
 0x396   :  { %6057 = vmatpush1.bf16.msra.mxu1 %v9060_v43 }
 0x397   :  { %6058 = vmatprep.subr.bf16.mxu1 %v9065_v45  ;;  %6583 = vmatpush1.bf16.msra.mxu0 %v9156_v0  ;;  %v9176_v0 = vld [vmem:[#allocation8 + $0x134] ss:$8 sps:$4 sm:$0xff]  }
 0x398   :  { %6584 = vmatprep.subr.bf16.mxu0 %v9161_v4  ;;  %v9219_v4 = vld [vmem:[#allocation11 + $0x58] sm:$0xff]  }
 0x39a   :  { %6059 = vmatpush1.bf16.msra.mxu1 %v9063_v15 }
 0x39b   :  { %6060 = vmatprep.subr.bf16.mxu1 %v9068_v46  ;;  %6585 = vmatpush1.bf16.msra.mxu0 %v9159_v8  ;;  %v9179_v8 = vld [vmem:[#allocation8 + $0x144] ss:$8 sps:$4 sm:$0xff]  }
 0x39c   :  { %6586 = vmatprep.subr.bf16.mxu0 %v9164_v10  ;;  %v9221_v10 = vld [vmem:[#allocation11 + $0x60] sm:$0xff]  }
 0x39e   :  { %6061 = vmatpush1.bf16.msra.mxu1 %v9066_v6 }
 0x39f   :  { %6062 = vmatprep.subr.bf16.mxu1 %v9071_v50  ;;  %6587 = vmatpush1.bf16.msra.mxu0 %v9162_v12  ;;  %v9182_v12 = vld [vmem:[#allocation8 + $0x154] ss:$8 sps:$4 sm:$0xff]  }
 0x3a0   :  { %6599 = vmatprep.subr.bf16.mxu0 %v9167_v17  ;;  %v9185_v17 = vld [vmem:[#allocation8 + $0x164] ss:$8 sps:$4 sm:$0xff]  }
 0x3a2   :  { %6063 = vmatpush1.bf16.msra.mxu1 %v9069_v44 }
 0x3a3   :  { %6064 = vmatprep.subr.bf16.mxu1 %v9074_v51 }
 0x3a6   :  { %6065 = vmatpush1.bf16.msra.mxu1 %v9072_v52 }
 0x3a7   :  { %6066 = vmatprep.subr.bf16.mxu1 %v9077_v53 }
 0x3aa   :  { %6067 = vmatpush1.bf16.msra.mxu1 %v9075_v24  ;;  %v9170_v24 = vld [vmem:[#allocation8 + $0x114] ss:$8 sps:$4 sm:$0xff]  }
 0x3ab   :  { %6068 = vmatprep.subr.bf16.mxu1 %v9080_v56  ;;  %v9213_v56 = vld [vmem:[#allocation11 + $0x40] sm:$0xff]  }
 0x3ae   :  { %6069 = vmatpush1.bf16.msra.mxu1 %v9078_v57  ;;  %v9214_v57 = vld [vmem:[#allocation11] sm:$0xff]  }
 0x3af   :  { %6070 = vmatprep.subr.bf16.mxu1 %v9083_v58  ;;  %v9215_v58 = vld [vmem:[#allocation11 + $0x48] sm:$0xff]  }
 0x3b2   :  { %6071 = vmatpush1.bf16.msra.mxu1 %v9081_v59  ;;  %v9168_v59 = vld [vmem:[#allocation8 + $0x110] ss:$8 sps:$4 sm:$0xff]  }
 0x3b3   :  { %6072 = vmatprep.subr.bf16.mxu1 %v9086_v21  ;;  %v9173_v21 = vld [vmem:[#allocation8 + $0x124] ss:$8 sps:$4 sm:$0xff]  }
 0x3b6   :  { %6073 = vmatpush1.bf16.msra.mxu1 %v9084_v61  ;;  %v9216_v61 = vld [vmem:[#allocation11 + $0x8] sm:$0xff]  }
 0x3b7   :  { %6074 = vmatprep.subr.bf16.mxu1 %v9089_v63  ;;  %v9171_v63 = vld [vmem:[#allocation8 + $0x120] ss:$8 sps:$4 sm:$0xff]  }
 0x3ba   :  { %6075 = vmatpush1.bf16.msra.mxu1 %v9087_v1  ;;  %v9218_v1 = vld [vmem:[#allocation11 + $0x10] sm:$0xff]  }
 0x3bb   :  { %6076 = vmatprep.subr.bf16.mxu1 %v9092_v34  ;;  %v9174_v34 = vld [vmem:[#allocation8 + $0x130] ss:$8 sps:$4 sm:$0xff]  }
 0x3be   :  { %6077 = vmatpush1.bf16.msra.mxu1 %v9090_v9  ;;  %v9220_v9 = vld [vmem:[#allocation11 + $0x18] sm:$0xff]  }
 0x3bf   :  { %6089 = vmatprep.subr.bf16.mxu1 %v9095_v11  ;;  %v9177_v11 = vld [vmem:[#allocation8 + $0x140] ss:$8 sps:$4 sm:$0xff]  }
 0x3c1   :  { %6079 = vmatmul.mubr.bf16.vlgmr.msra.gmra.mrb[4].mxu1 %v9663_v13  ;;  %v9108_v13 = vld [vmem:[#allocation5 + $0x18a8] ss:$16 sps:$4 sm:$0xff]  }
 0x3c2   :  { %6090 = vmatpush1.bf16.msra.mxu1 %v9093_v14  ;;  %6121 = vmatprep.mubr.bf16.mxu1 %v9438_v42  ;;  %v9111_v42 = vld [vmem:[#allocation5 + $0x18c8] ss:$16 sps:$4 sm:$0xff]  }
 0x3c3   :  { %6091 = vmatprep.subr.bf16.mxu1 %v9098_v16  ;;  %v9222_v14 = vld [vmem:[#allocation11 + $0x20] sm:$0xff]   ;;  %v9180_v16 = vld [vmem:[#allocation8 + $0x150] ss:$8 sps:$4 sm:$0xff]  }
 0x3c6   :  { %6092 = vmatpush1.bf16.msra.mxu1 %v9096_v18  ;;  %v9183_v18 = vld [vmem:[#allocation8 + $0x160] ss:$8 sps:$4 sm:$0xff]  }
 0x3c7   :  { %6093 = vmatprep.subr.bf16.mxu1 %v9101_v19  ;;  %v9188_v19 = vld [vmem:[#allocation8 + $0x174] ss:$8 sps:$4 sm:$0xff]  }
 0x3ca   :  { %6094 = vmatpush1.bf16.msra.mxu1 %v9099_v33  ;;  %v9186_v33 = vld [vmem:[#allocation8 + $0x170] ss:$8 sps:$4 sm:$0xff]  }
 0x3cb   :  { %6095 = vmatprep.subr.bf16.mxu1 %v9104_v20  ;;  %v9191_v20 = vld [vmem:[#allocation8 + $0x184] ss:$8 sps:$4 sm:$0xff]  }
 0x3ce   :  { %6096 = vmatpush1.bf16.msra.mxu1 %v9102_v22  ;;  %v9189_v22 = vld [vmem:[#allocation8 + $0x180] ss:$8 sps:$4 sm:$0xff]  }
 0x3cf   :  { %6097 = vmatprep.subr.bf16.mxu1 %v9107_v23  ;;  %v9194_v23 = vld [vmem:[#allocation8 + $0x194] ss:$8 sps:$4 sm:$0xff]  }
 0x3d2   :  { %6098 = vmatpush1.bf16.msra.mxu1 %v9105_v48  ;;  %v9192_v48 = vld [vmem:[#allocation8 + $0x190] ss:$8 sps:$4 sm:$0xff]  }
 0x3d3   :  { %6099 = vmatprep.subr.bf16.mxu1 %v9110_v25  ;;  %v9197_v25 = vld [vmem:[#allocation8 + $0x1a4] ss:$8 sps:$4 sm:$0xff]  }
 0x3d6   :  { %6100 = vmatpush1.bf16.msra.mxu1 %v9108_v13  ;;  %v9195_v13 = vld [vmem:[#allocation8 + $0x1a0] ss:$8 sps:$4 sm:$0xff]  }
 0x3d7   :  { %6101 = vmatprep.subr.bf16.mxu1 %v9113_v26  ;;  %v9200_v26 = vld [vmem:[#allocation8 + $0x1b4] ss:$8 sps:$4 sm:$0xff]  }
 0x3da   :  { %6102 = vmatpush1.bf16.msra.mxu1 %v9111_v42  ;;  %v9198_v42 = vld [vmem:[#allocation8 + $0x1b0] ss:$8 sps:$4 sm:$0xff]  }
 0x3db   :  { %6103 = vmatprep.subr.bf16.mxu1 %v9116_v27  ;;  %v9203_v27 = vld [vmem:[#allocation8 + $0x1c4] ss:$8 sps:$4 sm:$0xff]  }
 0x3de   :  { %6104 = vmatpush1.bf16.msra.mxu1 %v9114_v28  ;;  %v9201_v28 = vld [vmem:[#allocation8 + $0x1c0] ss:$8 sps:$4 sm:$0xff]  }
 0x3df   :  { %7766 = vmatprep.subr.bf16.mxu1 %v9213_v56  ;;  %v9223_v56 = vld [vmem:[#allocation11 + $0x68] sm:$0xff]  }
 0x3e1   :  { %6122 = vmatmul.mubr.bf16.vlgmr.msra.gmra.mrb[4].mxu1 %v9669_v49  ;;  %v5051_v49 = vadd.f32 %v9609_v3, %v1001_v54  ;;  %v9209_v54 = vld [vmem:[#allocation8 + $0x1e4] ss:$8 sps:$4 sm:$0xff]  }
 0x3e2   :  { %7767 = vmatpush3.bf16.msra.mxu1 %v9214_v57  ;;  %v9224_v57 = vld [vmem:[#allocation11 + $0x28] sm:$0xff]  }
 0x3e3   :  { %7768 = vmatprep.subr.bf16.mxu1 %v9215_v58  ;;  %v9225_v58 = vld [vmem:[#allocation11 + $0x70] sm:$0xff]  }
 0x3e6   :  { %7769 = vmatpush3.bf16.msra.mxu1 %v9216_v61  ;;  %v9228_v61 = vld [vmem:[#allocation11 + $0x38] sm:$0xff]  }
 0x3e7   :  { %7770 = vmatprep.subr.bf16.mxu1 %v9217_v62  ;;  %v6224_v62 = vld [vmem:[#allocation10] sm:$0x3] }
 0x3ea   :  { %7771 = vmatpush3.bf16.msra.mxu1 %v9218_v1 }
 0x3eb   :  { %7772 = vmatprep.subr.bf16.mxu1 %v9219_v4 }
 0x3ee   :  { %7773 = vmatpush3.bf16.msra.mxu1 %v9220_v9 }
 0x3ef   :  { %7774 = vmatprep.subr.bf16.mxu1 %v9221_v10 }
 0x3f2   :  { %7775 = vmatpush3.bf16.msra.mxu1 %v9222_v14 }
 0x3f3   :  { %7776 = vmatprep.subr.bf16.mxu1 %v9223_v56 }
 0x3f6   :  { %7777 = vmatpush3.bf16.msra.mxu1 %v9224_v57 }
 0x3f7   :  { %7778 = vmatprep.subr.bf16.mxu1 %v9225_v58 }
 0x435   :  { %v5564_v36 = vpop.f32.mrb[0].mxu0 }
 0x436   :  { %v7789_v47 = vadd.f32 %v5564_v36, %v5049_v60  ;;  %v5566_v39 = vpop.f32.mrb[1].mxu0  ;;  %v9207_v60 = vld [vmem:[#allocation8 + $0x1e0] ss:$8 sps:$4 sm:$0xff]   ;;  %v9210_v36 = vld [vmem:[#allocation8 + $0x1f0] ss:$8 sps:$4 sm:$0xff]  }
 0x437   :  { %v7791_v41 = vadd.f32 %v5566_v39, %v5051_v49  ;;  %v5568_v55 = vpop.f32.mrb[2].mxu0  ;;  %v9212_v49 = vld [vmem:[#allocation8 + $0x1f4] ss:$8 sps:$4 sm:$0xff]  }
 0x438   :  { %v6140_v43 = vmul.f32 0.2, %v7789_v47  ;;  %v7793_v45 = vadd.f32 %v5568_v55, %v5053_v37  ;;  %v5570_v15 = vpop.f32.mrb[3].mxu0  ;;  %vm6132_vm0 = vcmp.gt.f32.partialorder %v7789_v47, 0.0  ;;  %v1004_v37 = vsub.s32 2, %v9677_v30 }
 0x439   :  { %v6141_v46 = vmul.f32 0.2, %v7791_v41  ;;  %v7795_v6 = vadd.f32 %v5570_v15, %v5055_v40  ;;  %vm6133_vm1 = vcmp.gt.f32.partialorder %v7791_v41, 0.0 }
 0x43a   :  { %vm6136_vm2 = vcmp.gt.f32.partialorder %v7793_v45, 0.0  ;;  %v6144_v2 = vmul.f32 0.2, %v7793_v45  ;;  %v6148_v50 = vsel %vm6132_vm0, %v7789_v47, %v6140_v43  ;;  %v1008_v47 = vsub.s32 3, %v9677_v30 }
 0x43b   :  { %vm6137_vm3 = vcmp.gt.f32.partialorder %v7795_v6, 0.0  ;;  %v6145_v3 = vmul.f32 0.2, %v7795_v6  ;;  %v6149_v51 = vsel %vm6133_vm1, %v7791_v41, %v6141_v46  ;;  %v1005_v39 = vrot.slane %v9680_v31, %v1004_v37 }
 0x43c   :  { %v6152_v44 = vsel %vm6136_vm2, %v7793_v45, %v6144_v2  ;;  %v1009_v40 = vrot.slane %v9680_v31, %v1008_v47 }
 0x43d   :  { %v6156_v5 = vpack.c.bf16 %v6152_v44, %v6148_v50  ;;  %v6153_v52 = vsel %vm6137_vm3, %v7795_v6, %v6145_v3 }
 0x43e   :  { %v6157_v53 = vpack.c.bf16 %v6153_v52, %v6149_v51 }
 0x440   :  { %6588 = vmatprep.mubr.bf16.mxu0 %v6157_v53 }
 0x441   :  { %6589 = vmatmul.mubr.bf16.vlgmr.msra.gmra.mrb[4].mxu0 %v6156_v5 }
 0x442   :  { %6600 = vmatpush1.bf16.msra.mxu0 %v9165_v7 }
 0x443   :  { %6601 = vmatprep.subr.bf16.mxu0 %v9170_v24 }
 0x446   :  { %6602 = vmatpush1.bf16.msra.mxu0 %v9168_v59  ;;  %v9226_v59 = vld [vmem:[#allocation11 + $0x30] sm:$0xff]  }
 0x447   :  { %6603 = vmatprep.subr.bf16.mxu0 %v9173_v21  ;;  %7779 = vmatpush3.bf16.msra.mxu1 %v9226_v59  ;;  %v9227_v21 = vld [vmem:[#allocation11 + $0x78] sm:$0xff]  }
 0x448   :  { %7780 = vmatprep.subr.bf16.mxu1 %v9227_v21 }
 0x44a   :  { %6604 = vmatpush1.bf16.msra.mxu0 %v9171_v63  ;;  %v6229_v63 = vrot.slane %v6224_v62, %v996_v38 }
 0x44b   :  { %6605 = vmatprep.subr.bf16.mxu0 %v9176_v0  ;;  %7781 = vmatpush3.bf16.msra.mxu1 %v9228_v61  ;;  %v6233_v0 = vrot.slane %v6224_v62, %v1000_v32 }
 0x44e   :  { %6606 = vmatpush1.bf16.msra.mxu0 %v9174_v34 }
 0x44f   :  { %6607 = vmatprep.subr.bf16.mxu0 %v9179_v8 }
 0x452   :  { %6608 = vmatpush1.bf16.msra.mxu0 %v9177_v11 }
 0x453   :  { %6609 = vmatprep.subr.bf16.mxu0 %v9182_v12 }
 0x456   :  { %6610 = vmatpush1.bf16.msra.mxu0 %v9180_v16 }
 0x457   :  { %6611 = vmatprep.subr.bf16.mxu0 %v9185_v17 }
 0x45a   :  { %6612 = vmatpush1.bf16.msra.mxu0 %v9183_v18 }
 0x45b   :  { %6613 = vmatprep.subr.bf16.mxu0 %v9188_v19 }
 0x45e   :  { %6614 = vmatpush1.bf16.msra.mxu0 %v9186_v33 }
 0x45f   :  { %6615 = vmatprep.subr.bf16.mxu0 %v9191_v20 }
 0x462   :  { %6616 = vmatpush1.bf16.msra.mxu0 %v9189_v22 }
 0x463   :  { %6617 = vmatprep.subr.bf16.mxu0 %v9194_v23  ;;  %v7738_v23 = vld [vmem:[#allocation13] ss:$0 sm:$0xff] }
 0x466   :  { %6618 = vmatpush1.bf16.msra.mxu0 %v9192_v48 }
 0x467   :  { %6619 = vmatprep.subr.bf16.mxu0 %v9197_v25 }
 0x46a   :  { %6620 = vmatpush1.bf16.msra.mxu0 %v9195_v13 }
 0x46b   :  { %6621 = vmatprep.subr.bf16.mxu0 %v9200_v26 }
 0x46e   :  { %6622 = vmatpush1.bf16.msra.mxu0 %v9198_v42 }
 0x46f   :  { %6623 = vmatprep.subr.bf16.mxu0 %v9203_v27 }
 0x472   :  { %6624 = vmatpush1.bf16.msra.mxu0 %v9201_v28 }
 0x473   :  { %6625 = vmatprep.subr.bf16.mxu0 %v9206_v29 }
 0x476   :  { %6626 = vmatpush1.bf16.msra.mxu0 %v9204_v35 }
 0x477   :  { %6627 = vmatprep.subr.bf16.mxu0 %v9209_v54 }
 0x47a   :  { %6628 = vmatpush1.bf16.msra.mxu0 %v9207_v60 }
 0x47b   :  { %6629 = vmatprep.subr.bf16.mxu0 %v9212_v49 }
 0x47e   :  { %6630 = vmatpush1.bf16.msra.mxu0 %v9210_v36 }
 0x4b4   :  { %v6123_v41 = vpop.f32.mrb[4].mxu1 }
 0x4b5   :  { %v7796_v55 = vadd.f32 %v6123_v41, %v1005_v39  ;;  %v6125_v43 = vpop.f32.mrb[5].mxu1 }
 0x4b6   :  { %v7797_v45 = vadd.f32 %v6125_v43, %v1009_v40  ;;  %v6127_v15 = vpop.f32.mrb[6].mxu1 }
 0x4b7   :  { %v6142_v46 = vmul.f32 0.2, %v7796_v55  ;;  %v7798_v6 = vadd.f32 %v6127_v15, %v1005_v39  ;;  %v6129_v2 = vpop.f32.mrb[7].mxu1  ;;  %vm6134_vm4 = vcmp.gt.f32.partialorder %v7796_v55, 0.0 }
 0x4b8   :  { %v6143_v3 = vmul.f32 0.2, %v7797_v45  ;;  %v7799_v50 = vadd.f32 %v6129_v2, %v1009_v40  ;;  %vm6135_vm5 = vcmp.gt.f32.partialorder %v7797_v45, 0.0 }
 0x4b9   :  { %vm6138_vm6 = vcmp.gt.f32.partialorder %v7798_v6, 0.0  ;;  %v6146_v44 = vmul.f32 0.2, %v7798_v6  ;;  %v6150_v51 = vsel %vm6134_vm4, %v7796_v55, %v6142_v46 }
 0x4ba   :  { %vm6139_vm7 = vcmp.gt.f32.partialorder %v7799_v50, 0.0  ;;  %v6147_v5 = vmul.f32 0.2, %v7799_v50  ;;  %v6151_v31 = vsel %vm6135_vm5, %v7797_v45, %v6143_v3 }
 0x4bb   :  { %v6154_v52 = vsel %vm6138_vm6, %v7798_v6, %v6146_v44 }
 0x4bc   :  { %v6158_v53 = vpack.c.bf16 %v6154_v52, %v6150_v51  ;;  %v6155_v7 = vsel %vm6139_vm7, %v7799_v50, %v6147_v5 }
 0x4bd   :  { %v6159_v24 = vpack.c.bf16 %v6155_v7, %v6151_v31 }
 0x4bf   :  { %6631 = vmatprep.mubr.bf16.mxu0 %v6159_v24 }
 0x4c0   :  { %6632 = vmatmul.mubr.bf16.vlgmr.msra.gmra.mrb[4].mxu0 %v6158_v53 }
 0x593   :  { %v6633_v1 = vpop.f32.mrb[4].mxu0 }
 0x594   :  { %v7800_v4 = vadd.f32 %v6633_v1, %v6229_v63  ;;  %v6635_v34 = vpop.f32.mrb[5].mxu0 }
 0x595   :  { %v7801_v8 = vadd.f32 %v6635_v34, %v6233_v0  ;;  %v6637_v9 = vpop.f32.mrb[6].mxu0 }
 0x596   :  { %v6646_v10 = vmul.f32 0.2, %v7800_v4  ;;  %v7802_v11 = vadd.f32 %v6637_v9, %v6229_v63  ;;  %v6639_v12 = vpop.f32.mrb[7].mxu0  ;;  %vm6642_vm8 = vcmp.gt.f32.partialorder %v7800_v4, 0.0 }
 0x597   :  { %v6647_v14 = vmul.f32 0.2, %v7801_v8  ;;  %v7803_v16 = vadd.f32 %v6639_v12, %v6233_v0  ;;  %vm6643_vm9 = vcmp.gt.f32.partialorder %v7801_v8, 0.0 }
 0x598   :  { %vm6644_vm10 = vcmp.gt.f32.partialorder %v7802_v11, 0.0  ;;  %v6648_v17 = vmul.f32 0.2, %v7802_v11  ;;  %v6650_v38 = vsel %vm6642_vm8, %v7800_v4, %v6646_v10 }
 0x599   :  { %vm6645_vm11 = vcmp.gt.f32.partialorder %v7803_v16, 0.0  ;;  %v6649_v18 = vmul.f32 0.2, %v7803_v16  ;;  %v6651_v32 = vsel %vm6643_vm9, %v7801_v8, %v6647_v14 }
 0x59a   :  { %v6652_v19 = vsel %vm6644_vm10, %v7802_v11, %v6648_v17 }
 0x59b   :  { %v6654_v30 = vpack.c.bf16 %v6652_v19, %v6650_v38  ;;  %v6653_v33 = vsel %vm6645_vm11, %v7803_v16, %v6649_v18 }
 0x59c   :  { %v6655_v20 = vpack.c.bf16 %v6653_v33, %v6651_v32 }
 0x59e   :  { %6823 = vmatprep.mubr.bf16.mxu1 %v6655_v20 }
 0x59f   :  { %6824 = vmatmul.mubr.bf16.vlgmr.msra.gmra.mrb[8].mxu1 %v6654_v30 }
 0x672   :  { %v7782_v22 = vpop.f32.mrb[8].mxu1 }
 0x673   :  { %v7783_v48 = vpop.f32.mrb[9].mxu1 }
 0x674   :  { %v7784_v25 = vadd.f32 %v7783_v48, %v7782_v22  ;;  %v7785_v13 = vpop.f32.mrb[10].mxu1 }
 0x675   :  { %v7786_v26 = vpop.f32.mrb[11].mxu1 }
 0x676   :  { %v6826_v42 = vadd.f32 %v7784_v25, %v7738_v23  ;;  %v7787_v27 = vadd.f32 %v7786_v26, %v7785_v13 }
 0x678   :  { %v7755_v28 = vmul.f32 -1.442695, %v6826_v42  ;;  %v6829_v29 = vadd.f32 %v7787_v27, %v7738_v23 }
 0x67a   :  { %9229 = vpow2.f32 %v7755_v28  ;;  %v7756_v35 = vmul.f32 -1.442695, %v6829_v29 }
 0x67c   :  { %9231 = vpow2.f32 %v7756_v35 }
 0x684   :  { %v9230_v54 = vpop.eup %9229 }
 0x685   :  { %v6838_v60 = vadd.f32 1.0, %v9230_v54 }
 0x686   :  { %v9232_v49 = vpop.eup %9231 }
 0x687   :  { %v6839_v36 = vadd.f32 1.0, %v9232_v49  ;;  %9233 = vrcp.f32 %v6838_v60 }
 0x689   :  { %9235 = vrcp.f32 %v6839_v36 }
 0x691   :  { %v9234_v37 = vpop.eup %9233 }
 0x693   :  { %v9236_v47 = vpop.eup %9235 }
 0x694   :  { %v7764_v39 = vpack.c.bf16 %v9236_v47, %v9234_v37 }
 0x696   :  { %7765 = vst [vmem:[#allocation14] sm:$0xff] %v7764_v39  }
 0x697   :  { %9402 = shalt.err (!%p9399_p4)
}
 0x698   :  { %s9403_s21 = scalar_lea.hbm %s9723_s7, 128 }
 0x699   :  { %p9404_p5 = scmp.ne.s32.totalorder %s9723_s7, %s9403_s21  ;;  %p9407_p6 = scmp.lt.u32.totalorder %s9403_s21, %s9723_s7 }
 0x69b   :  { %p9409_p7 = pnand %p9407_p6, %p9404_p5 }
 0x69d   :  { %9412 = shalt.err (!%p9409_p7)
}
 0x69e   :  { %6865 = dma.vmem_to_hbm [thread:$0]  %s6860_s18, 128, %s9723_s7, [#allocation4], %s9430_s3, %s9430_s3, %s9431_s15  }
 0x69f   :  { %9421 = dma.done.wait [#allocation4], 128  }
 0x6a0   :  { %9422 = vsyncadd [#allocation4], 4294967168 }
 0x6a1   :  { %6869 = vsyncpa [#allocation3], 1 }
 0x6a2   :  { %6870 = vsyncpa [#allocation6], 1 }
 0x6a3   :  { %6871 = vsyncpa [#allocation9], 1 }
 0x6a4   :  { %6872 = vsyncpa [#allocation12], 1 }
 0x6a5   :  { %6873 = vsyncpa [#allocation4], 1 }

</bundles_post_ra>
